<compile_context>
chip_gen: v7x
topology: tpu7x:2x2x1
jax: 0.10.0
libtpu: 0.0.40
codegen_flags: <defaults>
</compile_context>

<pallas_src>
import functools

import jax
import jax.numpy as jnp
from jax.experimental import pallas as pl
from jax.experimental.pallas import tpu as pltpu


def _round_up(x, m):
    return ((x + m - 1) // m) * m


def _fold_bn(gamma, beta, mean, var, eps):
    scale = gamma / jnp.sqrt(var + eps)
    return scale, beta - mean * scale


def _pack_weights(w, cp_in, cp_out, dtype):
    """(3,3,Cin,Cout) -> (9, cp_in, cp_out): one MXU slab per tap, zero channel pad."""
    kh, kw, ci, co = w.shape
    wp = jnp.zeros((kh * kw, cp_in, cp_out), dtype)
    return wp.at[:, :ci, :co].set(w.reshape(kh * kw, ci, co).astype(dtype))


def _pack_params(conv_bias, gamma, beta, mean, var, eps, cp):
    """Rows: [conv bias, folded BN scale, folded BN bias], zero padded to cp (f32)."""
    scale, bias_bn = _fold_bn(gamma.astype(jnp.float32), beta.astype(jnp.float32),
                              mean.astype(jnp.float32), var.astype(jnp.float32), eps)
    co = conv_bias.shape[0]
    p = jnp.zeros((3, cp), jnp.float32)
    p = p.at[0, :co].set(conv_bias.astype(jnp.float32))
    p = p.at[1, :co].set(scale)
    p = p.at[2, :co].set(bias_bn)
    return p


def conv_block_forward_nhwc(x_nhwc, p1, p2, eps=1e-5, compute_dtype=jnp.bfloat16):
    """Fused _ConvBlock forward in NHWC. x: (N,H,W,Cin) -> (N,H,W,Cout)."""
    N, H, W, cin = x_nhwc.shape
    c1 = p1["w"].shape[-1]
    c2 = p2["w"].shape[-1]

    cin_p = _round_up(cin, 8)            # sublane-friendly K for the stage-1 matmul
    cp1 = _round_up(c1, 128)             # lane-dense mid channels / matmul N
    cp2 = _round_up(c2, 128)             # lane-dense output channels
    Wp = _round_up(W + 2, 8)             # padded row stride (sublane multiple)
    M = H * Wp                           # matmul M; row p = y*Wp + x (x < W valid)
    S = _round_up(Wp + 1, 16)            # tile-aligned flat offset of pixel (0,0) in mid
    MID_ROWS = _round_up(S + (H + 1) * Wp + 1, 8)
    XF_ROWS = (H + 2) * Wp + 8           # +8 rows so the (dy=2,dx=2) tap slice stays in-bounds

    out_dtype = x_nhwc.dtype

    # Spatial halo + row-stride + channel-to-8 padding done once in the wrapper
    # (cheap, fusable XLA pad); flattened so every in-kernel tap is contiguous.
    xb = x_nhwc.astype(compute_dtype)
    xp = jnp.pad(xb, ((0, 0), (1, 1), (1, Wp - W - 1), (0, cin_p - cin)))
    xf = jnp.pad(xp.reshape(N, (H + 2) * Wp, cin_p),
                 ((0, 0), (0, XF_ROWS - (H + 2) * Wp), (0, 0)))

    w1 = _pack_weights(p1["w"], cin_p, cp1, compute_dtype)       # (9, cin_p, cp1)
    w2 = _pack_weights(p2["w"], cp1, cp2, compute_dtype)         # (9, cp1,  cp2)
    q1 = _pack_params(p1["b"], p1["gamma"], p1["beta"], p1["mean"], p1["var"], eps, cp1)
    q2 = _pack_params(p2["b"], p2["gamma"], p2["beta"], p2["mean"], p2["var"], eps, cp2)

    # 1.0 for the W valid columns of each flattened row, 0.0 for the Wp-W pad columns.
    mask = jnp.tile((jnp.arange(Wp) < W).astype(jnp.float32), H).reshape(M, 1)

    def kernel(x_ref, w1_ref, q1_ref, w2_ref, q2_ref, mask_ref, o_ref, mid_ref):
        def conv3x3(tap, w_ref, q_ref):
            # 9 accumulating MXU matmuls straight off contiguous tap slices.
            acc = None
            for dy in range(3):
                for dx in range(3):
                    t = dy * 3 + dx
                    d = jnp.dot(tap(dy, dx), w_ref[t],
                                preferred_element_type=jnp.float32)
                    acc = d if acc is None else acc + d
            y = jnp.maximum(acc + q_ref[0:1, :], 0.0)            # conv bias + ReLU (f32)
            return y * q_ref[1:2, :] + q_ref[2:3, :]             # folded inference BN (f32)

        # ---- stage 1: taps read straight from the pre-padded flattened input.
        y1 = conv3x3(lambda dy, dx: x_ref[0, dy * Wp + dx: dy * Wp + dx + M, :],
                     w1_ref, q1_ref)
        # Zero the Wp-W pad columns so they become stage-2's zero halo.
        y1 = y1 * mask_ref[...]

        # Only the head/tail bands of mid fall outside the store below; re-zero
        # just those each step (tiny), keeping every grid step self-contained.
        tail = MID_ROWS - (S + M)
        mid_ref[0:S, :] = jnp.zeros((S, cp1), compute_dtype)
        mid_ref[S + M:MID_ROWS, :] = jnp.zeros((tail, cp1), compute_dtype)
        # One tile-aligned, contiguous store of the whole stage-1 result.
        mid_ref[S:S + M, :] = y1.astype(compute_dtype)

        # ---- stage 2: same flattened-tap trick against the VMEM-resident mid.
        y2 = conv3x3(
            lambda dy, dx: mid_ref[S + (dy - 1) * Wp + (dx - 1):
                                   S + (dy - 1) * Wp + (dx - 1) + M, :],
            w2_ref, q2_ref)
        o_ref[0] = y2.astype(o_ref.dtype)                         # lane-dense store

    # VMEM budget -> explicit vmem_limit_bytes (review #6).
    def _nbytes(shape, dtype):
        n = 1
        for s in shape[:-1]:
            n *= _round_up(s, 16)
        return n * _round_up(shape[-1], 128) * jnp.dtype(dtype).itemsize

    vmem_est = (2 * _nbytes((XF_ROWS, cin_p), compute_dtype)      # input block (2 bufs)
                + 2 * _nbytes((M, cp2), out_dtype)                # output block (2 bufs)
                + _nbytes((9 * cin_p, cp1), compute_dtype)        # w1 (single copy)
                + _nbytes((9 * cp1, cp2), compute_dtype)          # w2 (single copy)
                + _nbytes((3, cp1), jnp.float32)
                + _nbytes((3, cp2), jnp.float32)
                + _nbytes((M, 1), jnp.float32)                    # mask
                + _nbytes((MID_ROWS, cp1), compute_dtype)         # mid scratch
                + 4 * _nbytes((M, max(cp1, cp2)), jnp.float32))   # live f32 accumulators
    vmem_limit = min(64 * 1024 * 1024, max(int(1.5 * vmem_est), 16 * 1024 * 1024))

    vmem = pltpu.MemorySpace.VMEM
    out_p = pl.pallas_call(
        kernel,
        out_shape=jax.ShapeDtypeStruct((N, M, cp2), out_dtype),
        grid_spec=pltpu.PrefetchScalarGridSpec(
            num_scalar_prefetch=0,
            grid=(N,),
            in_specs=[
                pl.BlockSpec((1, XF_ROWS, cin_p), lambda n: (n, 0, 0)),
                # Grid-invariant operands: whole-array VMEM residents
                # (single-buffered -> no per-step re-DMA, half the footprint).
                pl.BlockSpec(memory_space=vmem),   # w1
                pl.BlockSpec(memory_space=vmem),   # q1
                pl.BlockSpec(memory_space=vmem),   # w2
                pl.BlockSpec(memory_space=vmem),   # q2
                pl.BlockSpec(memory_space=vmem),   # mask
            ],
            out_specs=pl.BlockSpec((1, M, cp2), lambda n: (n, 0, 0)),
            scratch_shapes=[pltpu.VMEM((MID_ROWS, cp1), compute_dtype)],
        ),
        compiler_params=pltpu.CompilerParams(
            dimension_semantics=("parallel",),
            vmem_limit_bytes=vmem_limit),
    )(xf, w1, q1, w2, q2, mask)

    # Drop the Wp-W pad columns and the channel lane padding (cheap XLA slice,
    # fused into the boundary transpose).
    return out_p.reshape(N, H, Wp, cp2)[:, :, :W, :c2]


def conv_block_forward(x_nchw, p1, p2, *, compute_dtype=jnp.bfloat16):
    """_ConvBlock.forward matching the PyTorch NCHW interface."""
    x = jnp.transpose(x_nchw, (0, 2, 3, 1))            # NCHW -> NHWC (boundary only)
    y = conv_block_forward_nhwc(x, p1, p2, compute_dtype=compute_dtype)
    return jnp.transpose(y, (0, 3, 1, 2))              # NHWC -> NCHW


def init_conv_bn_params(key, cin, cout, dtype=jnp.float32):
    kw, kb, kg, kbe = jax.random.split(key, 4)
    fan_in = cin * 9
    w = jax.random.normal(kw, (3, 3, cin, cout), dtype) * (1.0 / fan_in) ** 0.5
    b = jax.random.normal(kb, (cout,), dtype) * 0.01
    gamma = 1.0 + 0.1 * jax.random.normal(kg, (cout,), dtype)
    beta = 0.1 * jax.random.normal(kbe, (cout,), dtype)
    return dict(w=w, b=b, gamma=gamma, beta=beta,
                mean=jnp.zeros((cout,), dtype), var=jnp.ones((cout,), dtype))


# ----------------------- pure-JAX reference (correctness) -----------------------
def _ref_stage(x, w, b, gamma, beta, mean, var, eps=1e-5):
    y = jax.lax.conv_general_dilated(
        x, w, window_strides=(1, 1), padding=((1, 1), (1, 1)),
        dimension_numbers=("NHWC", "HWIO", "NHWC"))
    y = jnp.maximum(y + b, 0.0)
    scale = gamma / jnp.sqrt(var + eps)
    return y * scale + (beta - mean * scale)


def _reference(x_nchw, p1, p2):
    x = jnp.transpose(x_nchw, (0, 2, 3, 1))
    x = _ref_stage(x, p1["w"], p1["b"], p1["gamma"], p1["beta"], p1["mean"], p1["var"])
    x = _ref_stage(x, p2["w"], p2["b"], p2["gamma"], p2["beta"], p2["mean"], p2["var"])
    return jnp.transpose(x, (0, 3, 1, 2))


if __name__ == "__main__":
    key = jax.random.PRNGKey(0)
    k_x, k_p1, k_p2 = jax.random.split(key, 3)

    N, Cin, Cout, H, W = 2, 4, 8, 16, 16
    x = jax.random.normal(k_x, (N, Cin, H, W), jnp.float32)

    p1 = init_conv_bn_params(k_p1, Cin, Cout)
    p2 = init_conv_bn_params(k_p2, Cout, Cout)

    ref = jax.block_until_ready(_reference(x, p1, p2))

    # Exactness check: f32 compute path must match the XLA conv reference tightly.
    fwd_f32 = jax.jit(functools.partial(conv_block_forward, compute_dtype=jnp.float32))
    out_f32 = jax.block_until_ready(fwd_f32(x, p1, p2))
    assert out_f32.shape == (N, Cout, H, W), out_f32.shape
    assert out_f32.dtype == jnp.float32
    assert jnp.allclose(out_f32, ref, atol=1e-4, rtol=1e-4), (
        float(jnp.max(jnp.abs(out_f32 - ref))))

    # Default optimized path: bf16 MXU operands, f32 accumulate/epilogue
    # (looser tolerance vs the f32 reference, per review note).
    fwd = jax.jit(conv_block_forward)
    out = jax.block_until_ready(fwd(x, p1, p2))
    assert out.shape == (N, Cout, H, W), out.shape
    assert out.dtype == jnp.float32
    max_err = float(jnp.max(jnp.abs(out - ref)))
    assert max_err < 1e-1, max_err

    print("KERNEL_OK")
</pallas_src>

<mosaic_0001>
module attributes {stable_mosaic.version = 11 : i64} {
  func.func @kernel(%arg0: i32, %arg1: memref<1x440x8xf32, #tpu.memory_space<vmem>>, %arg2: memref<9x8x128xf32, #tpu.memory_space<vmem>>, %arg3: memref<3x128xf32, #tpu.memory_space<vmem>>, %arg4: memref<9x128x128xf32, #tpu.memory_space<vmem>>, %arg5: memref<3x128xf32, #tpu.memory_space<vmem>>, %arg6: memref<384x1xf32, #tpu.memory_space<vmem>>, %arg7: memref<1x384x128xf32, #tpu.memory_space<vmem>>, %arg8: memref<448x128xf32, #tpu.memory_space<vmem>>) attributes {dimension_semantics = [#tpu.dimension_semantics<parallel>], iteration_bounds = array<i64: 2>, scalar_prefetch = 0 : i64, scratch_operands = 1 : i64, tpu.core_type = #tpu.core_type<tc>, window_params = [{transform_indices = @transform_0, window_bounds = array<i64: 1, 440, 8>}, {pipeline_mode = #tpu.pipeline_mode<synchronous>, transform_indices = @transform_1, window_bounds = array<i64: 9, 8, 128>}, {pipeline_mode = #tpu.pipeline_mode<synchronous>, transform_indices = @transform_2, window_bounds = array<i64: 3, 128>}, {pipeline_mode = #tpu.pipeline_mode<synchronous>, transform_indices = @transform_3, window_bounds = array<i64: 9, 128, 128>}, {pipeline_mode = #tpu.pipeline_mode<synchronous>, transform_indices = @transform_4, window_bounds = array<i64: 3, 128>}, {pipeline_mode = #tpu.pipeline_mode<synchronous>, transform_indices = @transform_5, window_bounds = array<i64: 384, 1>}, {transform_indices = @transform_6, window_bounds = array<i64: 1, 384, 128>}]} {
    %c0 = arith.constant 0 : index
    %c0_0 = arith.constant 0 : index
    %c0_1 = arith.constant 0 : index
    %0 = vector.load %arg1[%c0, %c0_0, %c0_1] : memref<1x440x8xf32, #tpu.memory_space<vmem>>, vector<1x384x8xf32>
    %1 = vector.shape_cast %0 : vector<1x384x8xf32> to vector<384x8xf32>
    %c0_2 = arith.constant 0 : index
    %c0_3 = arith.constant 0 : index
    %c0_4 = arith.constant 0 : index
    %2 = vector.load %arg2[%c0_2, %c0_3, %c0_4] : memref<9x8x128xf32, #tpu.memory_space<vmem>>, vector<1x8x128xf32>
    %3 = vector.shape_cast %2 : vector<1x8x128xf32> to vector<8x128xf32>
    %cst = arith.constant dense<0.000000e+00> : vector<384x128xf32>
    %4 = tpu.matmul %1, %3, %cst {dimension_numbers = #tpu.dot_dimension_numbers<[1], [0], [0], [1], [0, 0, 1, 1], [], []>} : vector<384x8xf32>, vector<8x128xf32>, vector<384x128xf32> -> vector<384x128xf32>
    %c0_5 = arith.constant 0 : index
    %c1 = arith.constant 1 : index
    %c0_6 = arith.constant 0 : index
    %5 = vector.load %arg1[%c0_5, %c1, %c0_6] : memref<1x440x8xf32, #tpu.memory_space<vmem>>, vector<1x384x8xf32>
    %6 = vector.shape_cast %5 : vector<1x384x8xf32> to vector<384x8xf32>
    %c1_7 = arith.constant 1 : index
    %c0_8 = arith.constant 0 : index
    %c0_9 = arith.constant 0 : index
    %7 = vector.load %arg2[%c1_7, %c0_8, %c0_9] : memref<9x8x128xf32, #tpu.memory_space<vmem>>, vector<1x8x128xf32>
    %8 = vector.shape_cast %7 : vector<1x8x128xf32> to vector<8x128xf32>
    %cst_10 = arith.constant dense<0.000000e+00> : vector<384x128xf32>
    %9 = tpu.matmul %6, %8, %cst_10 {dimension_numbers = #tpu.dot_dimension_numbers<[1], [0], [0], [1], [0, 0, 1, 1], [], []>} : vector<384x8xf32>, vector<8x128xf32>, vector<384x128xf32> -> vector<384x128xf32>
    %10 = arith.addf %4, %9 : vector<384x128xf32>
    %c0_11 = arith.constant 0 : index
    %c2 = arith.constant 2 : index
    %c0_12 = arith.constant 0 : index
    %11 = vector.load %arg1[%c0_11, %c2, %c0_12] : memref<1x440x8xf32, #tpu.memory_space<vmem>>, vector<1x384x8xf32>
    %12 = vector.shape_cast %11 : vector<1x384x8xf32> to vector<384x8xf32>
    %c2_13 = arith.constant 2 : index
    %c0_14 = arith.constant 0 : index
    %c0_15 = arith.constant 0 : index
    %13 = vector.load %arg2[%c2_13, %c0_14, %c0_15] : memref<9x8x128xf32, #tpu.memory_space<vmem>>, vector<1x8x128xf32>
    %14 = vector.shape_cast %13 : vector<1x8x128xf32> to vector<8x128xf32>
    %cst_16 = arith.constant dense<0.000000e+00> : vector<384x128xf32>
    %15 = tpu.matmul %12, %14, %cst_16 {dimension_numbers = #tpu.dot_dimension_numbers<[1], [0], [0], [1], [0, 0, 1, 1], [], []>} : vector<384x8xf32>, vector<8x128xf32>, vector<384x128xf32> -> vector<384x128xf32>
    %16 = arith.addf %10, %15 : vector<384x128xf32>
    %c0_17 = arith.constant 0 : index
    %c24 = arith.constant 24 : index
    %c0_18 = arith.constant 0 : index
    %17 = vector.load %arg1[%c0_17, %c24, %c0_18] : memref<1x440x8xf32, #tpu.memory_space<vmem>>, vector<1x384x8xf32>
    %18 = vector.shape_cast %17 : vector<1x384x8xf32> to vector<384x8xf32>
    %c3 = arith.constant 3 : index
    %c0_19 = arith.constant 0 : index
    %c0_20 = arith.constant 0 : index
    %19 = vector.load %arg2[%c3, %c0_19, %c0_20] : memref<9x8x128xf32, #tpu.memory_space<vmem>>, vector<1x8x128xf32>
    %20 = vector.shape_cast %19 : vector<1x8x128xf32> to vector<8x128xf32>
    %cst_21 = arith.constant dense<0.000000e+00> : vector<384x128xf32>
    %21 = tpu.matmul %18, %20, %cst_21 {dimension_numbers = #tpu.dot_dimension_numbers<[1], [0], [0], [1], [0, 0, 1, 1], [], []>} : vector<384x8xf32>, vector<8x128xf32>, vector<384x128xf32> -> vector<384x128xf32>
    %22 = arith.addf %16, %21 : vector<384x128xf32>
    %c0_22 = arith.constant 0 : index
    %c25 = arith.constant 25 : index
    %c0_23 = arith.constant 0 : index
    %23 = vector.load %arg1[%c0_22, %c25, %c0_23] : memref<1x440x8xf32, #tpu.memory_space<vmem>>, vector<1x384x8xf32>
    %24 = vector.shape_cast %23 : vector<1x384x8xf32> to vector<384x8xf32>
    %c4 = arith.constant 4 : index
    %c0_24 = arith.constant 0 : index
    %c0_25 = arith.constant 0 : index
    %25 = vector.load %arg2[%c4, %c0_24, %c0_25] : memref<9x8x128xf32, #tpu.memory_space<vmem>>, vector<1x8x128xf32>
    %26 = vector.shape_cast %25 : vector<1x8x128xf32> to vector<8x128xf32>
    %cst_26 = arith.constant dense<0.000000e+00> : vector<384x128xf32>
    %27 = tpu.matmul %24, %26, %cst_26 {dimension_numbers = #tpu.dot_dimension_numbers<[1], [0], [0], [1], [0, 0, 1, 1], [], []>} : vector<384x8xf32>, vector<8x128xf32>, vector<384x128xf32> -> vector<384x128xf32>
    %28 = arith.addf %22, %27 : vector<384x128xf32>
    %c0_27 = arith.constant 0 : index
    %c26 = arith.constant 26 : index
    %c0_28 = arith.constant 0 : index
    %29 = vector.load %arg1[%c0_27, %c26, %c0_28] : memref<1x440x8xf32, #tpu.memory_space<vmem>>, vector<1x384x8xf32>
    %30 = vector.shape_cast %29 : vector<1x384x8xf32> to vector<384x8xf32>
    %c5 = arith.constant 5 : index
    %c0_29 = arith.constant 0 : index
    %c0_30 = arith.constant 0 : index
    %31 = vector.load %arg2[%c5, %c0_29, %c0_30] : memref<9x8x128xf32, #tpu.memory_space<vmem>>, vector<1x8x128xf32>
    %32 = vector.shape_cast %31 : vector<1x8x128xf32> to vector<8x128xf32>
    %cst_31 = arith.constant dense<0.000000e+00> : vector<384x128xf32>
    %33 = tpu.matmul %30, %32, %cst_31 {dimension_numbers = #tpu.dot_dimension_numbers<[1], [0], [0], [1], [0, 0, 1, 1], [], []>} : vector<384x8xf32>, vector<8x128xf32>, vector<384x128xf32> -> vector<384x128xf32>
    %34 = arith.addf %28, %33 : vector<384x128xf32>
    %c0_32 = arith.constant 0 : index
    %c48 = arith.constant 48 : index
    %c0_33 = arith.constant 0 : index
    %35 = vector.load %arg1[%c0_32, %c48, %c0_33] : memref<1x440x8xf32, #tpu.memory_space<vmem>>, vector<1x384x8xf32>
    %36 = vector.shape_cast %35 : vector<1x384x8xf32> to vector<384x8xf32>
    %c6 = arith.constant 6 : index
    %c0_34 = arith.constant 0 : index
    %c0_35 = arith.constant 0 : index
    %37 = vector.load %arg2[%c6, %c0_34, %c0_35] : memref<9x8x128xf32, #tpu.memory_space<vmem>>, vector<1x8x128xf32>
    %38 = vector.shape_cast %37 : vector<1x8x128xf32> to vector<8x128xf32>
    %cst_36 = arith.constant dense<0.000000e+00> : vector<384x128xf32>
    %39 = tpu.matmul %36, %38, %cst_36 {dimension_numbers = #tpu.dot_dimension_numbers<[1], [0], [0], [1], [0, 0, 1, 1], [], []>} : vector<384x8xf32>, vector<8x128xf32>, vector<384x128xf32> -> vector<384x128xf32>
    %40 = arith.addf %34, %39 : vector<384x128xf32>
    %c0_37 = arith.constant 0 : index
    %c49 = arith.constant 49 : index
    %c0_38 = arith.constant 0 : index
    %41 = vector.load %arg1[%c0_37, %c49, %c0_38] : memref<1x440x8xf32, #tpu.memory_space<vmem>>, vector<1x384x8xf32>
    %42 = vector.shape_cast %41 : vector<1x384x8xf32> to vector<384x8xf32>
    %c7 = arith.constant 7 : index
    %c0_39 = arith.constant 0 : index
    %c0_40 = arith.constant 0 : index
    %43 = vector.load %arg2[%c7, %c0_39, %c0_40] : memref<9x8x128xf32, #tpu.memory_space<vmem>>, vector<1x8x128xf32>
    %44 = vector.shape_cast %43 : vector<1x8x128xf32> to vector<8x128xf32>
    %cst_41 = arith.constant dense<0.000000e+00> : vector<384x128xf32>
    %45 = tpu.matmul %42, %44, %cst_41 {dimension_numbers = #tpu.dot_dimension_numbers<[1], [0], [0], [1], [0, 0, 1, 1], [], []>} : vector<384x8xf32>, vector<8x128xf32>, vector<384x128xf32> -> vector<384x128xf32>
    %46 = arith.addf %40, %45 : vector<384x128xf32>
    %c0_42 = arith.constant 0 : index
    %c50 = arith.constant 50 : index
    %c0_43 = arith.constant 0 : index
    %47 = vector.load %arg1[%c0_42, %c50, %c0_43] : memref<1x440x8xf32, #tpu.memory_space<vmem>>, vector<1x384x8xf32>
    %48 = vector.shape_cast %47 : vector<1x384x8xf32> to vector<384x8xf32>
    %c8 = arith.constant 8 : index
    %c0_44 = arith.constant 0 : index
    %c0_45 = arith.constant 0 : index
    %49 = vector.load %arg2[%c8, %c0_44, %c0_45] : memref<9x8x128xf32, #tpu.memory_space<vmem>>, vector<1x8x128xf32>
    %50 = vector.shape_cast %49 : vector<1x8x128xf32> to vector<8x128xf32>
    %cst_46 = arith.constant dense<0.000000e+00> : vector<384x128xf32>
    %51 = tpu.matmul %48, %50, %cst_46 {dimension_numbers = #tpu.dot_dimension_numbers<[1], [0], [0], [1], [0, 0, 1, 1], [], []>} : vector<384x8xf32>, vector<8x128xf32>, vector<384x128xf32> -> vector<384x128xf32>
    %52 = arith.addf %46, %51 : vector<384x128xf32>
    %c0_47 = arith.constant 0 : index
    %c0_48 = arith.constant 0 : index
    %53 = vector.load %arg3[%c0_47, %c0_48] : memref<3x128xf32, #tpu.memory_space<vmem>>, vector<1x128xf32>
    %54 = vector.broadcast %53 : vector<1x128xf32> to vector<384x128xf32>
    %55 = arith.addf %52, %54 : vector<384x128xf32>
    %cst_49 = arith.constant 0.000000e+00 : f32
    %56 = vector.broadcast %cst_49 : f32 to vector<384x128xf32>
    %57 = arith.maximumf %55, %56 : vector<384x128xf32>
    %c1_50 = arith.constant 1 : index
    %c0_51 = arith.constant 0 : index
    %58 = vector.load %arg3[%c1_50, %c0_51] : memref<3x128xf32, #tpu.memory_space<vmem>>, vector<1x128xf32>
    %59 = vector.broadcast %58 : vector<1x128xf32> to vector<384x128xf32>
    %60 = arith.mulf %57, %59 : vector<384x128xf32>
    %c2_52 = arith.constant 2 : index
    %c0_53 = arith.constant 0 : index
    %61 = vector.load %arg3[%c2_52, %c0_53] : memref<3x128xf32, #tpu.memory_space<vmem>>, vector<1x128xf32>
    %62 = vector.broadcast %61 : vector<1x128xf32> to vector<384x128xf32>
    %63 = arith.addf %60, %62 : vector<384x128xf32>
    %c0_54 = arith.constant 0 : index
    %c0_55 = arith.constant 0 : index
    %64 = vector.load %arg6[%c0_54, %c0_55] : memref<384x1xf32, #tpu.memory_space<vmem>>, vector<384x1xf32>
    %65 = vector.broadcast %64 : vector<384x1xf32> to vector<384x128xf32>
    %66 = arith.mulf %63, %65 : vector<384x128xf32>
    %cst_56 = arith.constant 0.000000e+00 : f32
    %67 = vector.broadcast %cst_56 : f32 to vector<32x128xf32>
    %c0_57 = arith.constant 0 : index
    %c0_58 = arith.constant 0 : index
    %68 = vector.load %arg8[%c0_57, %c0_58] : memref<448x128xf32, #tpu.memory_space<vmem>>, vector<32x128xf32>
    tpu.vector_store %arg8[%c0_57, %c0_58], %67 {strides = array<i32>} : memref<448x128xf32, #tpu.memory_space<vmem>>, vector<32x128xf32>,
    %cst_59 = arith.constant 0.000000e+00 : f32
    %69 = vector.broadcast %cst_59 : f32 to vector<32x128xf32>
    %c416 = arith.constant 416 : index
    %c0_60 = arith.constant 0 : index
    %70 = vector.load %arg8[%c416, %c0_60] : memref<448x128xf32, #tpu.memory_space<vmem>>, vector<32x128xf32>
    tpu.vector_store %arg8[%c416, %c0_60], %69 {strides = array<i32>} : memref<448x128xf32, #tpu.memory_space<vmem>>, vector<32x128xf32>,
    %c32 = arith.constant 32 : index
    %c0_61 = arith.constant 0 : index
    %71 = vector.load %arg8[%c32, %c0_61] : memref<448x128xf32, #tpu.memory_space<vmem>>, vector<384x128xf32>
    tpu.vector_store %arg8[%c32, %c0_61], %66 {strides = array<i32>} : memref<448x128xf32, #tpu.memory_space<vmem>>, vector<384x128xf32>,
    %c7_62 = arith.constant 7 : index
    %c0_63 = arith.constant 0 : index
    %72 = vector.load %arg8[%c7_62, %c0_63] : memref<448x128xf32, #tpu.memory_space<vmem>>, vector<384x128xf32>
    %c0_64 = arith.constant 0 : index
    %c0_65 = arith.constant 0 : index
    %c0_66 = arith.constant 0 : index
    %73 = vector.load %arg4[%c0_64, %c0_65, %c0_66] : memref<9x128x128xf32, #tpu.memory_space<vmem>>, vector<1x128x128xf32>
    %74 = vector.shape_cast %73 : vector<1x128x128xf32> to vector<128x128xf32>
    %cst_67 = arith.constant dense<0.000000e+00> : vector<384x128xf32>
    %75 = tpu.matmul %72, %74, %cst_67 {dimension_numbers = #tpu.dot_dimension_numbers<[1], [0], [0], [1], [0, 0, 1, 1], [], []>} : vector<384x128xf32>, vector<128x128xf32>, vector<384x128xf32> -> vector<384x128xf32>
    %c8_68 = arith.constant 8 : index
    %c0_69 = arith.constant 0 : index
    %76 = vector.load %arg8[%c8_68, %c0_69] : memref<448x128xf32, #tpu.memory_space<vmem>>, vector<384x128xf32>
    %c1_70 = arith.constant 1 : index
    %c0_71 = arith.constant 0 : index
    %c0_72 = arith.constant 0 : index
    %77 = vector.load %arg4[%c1_70, %c0_71, %c0_72] : memref<9x128x128xf32, #tpu.memory_space<vmem>>, vector<1x128x128xf32>
    %78 = vector.shape_cast %77 : vector<1x128x128xf32> to vector<128x128xf32>
    %cst_73 = arith.constant dense<0.000000e+00> : vector<384x128xf32>
    %79 = tpu.matmul %76, %78, %cst_73 {dimension_numbers = #tpu.dot_dimension_numbers<[1], [0], [0], [1], [0, 0, 1, 1], [], []>} : vector<384x128xf32>, vector<128x128xf32>, vector<384x128xf32> -> vector<384x128xf32>
    %80 = arith.addf %75, %79 : vector<384x128xf32>
    %c9 = arith.constant 9 : index
    %c0_74 = arith.constant 0 : index
    %81 = vector.load %arg8[%c9, %c0_74] : memref<448x128xf32, #tpu.memory_space<vmem>>, vector<384x128xf32>
    %c2_75 = arith.constant 2 : index
    %c0_76 = arith.constant 0 : index
    %c0_77 = arith.constant 0 : index
    %82 = vector.load %arg4[%c2_75, %c0_76, %c0_77] : memref<9x128x128xf32, #tpu.memory_space<vmem>>, vector<1x128x128xf32>
    %83 = vector.shape_cast %82 : vector<1x128x128xf32> to vector<128x128xf32>
    %cst_78 = arith.constant dense<0.000000e+00> : vector<384x128xf32>
    %84 = tpu.matmul %81, %83, %cst_78 {dimension_numbers = #tpu.dot_dimension_numbers<[1], [0], [0], [1], [0, 0, 1, 1], [], []>} : vector<384x128xf32>, vector<128x128xf32>, vector<384x128xf32> -> vector<384x128xf32>
    %85 = arith.addf %80, %84 : vector<384x128xf32>
    %c31 = arith.constant 31 : index
    %c0_79 = arith.constant 0 : index
    %86 = vector.load %arg8[%c31, %c0_79] : memref<448x128xf32, #tpu.memory_space<vmem>>, vector<384x128xf32>
    %c3_80 = arith.constant 3 : index
    %c0_81 = arith.constant 0 : index
    %c0_82 = arith.constant 0 : index
    %87 = vector.load %arg4[%c3_80, %c0_81, %c0_82] : memref<9x128x128xf32, #tpu.memory_space<vmem>>, vector<1x128x128xf32>
    %88 = vector.shape_cast %87 : vector<1x128x128xf32> to vector<128x128xf32>
    %cst_83 = arith.constant dense<0.000000e+00> : vector<384x128xf32>
    %89 = tpu.matmul %86, %88, %cst_83 {dimension_numbers = #tpu.dot_dimension_numbers<[1], [0], [0], [1], [0, 0, 1, 1], [], []>} : vector<384x128xf32>, vector<128x128xf32>, vector<384x128xf32> -> vector<384x128xf32>
    %90 = arith.addf %85, %89 : vector<384x128xf32>
    %c32_84 = arith.constant 32 : index
    %c0_85 = arith.constant 0 : index
    %91 = vector.load %arg8[%c32_84, %c0_85] : memref<448x128xf32, #tpu.memory_space<vmem>>, vector<384x128xf32>
    %c4_86 = arith.constant 4 : index
    %c0_87 = arith.constant 0 : index
    %c0_88 = arith.constant 0 : index
    %92 = vector.load %arg4[%c4_86, %c0_87, %c0_88] : memref<9x128x128xf32, #tpu.memory_space<vmem>>, vector<1x128x128xf32>
    %93 = vector.shape_cast %92 : vector<1x128x128xf32> to vector<128x128xf32>
    %cst_89 = arith.constant dense<0.000000e+00> : vector<384x128xf32>
    %94 = tpu.matmul %91, %93, %cst_89 {dimension_numbers = #tpu.dot_dimension_numbers<[1], [0], [0], [1], [0, 0, 1, 1], [], []>} : vector<384x128xf32>, vector<128x128xf32>, vector<384x128xf32> -> vector<384x128xf32>
    %95 = arith.addf %90, %94 : vector<384x128xf32>
    %c33 = arith.constant 33 : index
    %c0_90 = arith.constant 0 : index
    %96 = vector.load %arg8[%c33, %c0_90] : memref<448x128xf32, #tpu.memory_space<vmem>>, vector<384x128xf32>
    %c5_91 = arith.constant 5 : index
    %c0_92 = arith.constant 0 : index
    %c0_93 = arith.constant 0 : index
    %97 = vector.load %arg4[%c5_91, %c0_92, %c0_93] : memref<9x128x128xf32, #tpu.memory_space<vmem>>, vector<1x128x128xf32>
    %98 = vector.shape_cast %97 : vector<1x128x128xf32> to vector<128x128xf32>
    %cst_94 = arith.constant dense<0.000000e+00> : vector<384x128xf32>
    %99 = tpu.matmul %96, %98, %cst_94 {dimension_numbers = #tpu.dot_dimension_numbers<[1], [0], [0], [1], [0, 0, 1, 1], [], []>} : vector<384x128xf32>, vector<128x128xf32>, vector<384x128xf32> -> vector<384x128xf32>
    %100 = arith.addf %95, %99 : vector<384x128xf32>
    %c55 = arith.constant 55 : index
    %c0_95 = arith.constant 0 : index
    %101 = vector.load %arg8[%c55, %c0_95] : memref<448x128xf32, #tpu.memory_space<vmem>>, vector<384x128xf32>
    %c6_96 = arith.constant 6 : index
    %c0_97 = arith.constant 0 : index
    %c0_98 = arith.constant 0 : index
    %102 = vector.load %arg4[%c6_96, %c0_97, %c0_98] : memref<9x128x128xf32, #tpu.memory_space<vmem>>, vector<1x128x128xf32>
    %103 = vector.shape_cast %102 : vector<1x128x128xf32> to vector<128x128xf32>
    %cst_99 = arith.constant dense<0.000000e+00> : vector<384x128xf32>
    %104 = tpu.matmul %101, %103, %cst_99 {dimension_numbers = #tpu.dot_dimension_numbers<[1], [0], [0], [1], [0, 0, 1, 1], [], []>} : vector<384x128xf32>, vector<128x128xf32>, vector<384x128xf32> -> vector<384x128xf32>
    %105 = arith.addf %100, %104 : vector<384x128xf32>
    %c56 = arith.constant 56 : index
    %c0_100 = arith.constant 0 : index
    %106 = vector.load %arg8[%c56, %c0_100] : memref<448x128xf32, #tpu.memory_space<vmem>>, vector<384x128xf32>
    %c7_101 = arith.constant 7 : index
    %c0_102 = arith.constant 0 : index
    %c0_103 = arith.constant 0 : index
    %107 = vector.load %arg4[%c7_101, %c0_102, %c0_103] : memref<9x128x128xf32, #tpu.memory_space<vmem>>, vector<1x128x128xf32>
    %108 = vector.shape_cast %107 : vector<1x128x128xf32> to vector<128x128xf32>
    %cst_104 = arith.constant dense<0.000000e+00> : vector<384x128xf32>
    %109 = tpu.matmul %106, %108, %cst_104 {dimension_numbers = #tpu.dot_dimension_numbers<[1], [0], [0], [1], [0, 0, 1, 1], [], []>} : vector<384x128xf32>, vector<128x128xf32>, vector<384x128xf32> -> vector<384x128xf32>
    %110 = arith.addf %105, %109 : vector<384x128xf32>
    %c57 = arith.constant 57 : index
    %c0_105 = arith.constant 0 : index
    %111 = vector.load %arg8[%c57, %c0_105] : memref<448x128xf32, #tpu.memory_space<vmem>>, vector<384x128xf32>
    %c8_106 = arith.constant 8 : index
    %c0_107 = arith.constant 0 : index
    %c0_108 = arith.constant 0 : index
    %112 = vector.load %arg4[%c8_106, %c0_107, %c0_108] : memref<9x128x128xf32, #tpu.memory_space<vmem>>, vector<1x128x128xf32>
    %113 = vector.shape_cast %112 : vector<1x128x128xf32> to vector<128x128xf32>
    %cst_109 = arith.constant dense<0.000000e+00> : vector<384x128xf32>
    %114 = tpu.matmul %111, %113, %cst_109 {dimension_numbers = #tpu.dot_dimension_numbers<[1], [0], [0], [1], [0, 0, 1, 1], [], []>} : vector<384x128xf32>, vector<128x128xf32>, vector<384x128xf32> -> vector<384x128xf32>
    %115 = arith.addf %110, %114 : vector<384x128xf32>
    %c0_110 = arith.constant 0 : index
    %c0_111 = arith.constant 0 : index
    %116 = vector.load %arg5[%c0_110, %c0_111] : memref<3x128xf32, #tpu.memory_space<vmem>>, vector<1x128xf32>
    %117 = vector.broadcast %116 : vector<1x128xf32> to vector<384x128xf32>
    %118 = arith.addf %115, %117 : vector<384x128xf32>
    %cst_112 = arith.constant 0.000000e+00 : f32
    %119 = vector.broadcast %cst_112 : f32 to vector<384x128xf32>
    %120 = arith.maximumf %118, %119 : vector<384x128xf32>
    %c1_113 = arith.constant 1 : index
    %c0_114 = arith.constant 0 : index
    %121 = vector.load %arg5[%c1_113, %c0_114] : memref<3x128xf32, #tpu.memory_space<vmem>>, vector<1x128xf32>
    %122 = vector.broadcast %121 : vector<1x128xf32> to vector<384x128xf32>
    %123 = arith.mulf %120, %122 : vector<384x128xf32>
    %c2_115 = arith.constant 2 : index
    %c0_116 = arith.constant 0 : index
    %124 = vector.load %arg5[%c2_115, %c0_116] : memref<3x128xf32, #tpu.memory_space<vmem>>, vector<1x128xf32>
    %125 = vector.broadcast %124 : vector<1x128xf32> to vector<384x128xf32>
    %126 = arith.addf %123, %125 : vector<384x128xf32>
    %c0_117 = arith.constant 0 : index
    %c0_118 = arith.constant 0 : index
    %c0_119 = arith.constant 0 : index
    %127 = vector.load %arg7[%c0_117, %c0_118, %c0_119] : memref<1x384x128xf32, #tpu.memory_space<vmem>>, vector<1x384x128xf32>
    %128 = vector.shape_cast %127 : vector<1x384x128xf32> to vector<384x128xf32>
    %129 = vector.shape_cast %126 : vector<384x128xf32> to vector<1x384x128xf32>
    tpu.vector_store %arg7[%c0_117, %c0_118, %c0_119], %129 {strides = array<i32>} : memref<1x384x128xf32, #tpu.memory_space<vmem>>, vector<1x384x128xf32>,
    return
  }
  func.func @transform_0(%arg0: i32) -> (i32, i32, i32) {
    %c0_i32 = arith.constant 0 : i32
    %c0_i32_0 = arith.constant 0 : i32
    %c0_i32_1 = arith.constant 0 : i32
    return %arg0, %c0_i32, %c0_i32_0 : i32, i32, i32
  }
  func.func @transform_1(%arg0: i32) -> (i32, i32, i32) {
    %c0_i32 = arith.constant 0 : i32
    %c0_i32_0 = arith.constant 0 : i32
    %c0_i32_1 = arith.constant 0 : i32
    %c0_i32_2 = arith.constant 0 : i32
    return %c0_i32, %c0_i32_0, %c0_i32_1 : i32, i32, i32
  }
  func.func @transform_2(%arg0: i32) -> (i32, i32) {
    %c0_i32 = arith.constant 0 : i32
    %c0_i32_0 = arith.constant 0 : i32
    %c0_i32_1 = arith.constant 0 : i32
    return %c0_i32, %c0_i32_0 : i32, i32
  }
  func.func @transform_3(%arg0: i32) -> (i32, i32, i32) {
    %c0_i32 = arith.constant 0 : i32
    %c0_i32_0 = arith.constant 0 : i32
    %c0_i32_1 = arith.constant 0 : i32
    %c0_i32_2 = arith.constant 0 : i32
    return %c0_i32, %c0_i32_0, %c0_i32_1 : i32, i32, i32
  }
  func.func @transform_4(%arg0: i32) -> (i32, i32) {
    %c0_i32 = arith.constant 0 : i32
    %c0_i32_0 = arith.constant 0 : i32
    %c0_i32_1 = arith.constant 0 : i32
    return %c0_i32, %c0_i32_0 : i32, i32
  }
  func.func @transform_5(%arg0: i32) -> (i32, i32) {
    %c0_i32 = arith.constant 0 : i32
    %c0_i32_0 = arith.constant 0 : i32
    %c0_i32_1 = arith.constant 0 : i32
    return %c0_i32, %c0_i32_0 : i32, i32
  }
  func.func @transform_6(%arg0: i32) -> (i32, i32, i32) {
    %c0_i32 = arith.constant 0 : i32
    %c0_i32_0 = arith.constant 0 : i32
    %c0_i32_1 = arith.constant 0 : i32
    return %arg0, %c0_i32, %c0_i32_0 : i32, i32, i32
  }
}

</mosaic_0001>

<bundles_post_ra>
// kernel: tile.8
= control target key start
LH: loop header
LB: loop body
LE: loop exit
PB: predicated region body
PF: predicated region fallthrough
CT: control target
= control target key end

     0   :  { %s28_s0 = inlined_call_operand.vmem [shape: f32[24], index: 0, kind: input, shape index: {}]   ;;  %s29_s1 = inlined_call_operand.vmem [shape: f32[16,24], index: 1, kind: output, shape index: {}]  }
   0x1   :  { %v4_v0 = vld [vmem:[%s28_s0] ss:$0 sm:$0xff] }
   0x2   :  { %5 = vst [vmem:[%s29_s1] sm:$0xff] %v4_v0  ;;  %8 = vst [vmem:[%s29_s1 + $0x8] sm:$0xff] %v4_v0 }

// kernel: tile.0
= control target key start
LH: loop header
LB: loop body
LE: loop exit
PB: predicated region body
PF: predicated region fallthrough
CT: control target
= control target key end

     0   :  { %s821_s8 = smov 126   ;;  %s822_s9 = smov 127   ;;  %vm3_vm0 = vcmask 7168   ;;  %s1630_s0 = inlined_call_operand.vmem [shape: f32[16,24], index: 0, kind: input, shape index: {}]   ;;  %s1631_s1 = inlined_call_operand.vmem [shape: f32[384,1], index: 1, kind: output, shape index: {}]  }
   0x1   :  { %v38_v0 = vld.sshfl [vmem:[%s1630_s0] sm:$0xff pattern:$0x56741230]   ;;  %v604_v1 = vld.sshfl [vmem:[%s1630_s0 + $0x8] sm:$0xff pattern:$0x56741230]  }
   0x2   :  { %39 = vrot.lane.b32.xlu1 %v38_v0, %s821_s8  ;;  %14 = vrot.lane.b32.xlu0 %v38_v0, %s822_s9  ;;  %s823_s12 = smov 125   ;;  %s824_s13 = smov 124   ;;  %v658_v2 = vld.sshfl [vmem:[%s1630_s0 + $0x8] sm:$0xff pattern:$0x67452301]   ;;  %v2_v6 = vld [vmem:[%s1630_s0] sm:$0xff]  }
   0x3   :  { %s825_s14 = smov 123   ;;  %s826_s15 = smov 122   ;;  %v188_v3 = vld.sshfl [vmem:[%s1630_s0] sm:$0xff pattern:$0x67452301]   ;;  %v588_v7 = vld [vmem:[%s1630_s0 + $0x8] sm:$0xff]  }
   0x4   :  { %s827_s16 = smov 121   ;;  %s828_s21 = smov 120   ;;  %v730_v4 = vld.sshfl [vmem:[%s1630_s0 + $0x8] sm:$0xff pattern:$0x74563012]  }
   0x5   :  { %s829_s22 = smov 119   ;;  %s830_s23 = smov 118   ;;  %v388_v5 = vld.sshfl [vmem:[%s1630_s0] sm:$0xff pattern:$0x74563012]  }
   0x6   :  { %52 = vrot.lane.b32.xlu1 %v604_v1, %s821_s8  ;;  %27 = vrot.lane.b32.xlu0 %v604_v1, %s822_s9  ;;  %s831_s24 = smov 117   ;;  %s832_s25 = smov 116   ;;  %4 = vst.msk [vmem:[%s1631_s1] ss:$24 sm:$0xf] %vm3_vm0, %v2_v6  }
   0x7   :  { %s833_s26 = smov 115   ;;  %s834_s27 = smov 114   ;;  %5 = vst.msk [vmem:[%s1631_s1] ss:$24 sm:$0xf0] %vm3_vm0, %v2_v6  }
   0x8   :  { %s835_s28 = smov 113   ;;  %s836_s4 = smov 112   ;;  %589 = vst.msk [vmem:[%s1631_s1 + $0xc0] ss:$24 sm:$0xf] %vm3_vm0, %v588_v7  }
   0x9   :  { %s837_s5 = smov 111   ;;  %s838_s6 = smov 110   ;;  %590 = vst.msk [vmem:[%s1631_s1 + $0xc0] ss:$24 sm:$0xf0] %vm3_vm0, %v588_v7  }
   0xa   :  { %77 = vrot.lane.b32.xlu1 %v604_v1, %s823_s12  ;;  %64 = vrot.lane.b32.xlu0 %v38_v0, %s823_s12  ;;  %s839_s7 = smov 109   ;;  %s840_s19 = smov 108  }
   0xb   :  { %s841_s20 = smov 107  }
   0xe   :  { %102 = vrot.lane.b32.xlu1 %v604_v1, %s824_s13  ;;  %89 = vrot.lane.b32.xlu0 %v38_v0, %s824_s13 }
  0x12   :  { %127 = vrot.lane.b32.xlu1 %v604_v1, %s825_s14  ;;  %114 = vrot.lane.b32.xlu0 %v38_v0, %s825_s14 }
  0x16   :  { %152 = vrot.lane.b32.xlu1 %v604_v1, %s826_s15  ;;  %139 = vrot.lane.b32.xlu0 %v38_v0, %s826_s15 }
  0x1a   :  { %177 = vrot.lane.b32.xlu1 %v604_v1, %s827_s16  ;;  %164 = vrot.lane.b32.xlu0 %v38_v0, %s827_s16 }
  0x1e   :  { %202 = vrot.lane.b32.xlu1 %v658_v2, %s828_s21  ;;  %189 = vrot.lane.b32.xlu0 %v188_v3, %s828_s21  ;;  %s842_s21 = smov 106  }
  0x22   :  { %227 = vrot.lane.b32.xlu1 %v658_v2, %s829_s22  ;;  %214 = vrot.lane.b32.xlu0 %v188_v3, %s829_s22  ;;  %s843_s22 = smov 105  }
  0x26   :  { %252 = vrot.lane.b32.xlu1 %v658_v2, %s830_s23  ;;  %239 = vrot.lane.b32.xlu0 %v188_v3, %s830_s23 }
  0x2a   :  { %277 = vrot.lane.b32.xlu1 %v658_v2, %s831_s24  ;;  %264 = vrot.lane.b32.xlu0 %v188_v3, %s831_s24 }
  0x2e   :  { %302 = vrot.lane.b32.xlu1 %v658_v2, %s832_s25  ;;  %289 = vrot.lane.b32.xlu0 %v188_v3, %s832_s25 }
  0x32   :  { %327 = vrot.lane.b32.xlu1 %v658_v2, %s833_s26  ;;  %314 = vrot.lane.b32.xlu0 %v188_v3, %s833_s26 }
  0x36   :  { %352 = vrot.lane.b32.xlu1 %v658_v2, %s834_s27  ;;  %339 = vrot.lane.b32.xlu0 %v188_v3, %s834_s27 }
  0x3a   :  { %377 = vrot.lane.b32.xlu1 %v658_v2, %s835_s28  ;;  %364 = vrot.lane.b32.xlu0 %v188_v3, %s835_s28 }
  0x3e   :  { %402 = vrot.lane.b32.xlu1 %v730_v4, %s836_s4  ;;  %389 = vrot.lane.b32.xlu0 %v388_v5, %s836_s4 }
  0x42   :  { %427 = vrot.lane.b32.xlu1 %v730_v4, %s837_s5  ;;  %414 = vrot.lane.b32.xlu0 %v388_v5, %s837_s5 }
  0x46   :  { %452 = vrot.lane.b32.xlu1 %v730_v4, %s838_s6  ;;  %439 = vrot.lane.b32.xlu0 %v388_v5, %s838_s6 }
  0x4a   :  { %477 = vrot.lane.b32.xlu1 %v730_v4, %s839_s7  ;;  %464 = vrot.lane.b32.xlu0 %v388_v5, %s839_s7 }
  0x4e   :  { %502 = vrot.lane.b32.xlu1 %v730_v4, %s840_s19  ;;  %489 = vrot.lane.b32.xlu0 %v388_v5, %s840_s19 }
  0x52   :  { %527 = vrot.lane.b32.xlu1 %v730_v4, %s841_s20  ;;  %514 = vrot.lane.b32.xlu0 %v388_v5, %s841_s20 }
  0x56   :  { %552 = vrot.lane.b32.xlu1 %v730_v4, %s842_s21  ;;  %539 = vrot.lane.b32.xlu0 %v388_v5, %s842_s21 }
  0x5a   :  { %577 = vrot.lane.b32.xlu1 %v730_v4, %s843_s22  ;;  %564 = vrot.lane.b32.xlu0 %v388_v5, %s843_s22 }
  0x74   :  { %v40_v8 = vpop.permute.xlu1 %39   ;;  %v15_v9 = vpop.permute.xlu0 %14  }
  0x75   :  { %600 = vst.msk [vmem:[%s1631_s1 + $0x2] ss:$72 sm:$0x3] %vm3_vm0, %v40_v8   ;;  %601 = vst.msk [vmem:[%s1631_s1 + $0x62] ss:$-24 sm:$0xc] %vm3_vm0, %v40_v8  }
  0x76   :  { %602 = vst.msk [vmem:[%s1631_s1 - $0xbe] ss:$72 sm:$0x30] %vm3_vm0, %v40_v8   ;;  %603 = vst.msk [vmem:[%s1631_s1 + $0x122] ss:$-24 sm:$0xc0] %vm3_vm0, %v40_v8  }
  0x77   :  { %591 = vst.msk [vmem:[%s1631_s1 + $0x1] ss:$72 sm:$0x3] %vm3_vm0, %v15_v9   ;;  %592 = vst.msk [vmem:[%s1631_s1 + $0x61] ss:$-24 sm:$0xc] %vm3_vm0, %v15_v9  }
  0x78   :  { %593 = vst.msk [vmem:[%s1631_s1 - $0xbf] ss:$72 sm:$0x30] %vm3_vm0, %v15_v9   ;;  %594 = vst.msk [vmem:[%s1631_s1 + $0x121] ss:$-24 sm:$0xc0] %vm3_vm0, %v15_v9   ;;  %v53_v10 = vpop.permute.xlu1 %52   ;;  %v28_v11 = vpop.permute.xlu0 %27  }
  0x79   :  { %605 = vst.msk [vmem:[%s1631_s1 + $0xc2] ss:$72 sm:$0x3] %vm3_vm0, %v53_v10   ;;  %606 = vst.msk [vmem:[%s1631_s1 + $0x122] ss:$-24 sm:$0xc] %vm3_vm0, %v53_v10  }
  0x7a   :  { %607 = vst.msk [vmem:[%s1631_s1 + $0x2] ss:$72 sm:$0x30] %vm3_vm0, %v53_v10   ;;  %608 = vst.msk [vmem:[%s1631_s1 + $0x1e2] ss:$-24 sm:$0xc0] %vm3_vm0, %v53_v10  }
  0x7b   :  { %596 = vst.msk [vmem:[%s1631_s1 + $0xc1] ss:$72 sm:$0x3] %vm3_vm0, %v28_v11   ;;  %597 = vst.msk [vmem:[%s1631_s1 + $0x121] ss:$-24 sm:$0xc] %vm3_vm0, %v28_v11  }
  0x7c   :  { %598 = vst.msk [vmem:[%s1631_s1 + $0x1] ss:$72 sm:$0x30] %vm3_vm0, %v28_v11   ;;  %599 = vst.msk [vmem:[%s1631_s1 + $0x1e1] ss:$-24 sm:$0xc0] %vm3_vm0, %v28_v11   ;;  %v78_v12 = vpop.permute.xlu1 %77   ;;  %v65_v13 = vpop.permute.xlu0 %64  }
  0x7d   :  { %614 = vst.msk [vmem:[%s1631_s1 + $0xc3] ss:$72 sm:$0x3] %vm3_vm0, %v78_v12   ;;  %615 = vst.msk [vmem:[%s1631_s1 + $0x123] ss:$-24 sm:$0xc] %vm3_vm0, %v78_v12  }
  0x7e   :  { %616 = vst.msk [vmem:[%s1631_s1 + $0x3] ss:$72 sm:$0x30] %vm3_vm0, %v78_v12   ;;  %617 = vst.msk [vmem:[%s1631_s1 + $0x1e3] ss:$-24 sm:$0xc0] %vm3_vm0, %v78_v12  }
  0x7f   :  { %609 = vst.msk [vmem:[%s1631_s1 + $0x3] ss:$72 sm:$0x3] %vm3_vm0, %v65_v13   ;;  %610 = vst.msk [vmem:[%s1631_s1 + $0x63] ss:$-24 sm:$0xc] %vm3_vm0, %v65_v13  }
  0x80   :  { %611 = vst.msk [vmem:[%s1631_s1 - $0xbd] ss:$72 sm:$0x30] %vm3_vm0, %v65_v13   ;;  %612 = vst.msk [vmem:[%s1631_s1 + $0x123] ss:$-24 sm:$0xc0] %vm3_vm0, %v65_v13   ;;  %v103_v14 = vpop.permute.xlu1 %102   ;;  %v90_v15 = vpop.permute.xlu0 %89  }
  0x81   :  { %623 = vst.msk [vmem:[%s1631_s1 + $0xc4] ss:$72 sm:$0x3] %vm3_vm0, %v103_v14   ;;  %624 = vst.msk [vmem:[%s1631_s1 + $0x124] ss:$-24 sm:$0xc] %vm3_vm0, %v103_v14  }
  0x82   :  { %625 = vst.msk [vmem:[%s1631_s1 + $0x4] ss:$72 sm:$0x30] %vm3_vm0, %v103_v14   ;;  %626 = vst.msk [vmem:[%s1631_s1 + $0x1e4] ss:$-24 sm:$0xc0] %vm3_vm0, %v103_v14  }
  0x83   :  { %618 = vst.msk [vmem:[%s1631_s1 + $0x4] ss:$72 sm:$0x3] %vm3_vm0, %v90_v15   ;;  %619 = vst.msk [vmem:[%s1631_s1 + $0x64] ss:$-24 sm:$0xc] %vm3_vm0, %v90_v15  }
  0x84   :  { %620 = vst.msk [vmem:[%s1631_s1 - $0xbc] ss:$72 sm:$0x30] %vm3_vm0, %v90_v15   ;;  %621 = vst.msk [vmem:[%s1631_s1 + $0x124] ss:$-24 sm:$0xc0] %vm3_vm0, %v90_v15   ;;  %v128_v16 = vpop.permute.xlu1 %127   ;;  %v115_v17 = vpop.permute.xlu0 %114  }
  0x85   :  { %632 = vst.msk [vmem:[%s1631_s1 + $0xc5] ss:$72 sm:$0x3] %vm3_vm0, %v128_v16   ;;  %633 = vst.msk [vmem:[%s1631_s1 + $0x125] ss:$-24 sm:$0xc] %vm3_vm0, %v128_v16  }
  0x86   :  { %634 = vst.msk [vmem:[%s1631_s1 + $0x5] ss:$72 sm:$0x30] %vm3_vm0, %v128_v16   ;;  %635 = vst.msk [vmem:[%s1631_s1 + $0x1e5] ss:$-24 sm:$0xc0] %vm3_vm0, %v128_v16  }
  0x87   :  { %627 = vst.msk [vmem:[%s1631_s1 + $0x5] ss:$72 sm:$0x3] %vm3_vm0, %v115_v17   ;;  %628 = vst.msk [vmem:[%s1631_s1 + $0x65] ss:$-24 sm:$0xc] %vm3_vm0, %v115_v17  }
  0x88   :  { %629 = vst.msk [vmem:[%s1631_s1 - $0xbb] ss:$72 sm:$0x30] %vm3_vm0, %v115_v17   ;;  %630 = vst.msk [vmem:[%s1631_s1 + $0x125] ss:$-24 sm:$0xc0] %vm3_vm0, %v115_v17   ;;  %v153_v18 = vpop.permute.xlu1 %152   ;;  %v140_v19 = vpop.permute.xlu0 %139  }
  0x89   :  { %641 = vst.msk [vmem:[%s1631_s1 + $0xc6] ss:$72 sm:$0x3] %vm3_vm0, %v153_v18   ;;  %642 = vst.msk [vmem:[%s1631_s1 + $0x126] ss:$-24 sm:$0xc] %vm3_vm0, %v153_v18  }
  0x8a   :  { %643 = vst.msk [vmem:[%s1631_s1 + $0x6] ss:$72 sm:$0x30] %vm3_vm0, %v153_v18   ;;  %644 = vst.msk [vmem:[%s1631_s1 + $0x1e6] ss:$-24 sm:$0xc0] %vm3_vm0, %v153_v18  }
  0x8b   :  { %636 = vst.msk [vmem:[%s1631_s1 + $0x6] ss:$72 sm:$0x3] %vm3_vm0, %v140_v19   ;;  %637 = vst.msk [vmem:[%s1631_s1 + $0x66] ss:$-24 sm:$0xc] %vm3_vm0, %v140_v19  }
  0x8c   :  { %638 = vst.msk [vmem:[%s1631_s1 - $0xba] ss:$72 sm:$0x30] %vm3_vm0, %v140_v19   ;;  %639 = vst.msk [vmem:[%s1631_s1 + $0x126] ss:$-24 sm:$0xc0] %vm3_vm0, %v140_v19   ;;  %v178_v20 = vpop.permute.xlu1 %177   ;;  %v165_v21 = vpop.permute.xlu0 %164  }
  0x8d   :  { %650 = vst.msk [vmem:[%s1631_s1 + $0xc7] ss:$72 sm:$0x3] %vm3_vm0, %v178_v20   ;;  %651 = vst.msk [vmem:[%s1631_s1 + $0x127] ss:$-24 sm:$0xc] %vm3_vm0, %v178_v20  }
  0x8e   :  { %652 = vst.msk [vmem:[%s1631_s1 + $0x7] ss:$72 sm:$0x30] %vm3_vm0, %v178_v20   ;;  %653 = vst.msk [vmem:[%s1631_s1 + $0x1e7] ss:$-24 sm:$0xc0] %vm3_vm0, %v178_v20  }
  0x8f   :  { %645 = vst.msk [vmem:[%s1631_s1 + $0x7] ss:$72 sm:$0x3] %vm3_vm0, %v165_v21   ;;  %646 = vst.msk [vmem:[%s1631_s1 + $0x67] ss:$-24 sm:$0xc] %vm3_vm0, %v165_v21  }
  0x90   :  { %647 = vst.msk [vmem:[%s1631_s1 - $0xb9] ss:$72 sm:$0x30] %vm3_vm0, %v165_v21   ;;  %648 = vst.msk [vmem:[%s1631_s1 + $0x127] ss:$-24 sm:$0xc0] %vm3_vm0, %v165_v21   ;;  %v203_v22 = vpop.permute.xlu1 %202   ;;  %v190_v23 = vpop.permute.xlu0 %189  }
  0x91   :  { %659 = vst.msk [vmem:[%s1631_s1 + $0xe0] ss:$-24 sm:$0x3] %vm3_vm0, %v203_v22   ;;  %660 = vst.msk [vmem:[%s1631_s1 + $0x140] ss:$-24 sm:$0xc] %vm3_vm0, %v203_v22  }
  0x92   :  { %661 = vst.msk [vmem:[%s1631_s1 + $0x1a0] ss:$-24 sm:$0x30] %vm3_vm0, %v203_v22   ;;  %662 = vst.msk [vmem:[%s1631_s1 + $0x200] ss:$-24 sm:$0xc0] %vm3_vm0, %v203_v22  }
  0x93   :  { %654 = vst.msk [vmem:[%s1631_s1 + $0x20] ss:$-24 sm:$0x3] %vm3_vm0, %v190_v23   ;;  %655 = vst.msk [vmem:[%s1631_s1 + $0x80] ss:$-24 sm:$0xc] %vm3_vm0, %v190_v23  }
  0x94   :  { %656 = vst.msk [vmem:[%s1631_s1 + $0xe0] ss:$-24 sm:$0x30] %vm3_vm0, %v190_v23   ;;  %657 = vst.msk [vmem:[%s1631_s1 + $0x140] ss:$-24 sm:$0xc0] %vm3_vm0, %v190_v23   ;;  %v228_v24 = vpop.permute.xlu1 %227   ;;  %v215_v25 = vpop.permute.xlu0 %214  }
  0x95   :  { %668 = vst.msk [vmem:[%s1631_s1 + $0xe1] ss:$-24 sm:$0x3] %vm3_vm0, %v228_v24   ;;  %669 = vst.msk [vmem:[%s1631_s1 + $0x141] ss:$-24 sm:$0xc] %vm3_vm0, %v228_v24  }
  0x96   :  { %670 = vst.msk [vmem:[%s1631_s1 + $0x1a1] ss:$-24 sm:$0x30] %vm3_vm0, %v228_v24   ;;  %671 = vst.msk [vmem:[%s1631_s1 + $0x201] ss:$-24 sm:$0xc0] %vm3_vm0, %v228_v24  }
  0x97   :  { %663 = vst.msk [vmem:[%s1631_s1 + $0x21] ss:$-24 sm:$0x3] %vm3_vm0, %v215_v25   ;;  %664 = vst.msk [vmem:[%s1631_s1 + $0x81] ss:$-24 sm:$0xc] %vm3_vm0, %v215_v25  }
  0x98   :  { %665 = vst.msk [vmem:[%s1631_s1 + $0xe1] ss:$-24 sm:$0x30] %vm3_vm0, %v215_v25   ;;  %666 = vst.msk [vmem:[%s1631_s1 + $0x141] ss:$-24 sm:$0xc0] %vm3_vm0, %v215_v25   ;;  %v253_v26 = vpop.permute.xlu1 %252   ;;  %v240_v27 = vpop.permute.xlu0 %239  }
  0x99   :  { %677 = vst.msk [vmem:[%s1631_s1 + $0xe2] ss:$-24 sm:$0x3] %vm3_vm0, %v253_v26   ;;  %678 = vst.msk [vmem:[%s1631_s1 + $0x142] ss:$-24 sm:$0xc] %vm3_vm0, %v253_v26  }
  0x9a   :  { %679 = vst.msk [vmem:[%s1631_s1 + $0x1a2] ss:$-24 sm:$0x30] %vm3_vm0, %v253_v26   ;;  %680 = vst.msk [vmem:[%s1631_s1 + $0x202] ss:$-24 sm:$0xc0] %vm3_vm0, %v253_v26  }
  0x9b   :  { %672 = vst.msk [vmem:[%s1631_s1 + $0x22] ss:$-24 sm:$0x3] %vm3_vm0, %v240_v27   ;;  %673 = vst.msk [vmem:[%s1631_s1 + $0x82] ss:$-24 sm:$0xc] %vm3_vm0, %v240_v27  }
  0x9c   :  { %674 = vst.msk [vmem:[%s1631_s1 + $0xe2] ss:$-24 sm:$0x30] %vm3_vm0, %v240_v27   ;;  %675 = vst.msk [vmem:[%s1631_s1 + $0x142] ss:$-24 sm:$0xc0] %vm3_vm0, %v240_v27   ;;  %v278_v28 = vpop.permute.xlu1 %277   ;;  %v265_v29 = vpop.permute.xlu0 %264  }
  0x9d   :  { %686 = vst.msk [vmem:[%s1631_s1 + $0xe3] ss:$-24 sm:$0x3] %vm3_vm0, %v278_v28   ;;  %687 = vst.msk [vmem:[%s1631_s1 + $0x143] ss:$-24 sm:$0xc] %vm3_vm0, %v278_v28  }
  0x9e   :  { %688 = vst.msk [vmem:[%s1631_s1 + $0x1a3] ss:$-24 sm:$0x30] %vm3_vm0, %v278_v28   ;;  %689 = vst.msk [vmem:[%s1631_s1 + $0x203] ss:$-24 sm:$0xc0] %vm3_vm0, %v278_v28  }
  0x9f   :  { %681 = vst.msk [vmem:[%s1631_s1 + $0x23] ss:$-24 sm:$0x3] %vm3_vm0, %v265_v29   ;;  %682 = vst.msk [vmem:[%s1631_s1 + $0x83] ss:$-24 sm:$0xc] %vm3_vm0, %v265_v29  }
  0xa0   :  { %683 = vst.msk [vmem:[%s1631_s1 + $0xe3] ss:$-24 sm:$0x30] %vm3_vm0, %v265_v29   ;;  %684 = vst.msk [vmem:[%s1631_s1 + $0x143] ss:$-24 sm:$0xc0] %vm3_vm0, %v265_v29   ;;  %v303_v30 = vpop.permute.xlu1 %302   ;;  %v290_v31 = vpop.permute.xlu0 %289  }
  0xa1   :  { %695 = vst.msk [vmem:[%s1631_s1 + $0xe4] ss:$-24 sm:$0x3] %vm3_vm0, %v303_v30   ;;  %696 = vst.msk [vmem:[%s1631_s1 + $0x144] ss:$-24 sm:$0xc] %vm3_vm0, %v303_v30  }
  0xa2   :  { %697 = vst.msk [vmem:[%s1631_s1 + $0x1a4] ss:$-24 sm:$0x30] %vm3_vm0, %v303_v30   ;;  %698 = vst.msk [vmem:[%s1631_s1 + $0x204] ss:$-24 sm:$0xc0] %vm3_vm0, %v303_v30  }
  0xa3   :  { %690 = vst.msk [vmem:[%s1631_s1 + $0x24] ss:$-24 sm:$0x3] %vm3_vm0, %v290_v31   ;;  %691 = vst.msk [vmem:[%s1631_s1 + $0x84] ss:$-24 sm:$0xc] %vm3_vm0, %v290_v31  }
  0xa4   :  { %692 = vst.msk [vmem:[%s1631_s1 + $0xe4] ss:$-24 sm:$0x30] %vm3_vm0, %v290_v31   ;;  %693 = vst.msk [vmem:[%s1631_s1 + $0x144] ss:$-24 sm:$0xc0] %vm3_vm0, %v290_v31   ;;  %v328_v32 = vpop.permute.xlu1 %327   ;;  %v315_v33 = vpop.permute.xlu0 %314  }
  0xa5   :  { %704 = vst.msk [vmem:[%s1631_s1 + $0xe5] ss:$-24 sm:$0x3] %vm3_vm0, %v328_v32   ;;  %705 = vst.msk [vmem:[%s1631_s1 + $0x145] ss:$-24 sm:$0xc] %vm3_vm0, %v328_v32  }
  0xa6   :  { %706 = vst.msk [vmem:[%s1631_s1 + $0x1a5] ss:$-24 sm:$0x30] %vm3_vm0, %v328_v32   ;;  %707 = vst.msk [vmem:[%s1631_s1 + $0x205] ss:$-24 sm:$0xc0] %vm3_vm0, %v328_v32  }
  0xa7   :  { %699 = vst.msk [vmem:[%s1631_s1 + $0x25] ss:$-24 sm:$0x3] %vm3_vm0, %v315_v33   ;;  %700 = vst.msk [vmem:[%s1631_s1 + $0x85] ss:$-24 sm:$0xc] %vm3_vm0, %v315_v33  }
  0xa8   :  { %701 = vst.msk [vmem:[%s1631_s1 + $0xe5] ss:$-24 sm:$0x30] %vm3_vm0, %v315_v33   ;;  %702 = vst.msk [vmem:[%s1631_s1 + $0x145] ss:$-24 sm:$0xc0] %vm3_vm0, %v315_v33   ;;  %v353_v34 = vpop.permute.xlu1 %352   ;;  %v340_v35 = vpop.permute.xlu0 %339  }
  0xa9   :  { %713 = vst.msk [vmem:[%s1631_s1 + $0xe6] ss:$-24 sm:$0x3] %vm3_vm0, %v353_v34   ;;  %714 = vst.msk [vmem:[%s1631_s1 + $0x146] ss:$-24 sm:$0xc] %vm3_vm0, %v353_v34  }
  0xaa   :  { %715 = vst.msk [vmem:[%s1631_s1 + $0x1a6] ss:$-24 sm:$0x30] %vm3_vm0, %v353_v34   ;;  %716 = vst.msk [vmem:[%s1631_s1 + $0x206] ss:$-24 sm:$0xc0] %vm3_vm0, %v353_v34  }
  0xab   :  { %708 = vst.msk [vmem:[%s1631_s1 + $0x26] ss:$-24 sm:$0x3] %vm3_vm0, %v340_v35   ;;  %709 = vst.msk [vmem:[%s1631_s1 + $0x86] ss:$-24 sm:$0xc] %vm3_vm0, %v340_v35  }
  0xac   :  { %710 = vst.msk [vmem:[%s1631_s1 + $0xe6] ss:$-24 sm:$0x30] %vm3_vm0, %v340_v35   ;;  %711 = vst.msk [vmem:[%s1631_s1 + $0x146] ss:$-24 sm:$0xc0] %vm3_vm0, %v340_v35   ;;  %v378_v36 = vpop.permute.xlu1 %377   ;;  %v365_v37 = vpop.permute.xlu0 %364  }
  0xad   :  { %722 = vst.msk [vmem:[%s1631_s1 + $0xe7] ss:$-24 sm:$0x3] %vm3_vm0, %v378_v36   ;;  %723 = vst.msk [vmem:[%s1631_s1 + $0x147] ss:$-24 sm:$0xc] %vm3_vm0, %v378_v36  }
  0xae   :  { %724 = vst.msk [vmem:[%s1631_s1 + $0x1a7] ss:$-24 sm:$0x30] %vm3_vm0, %v378_v36   ;;  %725 = vst.msk [vmem:[%s1631_s1 + $0x207] ss:$-24 sm:$0xc0] %vm3_vm0, %v378_v36  }
  0xaf   :  { %717 = vst.msk [vmem:[%s1631_s1 + $0x27] ss:$-24 sm:$0x3] %vm3_vm0, %v365_v37   ;;  %718 = vst.msk [vmem:[%s1631_s1 + $0x87] ss:$-24 sm:$0xc] %vm3_vm0, %v365_v37  }
  0xb0   :  { %719 = vst.msk [vmem:[%s1631_s1 + $0xe7] ss:$-24 sm:$0x30] %vm3_vm0, %v365_v37   ;;  %720 = vst.msk [vmem:[%s1631_s1 + $0x147] ss:$-24 sm:$0xc0] %vm3_vm0, %v365_v37   ;;  %v403_v38 = vpop.permute.xlu1 %402   ;;  %v390_v39 = vpop.permute.xlu0 %389  }
  0xb1   :  { %731 = vst.msk [vmem:[%s1631_s1 + $0x100] ss:$-24 sm:$0x7] %vm3_vm0, %v403_v38   ;;  %732 = vst.msk [vmem:[%s1631_s1 + $0x40] ss:$72 sm:$0x18] %vm3_vm0, %v403_v38  }
  0xb2   :  { %733 = vst.msk [vmem:[%s1631_s1 + $0x1c0] ss:$-24 sm:$0x60] %vm3_vm0, %v403_v38   ;;  %734 = vst.msk [vmem:[%s1631_s1 + $0x171] sm:$0x80] %vm3_vm0, %v403_v38  }
  0xb3   :  { %726 = vst.msk [vmem:[%s1631_s1 + $0x40] ss:$-24 sm:$0x7] %vm3_vm0, %v390_v39   ;;  %727 = vst.msk [vmem:[%s1631_s1 - $0x80] ss:$72 sm:$0x18] %vm3_vm0, %v390_v39  }
  0xb4   :  { %728 = vst.msk [vmem:[%s1631_s1 + $0x100] ss:$-24 sm:$0x60] %vm3_vm0, %v390_v39   ;;  %729 = vst.msk [vmem:[%s1631_s1 + $0xb1] sm:$0x80] %vm3_vm0, %v390_v39   ;;  %v428_v40 = vpop.permute.xlu1 %427   ;;  %v415_v41 = vpop.permute.xlu0 %414  }
  0xb5   :  { %740 = vst.msk [vmem:[%s1631_s1 + $0x101] ss:$-24 sm:$0x7] %vm3_vm0, %v428_v40   ;;  %741 = vst.msk [vmem:[%s1631_s1 + $0x41] ss:$72 sm:$0x18] %vm3_vm0, %v428_v40  }
  0xb6   :  { %742 = vst.msk [vmem:[%s1631_s1 + $0x1c1] ss:$-24 sm:$0x60] %vm3_vm0, %v428_v40   ;;  %743 = vst.msk [vmem:[%s1631_s1 + $0x172] sm:$0x80] %vm3_vm0, %v428_v40  }
  0xb7   :  { %735 = vst.msk [vmem:[%s1631_s1 + $0x41] ss:$-24 sm:$0x7] %vm3_vm0, %v415_v41   ;;  %736 = vst.msk [vmem:[%s1631_s1 - $0x7f] ss:$72 sm:$0x18] %vm3_vm0, %v415_v41  }
  0xb8   :  { %737 = vst.msk [vmem:[%s1631_s1 + $0x101] ss:$-24 sm:$0x60] %vm3_vm0, %v415_v41   ;;  %738 = vst.msk [vmem:[%s1631_s1 + $0xb2] sm:$0x80] %vm3_vm0, %v415_v41   ;;  %v453_v42 = vpop.permute.xlu1 %452   ;;  %v440_v43 = vpop.permute.xlu0 %439  }
  0xb9   :  { %749 = vst.msk [vmem:[%s1631_s1 + $0x102] ss:$-24 sm:$0x7] %vm3_vm0, %v453_v42   ;;  %750 = vst.msk [vmem:[%s1631_s1 + $0x42] ss:$72 sm:$0x18] %vm3_vm0, %v453_v42  }
  0xba   :  { %751 = vst.msk [vmem:[%s1631_s1 + $0x1c2] ss:$-24 sm:$0x60] %vm3_vm0, %v453_v42   ;;  %752 = vst.msk [vmem:[%s1631_s1 + $0x173] sm:$0x80] %vm3_vm0, %v453_v42  }
  0xbb   :  { %744 = vst.msk [vmem:[%s1631_s1 + $0x42] ss:$-24 sm:$0x7] %vm3_vm0, %v440_v43   ;;  %745 = vst.msk [vmem:[%s1631_s1 - $0x7e] ss:$72 sm:$0x18] %vm3_vm0, %v440_v43  }
  0xbc   :  { %746 = vst.msk [vmem:[%s1631_s1 + $0x102] ss:$-24 sm:$0x60] %vm3_vm0, %v440_v43   ;;  %747 = vst.msk [vmem:[%s1631_s1 + $0xb3] sm:$0x80] %vm3_vm0, %v440_v43   ;;  %v478_v44 = vpop.permute.xlu1 %477   ;;  %v465_v45 = vpop.permute.xlu0 %464  }
  0xbd   :  { %758 = vst.msk [vmem:[%s1631_s1 + $0x103] ss:$-24 sm:$0x7] %vm3_vm0, %v478_v44   ;;  %759 = vst.msk [vmem:[%s1631_s1 + $0x43] ss:$72 sm:$0x18] %vm3_vm0, %v478_v44  }
  0xbe   :  { %760 = vst.msk [vmem:[%s1631_s1 + $0x1c3] ss:$-24 sm:$0x60] %vm3_vm0, %v478_v44   ;;  %761 = vst.msk [vmem:[%s1631_s1 + $0x174] sm:$0x80] %vm3_vm0, %v478_v44  }
  0xbf   :  { %753 = vst.msk [vmem:[%s1631_s1 + $0x43] ss:$-24 sm:$0x7] %vm3_vm0, %v465_v45   ;;  %754 = vst.msk [vmem:[%s1631_s1 - $0x7d] ss:$72 sm:$0x18] %vm3_vm0, %v465_v45  }
  0xc0   :  { %755 = vst.msk [vmem:[%s1631_s1 + $0x103] ss:$-24 sm:$0x60] %vm3_vm0, %v465_v45   ;;  %756 = vst.msk [vmem:[%s1631_s1 + $0xb4] sm:$0x80] %vm3_vm0, %v465_v45   ;;  %v503_v46 = vpop.permute.xlu1 %502   ;;  %v490_v47 = vpop.permute.xlu0 %489  }
  0xc1   :  { %767 = vst.msk [vmem:[%s1631_s1 + $0x104] ss:$-24 sm:$0x7] %vm3_vm0, %v503_v46   ;;  %768 = vst.msk [vmem:[%s1631_s1 + $0x44] ss:$72 sm:$0x18] %vm3_vm0, %v503_v46  }
  0xc2   :  { %769 = vst.msk [vmem:[%s1631_s1 + $0x1c4] ss:$-24 sm:$0x60] %vm3_vm0, %v503_v46   ;;  %770 = vst.msk [vmem:[%s1631_s1 + $0x175] sm:$0x80] %vm3_vm0, %v503_v46  }
  0xc3   :  { %762 = vst.msk [vmem:[%s1631_s1 + $0x44] ss:$-24 sm:$0x7] %vm3_vm0, %v490_v47   ;;  %763 = vst.msk [vmem:[%s1631_s1 - $0x7c] ss:$72 sm:$0x18] %vm3_vm0, %v490_v47  }
  0xc4   :  { %764 = vst.msk [vmem:[%s1631_s1 + $0x104] ss:$-24 sm:$0x60] %vm3_vm0, %v490_v47   ;;  %765 = vst.msk [vmem:[%s1631_s1 + $0xb5] sm:$0x80] %vm3_vm0, %v490_v47   ;;  %v528_v48 = vpop.permute.xlu1 %527   ;;  %v515_v49 = vpop.permute.xlu0 %514  }
  0xc5   :  { %776 = vst.msk [vmem:[%s1631_s1 + $0x105] ss:$-24 sm:$0x7] %vm3_vm0, %v528_v48   ;;  %777 = vst.msk [vmem:[%s1631_s1 + $0x45] ss:$72 sm:$0x18] %vm3_vm0, %v528_v48  }
  0xc6   :  { %778 = vst.msk [vmem:[%s1631_s1 + $0x1c5] ss:$-24 sm:$0x60] %vm3_vm0, %v528_v48   ;;  %779 = vst.msk [vmem:[%s1631_s1 + $0x176] sm:$0x80] %vm3_vm0, %v528_v48  }
  0xc7   :  { %771 = vst.msk [vmem:[%s1631_s1 + $0x45] ss:$-24 sm:$0x7] %vm3_vm0, %v515_v49   ;;  %772 = vst.msk [vmem:[%s1631_s1 - $0x7b] ss:$72 sm:$0x18] %vm3_vm0, %v515_v49  }
  0xc8   :  { %773 = vst.msk [vmem:[%s1631_s1 + $0x105] ss:$-24 sm:$0x60] %vm3_vm0, %v515_v49   ;;  %774 = vst.msk [vmem:[%s1631_s1 + $0xb6] sm:$0x80] %vm3_vm0, %v515_v49   ;;  %v553_v50 = vpop.permute.xlu1 %552   ;;  %v540_v51 = vpop.permute.xlu0 %539  }
  0xc9   :  { %785 = vst.msk [vmem:[%s1631_s1 + $0x106] ss:$-24 sm:$0x7] %vm3_vm0, %v553_v50   ;;  %786 = vst.msk [vmem:[%s1631_s1 + $0x46] ss:$72 sm:$0x18] %vm3_vm0, %v553_v50  }
  0xca   :  { %787 = vst.msk [vmem:[%s1631_s1 + $0x1c6] ss:$-24 sm:$0x60] %vm3_vm0, %v553_v50   ;;  %788 = vst.msk [vmem:[%s1631_s1 + $0x177] sm:$0x80] %vm3_vm0, %v553_v50  }
  0xcb   :  { %780 = vst.msk [vmem:[%s1631_s1 + $0x46] ss:$-24 sm:$0x7] %vm3_vm0, %v540_v51   ;;  %781 = vst.msk [vmem:[%s1631_s1 - $0x7a] ss:$72 sm:$0x18] %vm3_vm0, %v540_v51  }
  0xcc   :  { %782 = vst.msk [vmem:[%s1631_s1 + $0x106] ss:$-24 sm:$0x60] %vm3_vm0, %v540_v51   ;;  %783 = vst.msk [vmem:[%s1631_s1 + $0xb7] sm:$0x80] %vm3_vm0, %v540_v51   ;;  %v578_v52 = vpop.permute.xlu1 %577   ;;  %v565_v53 = vpop.permute.xlu0 %564  }
  0xcd   :  { %794 = vst.msk [vmem:[%s1631_s1 + $0x107] ss:$-24 sm:$0x7] %vm3_vm0, %v578_v52   ;;  %795 = vst.msk [vmem:[%s1631_s1 + $0x47] ss:$72 sm:$0x18] %vm3_vm0, %v578_v52  }
  0xce   :  { %796 = vst.msk [vmem:[%s1631_s1 + $0x1c7] ss:$-24 sm:$0x60] %vm3_vm0, %v578_v52   ;;  %797 = vst.msk [vmem:[%s1631_s1 + $0x178] sm:$0x80] %vm3_vm0, %v578_v52  }
  0xcf   :  { %789 = vst.msk [vmem:[%s1631_s1 + $0x47] ss:$-24 sm:$0x7] %vm3_vm0, %v565_v53   ;;  %790 = vst.msk [vmem:[%s1631_s1 - $0x79] ss:$72 sm:$0x18] %vm3_vm0, %v565_v53  }
  0xd0   :  { %791 = vst.msk [vmem:[%s1631_s1 + $0x107] ss:$-24 sm:$0x60] %vm3_vm0, %v565_v53   ;;  %792 = vst.msk [vmem:[%s1631_s1 + $0xb8] sm:$0x80] %vm3_vm0, %v565_v53  }

// kernel: conv_block_forward.1
= control target key start
LH: loop header
LB: loop body
LE: loop exit
PB: predicated region body
PF: predicated region fallthrough
CT: control target
= control target key end

     0   :  { %s13987_s21 = smov 0   ;;  %s17025_s0 = inlined_call_operand.vmem [shape: f32[2,440,8], index: 0, kind: input, shape index: {}]   ;;  %s17026_s1 = inlined_call_operand.vmem [shape: f32[9,8,128], index: 1, kind: input, shape index: {}]   ;;  %s17027_s2 = inlined_call_operand.vmem [shape: f32[3,128], index: 2, kind: input, shape index: {}]   ;;  %s17028_s3 = inlined_call_operand.vmem [shape: f32[9,128,128], index: 3, kind: input, shape index: {}]   ;;  %s17029_s4 = inlined_call_operand.vmem [shape: f32[3,128], index: 4, kind: input, shape index: {}]   ;;  %s17030_s5 = inlined_call_operand.vmem [shape: f32[384,1], index: 5, kind: input, shape index: {}]   ;;  %s17031_s6 = inlined_call_operand.vmem [shape: f32[2,384,128], index: 6, kind: output, shape index: {}]  }
   0x1 LB: > { %s9653_s22 = sadd.s32 4294967295, %s13948_s21   ;;  %p9657_p0 = scmp.ge.s32.totalorder %s13948_s21, 1  ;;  %s13948_s21 = sphi %s13987_s21, %s16_s21  }
   0x2   : > { %p212_p1 = scmp.lt.s32.totalorder %s13948_s21, 3 }
   0x4   : > { %p213_p2 = pnand %p9657_p0, %p212_p1 }
   0x6   : > { %216 = sbr.rel (%p213_p2) target bundleno = 2090 (0x82a), region = 44 }
   0xd   : > { %v9660_v0 = vld [vmem:[%s17026_s1 + $0x8] sm:$0xff]  ;;  %p242_p3 = scmp.lt.s32.totalorder %s9653_s22, 1  ;;  %v300_v1 = vld [vmem:[%s17026_s1] sm:$0xff]  ;;  %vm351_vm0 = vcmask 64512   ;;  %v14016_v5 = vld [vmem:[%s17026_s1 + $0x10] sm:$0xff] }
   0xe   : > { %11253 = vmatprep.subr.mxu0 %v9660_v0  ;;  %v14253_v54 = vld [vmem:[%s17026_s1 + $0x18] sm:$0xff] }
   0xf   : > { %11254 = vmatpush3.msra.mxu0 %v9660_v0  ;;  %s17374_s22 = smov (!%p242_p3, %s9653_s22), 1 }
  0x10   : > { %11327 = vmatprep.subr.mxu0 %v300_v1  ;;  %s13927_s27 = smul.u32 440, %s17374_s22 }
  0x12   : > { %s14007_s30 = scalar_lea.vmem %s17025_s0, %s13927_s27 }
  0x13   : > { %v301_v2 = vld [vmem:[%s14007_s30 + $0x1] sm:$0xff]  ;;  %v302_v3 = vld [vmem:[%s14007_s30 + $0x9] sm:$0xff]  ;;  %v303_v4 = vld [vmem:[%s14007_s30 + $0x11] sm:$0xff] }
  0x14   : > { %11255 = vmatprep.mubr.msk.f32.mxu0 %vm351_vm0, %v301_v2  ;;  %v14021_v6 = vld [vmem:[%s14007_s30 + $0x19] sm:$0xff]  ;;  %v14024_v7 = vld [vmem:[%s14007_s30 + $0x21] sm:$0xff]  ;;  %v14032_v8 = vld [vmem:[%s14007_s30 + $0x29] sm:$0xff] }
  0x15   : > { %11256 = vmatmul.mubr.msk.f32.vlgmr.msra.gmra.mrb[0].mxu0 %vm351_vm0, %v302_v3  ;;  %v14035_v9 = vld [vmem:[%s14007_s30 + $0x31] sm:$0xff]  ;;  %v14042_v10 = vld [vmem:[%s14007_s30 + $0x39] sm:$0xff]  ;;  %v14045_v11 = vld [vmem:[%s14007_s30 + $0x41] sm:$0xff] }
  0x16   : > { %11328 = vmatpush3.msra.mxu0 %v300_v1  ;;  %11258 = vmatprep.mubr.msk.f32.mxu0 %vm351_vm0, %v303_v4  ;;  %v14052_v12 = vld [vmem:[%s14007_s30 + $0x49] sm:$0xff]  ;;  %v14055_v13 = vld [vmem:[%s14007_s30 + $0x51] sm:$0xff]  ;;  %v14062_v14 = vld [vmem:[%s14007_s30 + $0x59] sm:$0xff] }
  0x17   : > { %11401 = vmatprep.subr.mxu0 %v14016_v5  ;;  %v14065_v15 = vld [vmem:[%s14007_s30 + $0x61] sm:$0xff]  ;;  %v14072_v16 = vld [vmem:[%s14007_s30 + $0x69] sm:$0xff]  ;;  %v14075_v17 = vld [vmem:[%s14007_s30 + $0x71] sm:$0xff] }
  0x18   : > { %v14082_v18 = vld [vmem:[%s14007_s30 + $0x79] sm:$0xff]  ;;  %v14085_v19 = vld [vmem:[%s14007_s30 + $0x81] sm:$0xff]  ;;  %v14092_v20 = vld [vmem:[%s14007_s30 + $0x89] sm:$0xff] }
  0x19   : > { %11259 = vmatmul.mubr.msk.f32.gmra.mrb[2].mxu0 %vm351_vm0, %v14021_v6  ;;  %17141 = vst [vmem:[#allocation3_spill] sm:$0xff] %v14082_v18  ;;  %17142 = vst [vmem:[#allocation4_spill] sm:$0xff] %v14085_v19  ;;  %v14095_v21 = vld [vmem:[%s14007_s30 + $0x91] sm:$0xff]  ;;  %v14102_v22 = vld [vmem:[%s14007_s30 + $0x99] sm:$0xff] }
  0x1a   : > { %11261 = vmatprep.mubr.msk.f32.mxu0 %vm351_vm0, %v14024_v7  ;;  %17143 = vst [vmem:[#allocation5_spill] sm:$0xff] %v14092_v20  ;;  %17144 = vst [vmem:[#allocation6_spill] sm:$0xff] %v14095_v21  ;;  %v14105_v23 = vld [vmem:[%s14007_s30 + $0xa1] sm:$0xff]  ;;  %v14112_v24 = vld [vmem:[%s14007_s30 + $0xa9] sm:$0xff] }
  0x1b   : > { %17145 = vst [vmem:[#allocation7_spill] sm:$0xff] %v14102_v22  ;;  %17146 = vst [vmem:[#allocation8_spill] sm:$0xff] %v14105_v23  ;;  %v14115_v25 = vld [vmem:[%s14007_s30 + $0xb1] sm:$0xff]  ;;  %v14122_v26 = vld [vmem:[%s14007_s30 + $0xb9] sm:$0xff] }
  0x1c   : > { %17147 = vst [vmem:[#allocation9_spill] sm:$0xff] %v14112_v24  ;;  %17148 = vst [vmem:[#allocation10_spill] sm:$0xff] %v14115_v25  ;;  %v14125_v27 = vld [vmem:[%s14007_s30 + $0xc1] sm:$0xff]  ;;  %v14132_v28 = vld [vmem:[%s14007_s30 + $0xc9] sm:$0xff] }
  0x1d   : > { %11262 = vmatmul.mubr.msk.f32.gmra.mrb[4].mxu0 %vm351_vm0, %v14032_v8  ;;  %17149 = vst [vmem:[#allocation11_spill] sm:$0xff] %v14122_v26  ;;  %17150 = vst [vmem:[#allocation12_spill] sm:$0xff] %v14125_v27  ;;  %v14135_v29 = vld [vmem:[%s14007_s30 + $0xd1] sm:$0xff]  ;;  %v14142_v30 = vld [vmem:[%s14007_s30 + $0xd9] sm:$0xff] }
  0x1e   : > { %11264 = vmatprep.mubr.msk.f32.mxu0 %vm351_vm0, %v14035_v9  ;;  %17151 = vst [vmem:[#allocation13_spill] sm:$0xff] %v14132_v28  ;;  %17152 = vst [vmem:[#allocation14_spill] sm:$0xff] %v14135_v29  ;;  %v14145_v31 = vld [vmem:[%s14007_s30 + $0xe1] sm:$0xff]  ;;  %v14152_v32 = vld [vmem:[%s14007_s30 + $0xe9] sm:$0xff] }
  0x1f   : > { %17153 = vst [vmem:[#allocation15_spill] sm:$0xff] %v14142_v30  ;;  %17154 = vst [vmem:[#allocation16_spill] sm:$0xff] %v14145_v31  ;;  %v14155_v33 = vld [vmem:[%s14007_s30 + $0xf1] sm:$0xff]  ;;  %v14162_v34 = vld [vmem:[%s14007_s30 + $0xf9] sm:$0xff] }
  0x20   : > { %17155 = vst [vmem:[#allocation17_spill] sm:$0xff] %v14152_v32  ;;  %17156 = vst [vmem:[#allocation18_spill] sm:$0xff] %v14155_v33  ;;  %v14165_v35 = vld [vmem:[%s14007_s30 + $0x101] sm:$0xff]  ;;  %v14172_v36 = vld [vmem:[%s14007_s30 + $0x109] sm:$0xff] }
  0x21   : > { %11265 = vmatmul.mubr.msk.f32.gmra.mrb[6].mxu0 %vm351_vm0, %v14042_v10  ;;  %17157 = vst [vmem:[#allocation19_spill] sm:$0xff] %v14162_v34  ;;  %17158 = vst [vmem:[#allocation20_spill] sm:$0xff] %v14165_v35  ;;  %v14175_v37 = vld [vmem:[%s14007_s30 + $0x111] sm:$0xff]  ;;  %v14182_v38 = vld [vmem:[%s14007_s30 + $0x119] sm:$0xff] }
  0x22   : > { %11267 = vmatprep.mubr.msk.f32.mxu0 %vm351_vm0, %v14045_v11  ;;  %17159 = vst [vmem:[#allocation21_spill] sm:$0xff] %v14172_v36  ;;  %17160 = vst [vmem:[#allocation22_spill] sm:$0xff] %v14175_v37  ;;  %v14185_v39 = vld [vmem:[%s14007_s30 + $0x121] sm:$0xff]  ;;  %v14192_v40 = vld [vmem:[%s14007_s30 + $0x129] sm:$0xff] }
  0x23   : > { %17161 = vst [vmem:[#allocation23_spill] sm:$0xff] %v14182_v38  ;;  %17162 = vst [vmem:[#allocation24_spill] sm:$0xff] %v14185_v39  ;;  %v14195_v41 = vld [vmem:[%s14007_s30 + $0x131] sm:$0xff]  ;;  %v14202_v42 = vld [vmem:[%s14007_s30 + $0x139] sm:$0xff] }
  0x24   : > { %17163 = vst [vmem:[#allocation25_spill] sm:$0xff] %v14192_v40  ;;  %17164 = vst [vmem:[#allocation26_spill] sm:$0xff] %v14195_v41  ;;  %v14205_v43 = vld [vmem:[%s14007_s30 + $0x141] sm:$0xff]  ;;  %v14212_v44 = vld [vmem:[%s14007_s30 + $0x149] sm:$0xff] }
  0x25   : > { %11268 = vmatmul.mubr.msk.f32.gmra.mrb[8].mxu0 %vm351_vm0, %v14052_v12  ;;  %17165 = vst [vmem:[#allocation27_spill] sm:$0xff] %v14202_v42  ;;  %17166 = vst [vmem:[#allocation28_spill] sm:$0xff] %v14205_v43  ;;  %v14215_v45 = vld [vmem:[%s14007_s30 + $0x151] sm:$0xff]  ;;  %v14222_v46 = vld [vmem:[%s14007_s30 + $0x159] sm:$0xff] }
  0x26   : > { %11270 = vmatprep.mubr.msk.f32.mxu0 %vm351_vm0, %v14055_v13  ;;  %17167 = vst [vmem:[#allocation29_spill] sm:$0xff] %v14212_v44  ;;  %17168 = vst [vmem:[#allocation30_spill] sm:$0xff] %v14215_v45  ;;  %v14225_v47 = vld [vmem:[%s14007_s30 + $0x161] sm:$0xff]  ;;  %v14232_v48 = vld [vmem:[%s14007_s30 + $0x169] sm:$0xff] }
  0x27   : > { %17169 = vst [vmem:[#allocation31_spill] sm:$0xff] %v14222_v46  ;;  %17170 = vst [vmem:[#allocation32_spill] sm:$0xff] %v14225_v47  ;;  %v14235_v49 = vld [vmem:[%s14007_s30 + $0x171] sm:$0xff]  ;;  %v14242_v50 = vld [vmem:[%s14007_s30 + $0x179] sm:$0xff] }
  0x28   : > { %17171 = vst [vmem:[#allocation33_spill] sm:$0xff] %v14232_v48  ;;  %17172 = vst [vmem:[#allocation34_spill] sm:$0xff] %v14235_v49  ;;  %v252_v51 = vld [vmem:[%s14007_s30] sm:$0xff]  ;;  %v253_v52 = vld [vmem:[%s14007_s30 + $0x8] sm:$0xff] }
  0x29   : > { %11271 = vmatmul.mubr.msk.f32.gmra.mrb[10].mxu0 %vm351_vm0, %v14062_v14  ;;  %17173 = vst [vmem:[#allocation35_spill] sm:$0xff] %v14242_v50  ;;  %v254_v53 = vld [vmem:[%s14007_s30 + $0x10] sm:$0xff]  ;;  %v14259_v55 = vld [vmem:[%s14007_s30 + $0x18] sm:$0xff]  ;;  %v14262_v56 = vld [vmem:[%s14007_s30 + $0x20] sm:$0xff] }
  0x2a   : > { %11273 = vmatprep.mubr.msk.f32.mxu0 %vm351_vm0, %v14065_v15  ;;  %v14270_v57 = vld [vmem:[%s14007_s30 + $0x28] sm:$0xff]  ;;  %v14273_v58 = vld [vmem:[%s14007_s30 + $0x30] sm:$0xff]  ;;  %v14280_v59 = vld [vmem:[%s14007_s30 + $0x38] sm:$0xff] }
  0x2b   : > { %v14283_v60 = vld [vmem:[%s14007_s30 + $0x40] sm:$0xff]  ;;  %v14290_v61 = vld [vmem:[%s14007_s30 + $0x48] sm:$0xff]  ;;  %v14293_v62 = vld [vmem:[%s14007_s30 + $0x50] sm:$0xff] }
  0x2c   : > { %v14300_v63 = vld [vmem:[%s14007_s30 + $0x58] sm:$0xff]  ;;  %v14303_v0 = vld [vmem:[%s14007_s30 + $0x60] sm:$0xff]  ;;  %v14310_v1 = vld [vmem:[%s14007_s30 + $0x68] sm:$0xff] }
  0x2d   : > { %11274 = vmatmul.mubr.msk.f32.gmra.mrb[12].mxu0 %vm351_vm0, %v14072_v16  ;;  %v14313_v2 = vld [vmem:[%s14007_s30 + $0x70] sm:$0xff]  ;;  %v14320_v3 = vld [vmem:[%s14007_s30 + $0x78] sm:$0xff]  ;;  %v14323_v4 = vld [vmem:[%s14007_s30 + $0x80] sm:$0xff] }
  0x2e   : > { %11276 = vmatprep.mubr.msk.f32.mxu0 %vm351_vm0, %v14075_v17 }
  0x31   : > { %11277 = vmatmul.mubr.msk.f32.gmra.mrb[14].mxu0 %vm351_vm0, %v14082_v18  ;;  %v14521_v18 = vld [vmem:[%s14007_s30 + $0x42] sm:$0xff] }
  0x32   : > { %11279 = vmatprep.mubr.msk.f32.mxu0 %vm351_vm0, %v14085_v19  ;;  %v14497_v19 = vld [vmem:[%s14007_s30 + $0x1a] sm:$0xff]  ;;  %17179 = vst [vmem:[#allocation41_spill] sm:$0xff] %v14521_v18 }
  0x33   : > { %17174 = vst [vmem:[#allocation36_spill] sm:$0xff] %v14497_v19 }
  0x35   : > { %11280 = vmatmul.mubr.msk.f32.gmra.mrb[16].mxu0 %vm351_vm0, %v14092_v20  ;;  %v14491_v20 = vld [vmem:[%s17026_s1 + $0x20] sm:$0xff] }
  0x36   : > { %11282 = vmatprep.mubr.msk.f32.mxu0 %vm351_vm0, %v14095_v21  ;;  %v1252_v21 = vld [vmem:[%s14007_s30 + $0x12] sm:$0xff] }
  0x39   : > { %11283 = vmatmul.mubr.msk.f32.gmra.mrb[18].mxu0 %vm351_vm0, %v14102_v22  ;;  %v1251_v22 = vld [vmem:[%s14007_s30 + $0xa] sm:$0xff] }
  0x3a   : > { %11285 = vmatprep.mubr.msk.f32.mxu0 %vm351_vm0, %v14105_v23  ;;  %v1250_v23 = vld [vmem:[%s14007_s30 + $0x2] sm:$0xff] }
  0x3d   : > { %11286 = vmatmul.mubr.msk.f32.gmra.mrb[20].mxu0 %vm351_vm0, %v14112_v24  ;;  %v14480_v24 = vld [vmem:[%s14007_s30 + $0x178] sm:$0xff] }
  0x3e   : > { %11288 = vmatprep.mubr.msk.f32.mxu0 %vm351_vm0, %v14115_v25  ;;  %v14473_v25 = vld [vmem:[%s14007_s30 + $0x170] sm:$0xff] }
  0x41   : > { %11289 = vmatmul.mubr.msk.f32.gmra.mrb[22].mxu0 %vm351_vm0, %v14122_v26  ;;  %v14470_v26 = vld [vmem:[%s14007_s30 + $0x168] sm:$0xff] }
  0x42   : > { %11291 = vmatprep.mubr.msk.f32.mxu0 %vm351_vm0, %v14125_v27  ;;  %v14463_v27 = vld [vmem:[%s14007_s30 + $0x160] sm:$0xff] }
  0x45   : > { %11292 = vmatmul.mubr.msk.f32.gmra.mrb[24].mxu0 %vm351_vm0, %v14132_v28  ;;  %v14460_v28 = vld [vmem:[%s14007_s30 + $0x158] sm:$0xff] }
  0x46   : > { %11294 = vmatprep.mubr.msk.f32.mxu0 %vm351_vm0, %v14135_v29  ;;  %v14453_v29 = vld [vmem:[%s14007_s30 + $0x150] sm:$0xff] }
  0x49   : > { %11295 = vmatmul.mubr.msk.f32.gmra.mrb[26].mxu0 %vm351_vm0, %v14142_v30  ;;  %v14450_v30 = vld [vmem:[%s14007_s30 + $0x148] sm:$0xff] }
  0x4a   : > { %11297 = vmatprep.mubr.msk.f32.mxu0 %vm351_vm0, %v14145_v31  ;;  %v14443_v31 = vld [vmem:[%s14007_s30 + $0x140] sm:$0xff] }
  0x4d   : > { %11298 = vmatmul.mubr.msk.f32.gmra.mrb[28].mxu0 %vm351_vm0, %v14152_v32  ;;  %v14440_v32 = vld [vmem:[%s14007_s30 + $0x138] sm:$0xff] }
  0x4e   : > { %11300 = vmatprep.mubr.msk.f32.mxu0 %vm351_vm0, %v14155_v33  ;;  %v14433_v33 = vld [vmem:[%s14007_s30 + $0x130] sm:$0xff] }
  0x51   : > { %11301 = vmatmul.mubr.msk.f32.gmra.mrb[30].mxu0 %vm351_vm0, %v14162_v34  ;;  %v14430_v34 = vld [vmem:[%s14007_s30 + $0x128] sm:$0xff] }
  0x52   : > { %11303 = vmatprep.mubr.msk.f32.mxu0 %vm351_vm0, %v14165_v35  ;;  %v14423_v35 = vld [vmem:[%s14007_s30 + $0x120] sm:$0xff] }
  0x55   : > { %11304 = vmatmul.mubr.msk.f32.gmra.mrb[32].mxu0 %vm351_vm0, %v14172_v36  ;;  %v14420_v36 = vld [vmem:[%s14007_s30 + $0x118] sm:$0xff] }
  0x56   : > { %11306 = vmatprep.mubr.msk.f32.mxu0 %vm351_vm0, %v14175_v37  ;;  %v14413_v37 = vld [vmem:[%s14007_s30 + $0x110] sm:$0xff] }
  0x59   : > { %11307 = vmatmul.mubr.msk.f32.gmra.mrb[34].mxu0 %vm351_vm0, %v14182_v38  ;;  %v14410_v38 = vld [vmem:[%s14007_s30 + $0x108] sm:$0xff] }
  0x5a   : > { %11309 = vmatprep.mubr.msk.f32.mxu0 %vm351_vm0, %v14185_v39  ;;  %v14403_v39 = vld [vmem:[%s14007_s30 + $0x100] sm:$0xff] }
  0x5d   : > { %11310 = vmatmul.mubr.msk.f32.gmra.mrb[36].mxu0 %vm351_vm0, %v14192_v40  ;;  %v14400_v40 = vld [vmem:[%s14007_s30 + $0xf8] sm:$0xff] }
  0x5e   : > { %11312 = vmatprep.mubr.msk.f32.mxu0 %vm351_vm0, %v14195_v41  ;;  %v14393_v41 = vld [vmem:[%s14007_s30 + $0xf0] sm:$0xff] }
  0x61   : > { %11313 = vmatmul.mubr.msk.f32.gmra.mrb[38].mxu0 %vm351_vm0, %v14202_v42  ;;  %v14390_v42 = vld [vmem:[%s14007_s30 + $0xe8] sm:$0xff] }
  0x62   : > { %11315 = vmatprep.mubr.msk.f32.mxu0 %vm351_vm0, %v14205_v43  ;;  %v14383_v43 = vld [vmem:[%s14007_s30 + $0xe0] sm:$0xff] }
  0x65   : > { %11316 = vmatmul.mubr.msk.f32.gmra.mrb[40].mxu0 %vm351_vm0, %v14212_v44  ;;  %v14380_v44 = vld [vmem:[%s14007_s30 + $0xd8] sm:$0xff] }
  0x66   : > { %11318 = vmatprep.mubr.msk.f32.mxu0 %vm351_vm0, %v14215_v45  ;;  %v14373_v45 = vld [vmem:[%s14007_s30 + $0xd0] sm:$0xff] }
  0x69   : > { %11319 = vmatmul.mubr.msk.f32.gmra.mrb[42].mxu0 %vm351_vm0, %v14222_v46  ;;  %v14370_v46 = vld [vmem:[%s14007_s30 + $0xc8] sm:$0xff] }
  0x6a   : > { %11321 = vmatprep.mubr.msk.f32.mxu0 %vm351_vm0, %v14225_v47  ;;  %v14363_v47 = vld [vmem:[%s14007_s30 + $0xc0] sm:$0xff] }
  0x6d   : > { %11322 = vmatmul.mubr.msk.f32.gmra.mrb[44].mxu0 %vm351_vm0, %v14232_v48  ;;  %v14360_v48 = vld [vmem:[%s14007_s30 + $0xb8] sm:$0xff] }
  0x6e   : > { %11324 = vmatprep.mubr.msk.f32.mxu0 %vm351_vm0, %v14235_v49  ;;  %v14353_v49 = vld [vmem:[%s14007_s30 + $0xb0] sm:$0xff] }
  0x71   : > { %11325 = vmatmul.mubr.msk.f32.gmra.mrb[46].mxu0 %vm351_vm0, %v14242_v50  ;;  %v14350_v50 = vld [vmem:[%s14007_s30 + $0xa8] sm:$0xff] }
  0x72   : > { %11329 = vmatprep.mubr.msk.f32.mxu0 %vm351_vm0, %v252_v51  ;;  %v14333_v51 = vld [vmem:[%s14007_s30 + $0x90] sm:$0xff] }
  0x75   : > { %11330 = vmatmul.mubr.msk.f32.vlgmr.msra.gmra.mrb[0].mxu0 %vm351_vm0, %v253_v52  ;;  %v14340_v52 = vld [vmem:[%s14007_s30 + $0x98] sm:$0xff] }
  0x76   : > { %11402 = vmatpush3.msra.mxu0 %v14016_v5  ;;  %11332 = vmatprep.mubr.msk.f32.mxu0 %vm351_vm0, %v254_v53  ;;  %v14330_v5 = vld [vmem:[%s14007_s30 + $0x88] sm:$0xff]  ;;  %v14343_v53 = vld [vmem:[%s14007_s30 + $0xa0] sm:$0xff] }
  0x77   : > { %11475 = vmatprep.subr.mxu0 %v14253_v54 }
  0x79   : > { %11333 = vmatmul.mubr.msk.f32.gmra.mrb[2].mxu0 %vm351_vm0, %v14259_v55 }
  0x7a   : > { %11335 = vmatprep.mubr.msk.f32.mxu0 %vm351_vm0, %v14262_v56 }
  0x7d   : > { %11336 = vmatmul.mubr.msk.f32.gmra.mrb[4].mxu0 %vm351_vm0, %v14270_v57 }
  0x7e   : > { %11338 = vmatprep.mubr.msk.f32.mxu0 %vm351_vm0, %v14273_v58 }
  0x81   : > { %11339 = vmatmul.mubr.msk.f32.gmra.mrb[6].mxu0 %vm351_vm0, %v14280_v59 }
  0x82   : > { %11341 = vmatprep.mubr.msk.f32.mxu0 %vm351_vm0, %v14283_v60 }
  0x85   : > { %11342 = vmatmul.mubr.msk.f32.gmra.mrb[8].mxu0 %vm351_vm0, %v14290_v61 }
  0x86   : > { %11344 = vmatprep.mubr.msk.f32.mxu0 %vm351_vm0, %v14293_v62 }
  0x89   : > { %11345 = vmatmul.mubr.msk.f32.gmra.mrb[10].mxu0 %vm351_vm0, %v14300_v63 }
  0x8a   : > { %11347 = vmatprep.mubr.msk.f32.mxu0 %vm351_vm0, %v14303_v0 }
  0x8d   : > { %11348 = vmatmul.mubr.msk.f32.gmra.mrb[12].mxu0 %vm351_vm0, %v14310_v1 }
  0x8e   : > { %11350 = vmatprep.mubr.msk.f32.mxu0 %vm351_vm0, %v14313_v2 }
  0x91   : > { %11351 = vmatmul.mubr.msk.f32.gmra.mrb[14].mxu0 %vm351_vm0, %v14320_v3 }
  0x92   : > { %11353 = vmatprep.mubr.msk.f32.mxu0 %vm351_vm0, %v14323_v4 }
  0x95   : > { %11354 = vmatmul.mubr.msk.f32.gmra.mrb[16].mxu0 %vm351_vm0, %v14330_v5 }
  0x96   : > { %11356 = vmatprep.mubr.msk.f32.mxu0 %vm351_vm0, %v14333_v51 }
  0x99   : > { %11357 = vmatmul.mubr.msk.f32.gmra.mrb[18].mxu0 %vm351_vm0, %v14340_v52 }
  0x9a   : > { %11359 = vmatprep.mubr.msk.f32.mxu0 %vm351_vm0, %v14343_v53 }
  0x9d   : > { %11360 = vmatmul.mubr.msk.f32.gmra.mrb[20].mxu0 %vm351_vm0, %v14350_v50 }
  0x9e   : > { %11362 = vmatprep.mubr.msk.f32.mxu0 %vm351_vm0, %v14353_v49 }
  0xa1   : > { %11363 = vmatmul.mubr.msk.f32.gmra.mrb[22].mxu0 %vm351_vm0, %v14360_v48 }
  0xa2   : > { %11365 = vmatprep.mubr.msk.f32.mxu0 %vm351_vm0, %v14363_v47 }
  0xa5   : > { %11366 = vmatmul.mubr.msk.f32.gmra.mrb[24].mxu0 %vm351_vm0, %v14370_v46 }
  0xa6   : > { %11368 = vmatprep.mubr.msk.f32.mxu0 %vm351_vm0, %v14373_v45 }
  0xa9   : > { %11369 = vmatmul.mubr.msk.f32.gmra.mrb[26].mxu0 %vm351_vm0, %v14380_v44 }
  0xaa   : > { %11371 = vmatprep.mubr.msk.f32.mxu0 %vm351_vm0, %v14383_v43 }
  0xad   : > { %11372 = vmatmul.mubr.msk.f32.gmra.mrb[28].mxu0 %vm351_vm0, %v14390_v42 }
  0xae   : > { %11374 = vmatprep.mubr.msk.f32.mxu0 %vm351_vm0, %v14393_v41 }
  0xb1   : > { %11375 = vmatmul.mubr.msk.f32.gmra.mrb[30].mxu0 %vm351_vm0, %v14400_v40 }
  0xb2   : > { %11377 = vmatprep.mubr.msk.f32.mxu0 %vm351_vm0, %v14403_v39 }
  0xb5   : > { %11378 = vmatmul.mubr.msk.f32.gmra.mrb[32].mxu0 %vm351_vm0, %v14410_v38 }
  0xb6   : > { %11380 = vmatprep.mubr.msk.f32.mxu0 %vm351_vm0, %v14413_v37 }
  0xb9   : > { %11381 = vmatmul.mubr.msk.f32.gmra.mrb[34].mxu0 %vm351_vm0, %v14420_v36 }
  0xba   : > { %11383 = vmatprep.mubr.msk.f32.mxu0 %vm351_vm0, %v14423_v35 }
  0xbd   : > { %11384 = vmatmul.mubr.msk.f32.gmra.mrb[36].mxu0 %vm351_vm0, %v14430_v34 }
  0xbe   : > { %11386 = vmatprep.mubr.msk.f32.mxu0 %vm351_vm0, %v14433_v33 }
  0xc1   : > { %11387 = vmatmul.mubr.msk.f32.gmra.mrb[38].mxu0 %vm351_vm0, %v14440_v32 }
  0xc2   : > { %11389 = vmatprep.mubr.msk.f32.mxu0 %vm351_vm0, %v14443_v31 }
  0xc5   : > { %11390 = vmatmul.mubr.msk.f32.gmra.mrb[40].mxu0 %vm351_vm0, %v14450_v30 }
  0xc6   : > { %11392 = vmatprep.mubr.msk.f32.mxu0 %vm351_vm0, %v14453_v29 }
  0xc9   : > { %11393 = vmatmul.mubr.msk.f32.gmra.mrb[42].mxu0 %vm351_vm0, %v14460_v28 }
  0xca   : > { %11395 = vmatprep.mubr.msk.f32.mxu0 %vm351_vm0, %v14463_v27 }
  0xcd   : > { %11396 = vmatmul.mubr.msk.f32.gmra.mrb[44].mxu0 %vm351_vm0, %v14470_v26 }
  0xce   : > { %11398 = vmatprep.mubr.msk.f32.mxu0 %vm351_vm0, %v14473_v25 }
  0xd1   : > { %11399 = vmatmul.mubr.msk.f32.gmra.mrb[46].mxu0 %vm351_vm0, %v14480_v24 }
  0xd2   : > { %11403 = vmatprep.mubr.msk.f32.mxu0 %vm351_vm0, %v1250_v23  ;;  %v14500_v23 = vld [vmem:[%s14007_s30 + $0x22] sm:$0xff] }
  0xd3   : > { %17175 = vst [vmem:[#allocation37_spill] sm:$0xff] %v14500_v23 }
  0xd5   : > { %11404 = vmatmul.mubr.msk.f32.vlgmr.msra.gmra.mrb[0].mxu0 %vm351_vm0, %v1251_v22  ;;  %v14508_v22 = vld [vmem:[%s14007_s30 + $0x2a] sm:$0xff] }
  0xd6   : > { %11476 = vmatpush3.msra.mxu0 %v14253_v54  ;;  %11406 = vmatprep.mubr.msk.f32.mxu0 %vm351_vm0, %v1252_v21  ;;  %17176 = vst [vmem:[#allocation38_spill] sm:$0xff] %v14508_v22  ;;  %v14511_v54 = vld [vmem:[%s14007_s30 + $0x32] sm:$0xff]  ;;  %v14518_v21 = vld [vmem:[%s14007_s30 + $0x3a] sm:$0xff] }
  0xd7   : > { %11549 = vmatprep.subr.mxu0 %v14491_v20  ;;  %17177 = vst [vmem:[#allocation39_spill] sm:$0xff] %v14511_v54  ;;  %17178 = vst [vmem:[#allocation40_spill] sm:$0xff] %v14518_v21 }
  0xd9   : > { %11407 = vmatmul.mubr.msk.f32.gmra.mrb[2].mxu0 %vm351_vm0, %v14497_v19  ;;  %v14531_v19 = vld [vmem:[%s14007_s30 + $0x52] sm:$0xff] }
  0xda   : > { %11409 = vmatprep.mubr.msk.f32.mxu0 %vm351_vm0, %v14500_v23  ;;  %v14528_v23 = vld [vmem:[%s14007_s30 + $0x4a] sm:$0xff]  ;;  %17181 = vst [vmem:[#allocation43_spill] sm:$0xff] %v14531_v19 }
  0xdb   : > { %17180 = vst [vmem:[#allocation42_spill] sm:$0xff] %v14528_v23 }
  0xdd   : > { %11410 = vmatmul.mubr.msk.f32.gmra.mrb[4].mxu0 %vm351_vm0, %v14508_v22  ;;  %v14541_v22 = vld [vmem:[%s14007_s30 + $0x62] sm:$0xff] }
  0xde   : > { %11412 = vmatprep.mubr.msk.f32.mxu0 %vm351_vm0, %v14511_v54  ;;  %v14538_v54 = vld [vmem:[%s14007_s30 + $0x5a] sm:$0xff]  ;;  %17183 = vst [vmem:[#allocation45_spill] sm:$0xff] %v14541_v22 }
  0xdf   : > { %17182 = vst [vmem:[#allocation44_spill] sm:$0xff] %v14538_v54 }
  0xe1   : > { %11413 = vmatmul.mubr.msk.f32.gmra.mrb[6].mxu0 %vm351_vm0, %v14518_v21  ;;  %v14551_v21 = vld [vmem:[%s14007_s30 + $0x72] sm:$0xff] }
  0xe2   : > { %11415 = vmatprep.mubr.msk.f32.mxu0 %vm351_vm0, %v14521_v18  ;;  %v14548_v18 = vld [vmem:[%s14007_s30 + $0x6a] sm:$0xff]  ;;  %17185 = vst [vmem:[#allocation47_spill] sm:$0xff] %v14551_v21 }
  0xe3   : > { %17184 = vst [vmem:[#allocation46_spill] sm:$0xff] %v14548_v18 }
  0xe5   : > { %11416 = vmatmul.mubr.msk.f32.gmra.mrb[8].mxu0 %vm351_vm0, %v14528_v23  ;;  %v14561_v23 = vld [vmem:[%s14007_s30 + $0x82] sm:$0xff] }
  0xe6   : > { %11418 = vmatprep.mubr.msk.f32.mxu0 %vm351_vm0, %v14531_v19  ;;  %v14558_v19 = vld [vmem:[%s14007_s30 + $0x7a] sm:$0xff]  ;;  %17187 = vst [vmem:[#allocation49_spill] sm:$0xff] %v14561_v23 }
  0xe7   : > { %17186 = vst [vmem:[#allocation48_spill] sm:$0xff] %v14558_v19 }
  0xe9   : > { %11419 = vmatmul.mubr.msk.f32.gmra.mrb[10].mxu0 %vm351_vm0, %v14538_v54  ;;  %v14571_v54 = vld [vmem:[%s14007_s30 + $0x92] sm:$0xff] }
  0xea   : > { %11421 = vmatprep.mubr.msk.f32.mxu0 %vm351_vm0, %v14541_v22  ;;  %v14568_v22 = vld [vmem:[%s14007_s30 + $0x8a] sm:$0xff]  ;;  %17189 = vst [vmem:[#allocation51_spill] sm:$0xff] %v14571_v54 }
  0xeb   : > { %17188 = vst [vmem:[#allocation50_spill] sm:$0xff] %v14568_v22 }
  0xed   : > { %11422 = vmatmul.mubr.msk.f32.gmra.mrb[12].mxu0 %vm351_vm0, %v14548_v18  ;;  %v14581_v18 = vld [vmem:[%s14007_s30 + $0xa2] sm:$0xff] }
  0xee   : > { %11424 = vmatprep.mubr.msk.f32.mxu0 %vm351_vm0, %v14551_v21  ;;  %v14578_v21 = vld [vmem:[%s14007_s30 + $0x9a] sm:$0xff]  ;;  %17191 = vst [vmem:[#allocation53_spill] sm:$0xff] %v14581_v18 }
  0xef   : > { %17190 = vst [vmem:[#allocation52_spill] sm:$0xff] %v14578_v21 }
  0xf1   : > { %11425 = vmatmul.mubr.msk.f32.gmra.mrb[14].mxu0 %vm351_vm0, %v14558_v19  ;;  %v14591_v19 = vld [vmem:[%s14007_s30 + $0xb2] sm:$0xff] }
  0xf2   : > { %11427 = vmatprep.mubr.msk.f32.mxu0 %vm351_vm0, %v14561_v23  ;;  %v14588_v23 = vld [vmem:[%s14007_s30 + $0xaa] sm:$0xff]  ;;  %17193 = vst [vmem:[#allocation55_spill] sm:$0xff] %v14591_v19 }
  0xf3   : > { %17192 = vst [vmem:[#allocation54_spill] sm:$0xff] %v14588_v23 }
  0xf5   : > { %11428 = vmatmul.mubr.msk.f32.gmra.mrb[16].mxu0 %vm351_vm0, %v14568_v22  ;;  %v14601_v22 = vld [vmem:[%s14007_s30 + $0xc2] sm:$0xff] }
  0xf6   : > { %11430 = vmatprep.mubr.msk.f32.mxu0 %vm351_vm0, %v14571_v54  ;;  %v14598_v54 = vld [vmem:[%s14007_s30 + $0xba] sm:$0xff]  ;;  %17195 = vst [vmem:[#allocation57_spill] sm:$0xff] %v14601_v22 }
  0xf7   : > { %17194 = vst [vmem:[#allocation56_spill] sm:$0xff] %v14598_v54 }
  0xf9   : > { %11431 = vmatmul.mubr.msk.f32.gmra.mrb[18].mxu0 %vm351_vm0, %v14578_v21  ;;  %v14611_v21 = vld [vmem:[%s14007_s30 + $0xd2] sm:$0xff] }
  0xfa   : > { %11433 = vmatprep.mubr.msk.f32.mxu0 %vm351_vm0, %v14581_v18  ;;  %v14608_v18 = vld [vmem:[%s14007_s30 + $0xca] sm:$0xff]  ;;  %17197 = vst [vmem:[#allocation59_spill] sm:$0xff] %v14611_v21 }
  0xfb   : > { %17196 = vst [vmem:[#allocation58_spill] sm:$0xff] %v14608_v18 }
  0xfd   : > { %11434 = vmatmul.mubr.msk.f32.gmra.mrb[20].mxu0 %vm351_vm0, %v14588_v23  ;;  %v14621_v23 = vld [vmem:[%s14007_s30 + $0xe2] sm:$0xff] }
  0xfe   : > { %11436 = vmatprep.mubr.msk.f32.mxu0 %vm351_vm0, %v14591_v19  ;;  %v14618_v19 = vld [vmem:[%s14007_s30 + $0xda] sm:$0xff]  ;;  %17199 = vst [vmem:[#allocation61_spill] sm:$0xff] %v14621_v23 }
  0xff   : > { %17198 = vst [vmem:[#allocation60_spill] sm:$0xff] %v14618_v19 }
 0x101   : > { %11437 = vmatmul.mubr.msk.f32.gmra.mrb[22].mxu0 %vm351_vm0, %v14598_v54  ;;  %v14631_v54 = vld [vmem:[%s14007_s30 + $0xf2] sm:$0xff] }
 0x102   : > { %11439 = vmatprep.mubr.msk.f32.mxu0 %vm351_vm0, %v14601_v22  ;;  %v14628_v22 = vld [vmem:[%s14007_s30 + $0xea] sm:$0xff]  ;;  %17201 = vst [vmem:[#allocation63_spill] sm:$0xff] %v14631_v54 }
 0x103   : > { %17200 = vst [vmem:[#allocation62_spill] sm:$0xff] %v14628_v22 }
 0x105   : > { %11440 = vmatmul.mubr.msk.f32.gmra.mrb[24].mxu0 %vm351_vm0, %v14608_v18  ;;  %v14641_v18 = vld [vmem:[%s14007_s30 + $0x102] sm:$0xff] }
 0x106   : > { %11442 = vmatprep.mubr.msk.f32.mxu0 %vm351_vm0, %v14611_v21  ;;  %v14638_v21 = vld [vmem:[%s14007_s30 + $0xfa] sm:$0xff]  ;;  %17203 = vst [vmem:[#allocation65_spill] sm:$0xff] %v14641_v18 }
 0x107   : > { %17202 = vst [vmem:[#allocation64_spill] sm:$0xff] %v14638_v21 }
 0x109   : > { %11443 = vmatmul.mubr.msk.f32.gmra.mrb[26].mxu0 %vm351_vm0, %v14618_v19  ;;  %v14651_v19 = vld [vmem:[%s14007_s30 + $0x112] sm:$0xff] }
 0x10a   : > { %11445 = vmatprep.mubr.msk.f32.mxu0 %vm351_vm0, %v14621_v23  ;;  %v14648_v23 = vld [vmem:[%s14007_s30 + $0x10a] sm:$0xff]  ;;  %17205 = vst [vmem:[#allocation67_spill] sm:$0xff] %v14651_v19 }
 0x10b   : > { %17204 = vst [vmem:[#allocation66_spill] sm:$0xff] %v14648_v23 }
 0x10d   : > { %11446 = vmatmul.mubr.msk.f32.gmra.mrb[28].mxu0 %vm351_vm0, %v14628_v22  ;;  %v14661_v22 = vld [vmem:[%s14007_s30 + $0x122] sm:$0xff] }
 0x10e   : > { %11448 = vmatprep.mubr.msk.f32.mxu0 %vm351_vm0, %v14631_v54  ;;  %v14658_v54 = vld [vmem:[%s14007_s30 + $0x11a] sm:$0xff]  ;;  %17207 = vst [vmem:[#allocation69_spill] sm:$0xff] %v14661_v22 }
 0x10f   : > { %17206 = vst [vmem:[#allocation68_spill] sm:$0xff] %v14658_v54 }
 0x111   : > { %11449 = vmatmul.mubr.msk.f32.gmra.mrb[30].mxu0 %vm351_vm0, %v14638_v21  ;;  %v14671_v21 = vld [vmem:[%s14007_s30 + $0x132] sm:$0xff] }
 0x112   : > { %11451 = vmatprep.mubr.msk.f32.mxu0 %vm351_vm0, %v14641_v18  ;;  %v14668_v18 = vld [vmem:[%s14007_s30 + $0x12a] sm:$0xff]  ;;  %17209 = vst [vmem:[#allocation71_spill] sm:$0xff] %v14671_v21 }
 0x113   : > { %17208 = vst [vmem:[#allocation70_spill] sm:$0xff] %v14668_v18 }
 0x115   : > { %11452 = vmatmul.mubr.msk.f32.gmra.mrb[32].mxu0 %vm351_vm0, %v14648_v23  ;;  %v14681_v23 = vld [vmem:[%s14007_s30 + $0x142] sm:$0xff] }
 0x116   : > { %11454 = vmatprep.mubr.msk.f32.mxu0 %vm351_vm0, %v14651_v19  ;;  %v14678_v19 = vld [vmem:[%s14007_s30 + $0x13a] sm:$0xff]  ;;  %17211 = vst [vmem:[#allocation73_spill] sm:$0xff] %v14681_v23 }
 0x117   : > { %17210 = vst [vmem:[#allocation72_spill] sm:$0xff] %v14678_v19 }
 0x119   : > { %11455 = vmatmul.mubr.msk.f32.gmra.mrb[34].mxu0 %vm351_vm0, %v14658_v54  ;;  %v14691_v54 = vld [vmem:[%s14007_s30 + $0x152] sm:$0xff] }
 0x11a   : > { %11457 = vmatprep.mubr.msk.f32.mxu0 %vm351_vm0, %v14661_v22  ;;  %v14688_v22 = vld [vmem:[%s14007_s30 + $0x14a] sm:$0xff]  ;;  %17212 = vst [vmem:[#allocation74_spill] sm:$0xff] %v14691_v54 }
 0x11d   : > { %11458 = vmatmul.mubr.msk.f32.gmra.mrb[36].mxu0 %vm351_vm0, %v14668_v18  ;;  %v14701_v18 = vld [vmem:[%s14007_s30 + $0x162] sm:$0xff] }
 0x11e   : > { %11460 = vmatprep.mubr.msk.f32.mxu0 %vm351_vm0, %v14671_v21  ;;  %v14698_v21 = vld [vmem:[%s14007_s30 + $0x15a] sm:$0xff]  ;;  %17213 = vst [vmem:[#allocation75_spill] sm:$0xff] %v14701_v18 }
 0x121   : > { %11461 = vmatmul.mubr.msk.f32.gmra.mrb[38].mxu0 %vm351_vm0, %v14678_v19  ;;  %v14711_v19 = vld [vmem:[%s14007_s30 + $0x172] sm:$0xff] }
 0x122   : > { %11463 = vmatprep.mubr.msk.f32.mxu0 %vm351_vm0, %v14681_v23  ;;  %v14708_v23 = vld [vmem:[%s14007_s30 + $0x16a] sm:$0xff] }
 0x125   : > { %11464 = vmatmul.mubr.msk.f32.gmra.mrb[40].mxu0 %vm351_vm0, %v14688_v22 }
 0x126   : > { %11466 = vmatprep.mubr.msk.f32.mxu0 %vm351_vm0, %v14691_v54  ;;  %v14718_v54 = vld [vmem:[%s14007_s30 + $0x17a] sm:$0xff] }
 0x129   : > { %11467 = vmatmul.mubr.msk.f32.gmra.mrb[42].mxu0 %vm351_vm0, %v14698_v21 }
 0x12a   : > { %11469 = vmatprep.mubr.msk.f32.mxu0 %vm351_vm0, %v14701_v18  ;;  %v9904_v18 = vld [vmem:[%s17026_s1 + $0x28] sm:$0xff] }
 0x12d   : > { %11470 = vmatmul.mubr.msk.f32.gmra.mrb[44].mxu0 %vm351_vm0, %v14708_v23 }
 0x12e   : > { %11472 = vmatprep.mubr.msk.f32.mxu0 %vm351_vm0, %v14711_v19 }
 0x131   : > { %11473 = vmatmul.mubr.msk.f32.gmra.mrb[46].mxu0 %vm351_vm0, %v14718_v54 }
 0x132   : > { %11477 = vmatprep.mubr.msk.f32.mxu0 %vm351_vm0, %v14259_v55  ;;  %v14820_v55 = vld [vmem:[%s14007_s30 + $0x188] sm:$0xff] }
 0x135   : > { %11478 = vmatmul.mubr.msk.f32.vlgmr.msra.gmra.mrb[0].mxu0 %vm351_vm0, %v14262_v56  ;;  %v14827_v56 = vld [vmem:[%s14007_s30 + $0x190] sm:$0xff] }
 0x136   : > { %11550 = vmatpush3.msra.mxu0 %v14491_v20  ;;  %11480 = vmatprep.mubr.msk.f32.mxu0 %vm351_vm0, %v14270_v57  ;;  %v14817_v20 = vld [vmem:[%s14007_s30 + $0x180] sm:$0xff]  ;;  %v9953_v57 = vld [vmem:[%s17026_s1 + $0x30] sm:$0xff] }
 0x137   : > { %11623 = vmatprep.subr.mxu0 %v9904_v18 }
 0x139   : > { %11481 = vmatmul.mubr.msk.f32.gmra.mrb[2].mxu0 %vm351_vm0, %v14273_v58 }
 0x13a   : > { %11483 = vmatprep.mubr.msk.f32.mxu0 %vm351_vm0, %v14280_v59 }
 0x13d   : > { %11484 = vmatmul.mubr.msk.f32.gmra.mrb[4].mxu0 %vm351_vm0, %v14283_v60 }
 0x13e   : > { %11486 = vmatprep.mubr.msk.f32.mxu0 %vm351_vm0, %v14290_v61 }
 0x141   : > { %11487 = vmatmul.mubr.msk.f32.gmra.mrb[6].mxu0 %vm351_vm0, %v14293_v62 }
 0x142   : > { %11489 = vmatprep.mubr.msk.f32.mxu0 %vm351_vm0, %v14300_v63 }
 0x145   : > { %11490 = vmatmul.mubr.msk.f32.gmra.mrb[8].mxu0 %vm351_vm0, %v14303_v0 }
 0x146   : > { %11492 = vmatprep.mubr.msk.f32.mxu0 %vm351_vm0, %v14310_v1 }
 0x149   : > { %11493 = vmatmul.mubr.msk.f32.gmra.mrb[10].mxu0 %vm351_vm0, %v14313_v2 }
 0x14a   : > { %11495 = vmatprep.mubr.msk.f32.mxu0 %vm351_vm0, %v14320_v3 }
 0x14d   : > { %11496 = vmatmul.mubr.msk.f32.gmra.mrb[12].mxu0 %vm351_vm0, %v14323_v4 }
 0x14e   : > { %11498 = vmatprep.mubr.msk.f32.mxu0 %vm351_vm0, %v14330_v5 }
 0x151   : > { %11499 = vmatmul.mubr.msk.f32.gmra.mrb[14].mxu0 %vm351_vm0, %v14333_v51 }
 0x152   : > { %11501 = vmatprep.mubr.msk.f32.mxu0 %vm351_vm0, %v14340_v52 }
 0x155   : > { %11502 = vmatmul.mubr.msk.f32.gmra.mrb[16].mxu0 %vm351_vm0, %v14343_v53 }
 0x156   : > { %11504 = vmatprep.mubr.msk.f32.mxu0 %vm351_vm0, %v14350_v50 }
 0x159   : > { %11505 = vmatmul.mubr.msk.f32.gmra.mrb[18].mxu0 %vm351_vm0, %v14353_v49 }
 0x15a   : > { %11507 = vmatprep.mubr.msk.f32.mxu0 %vm351_vm0, %v14360_v48 }
 0x15d   : > { %11508 = vmatmul.mubr.msk.f32.gmra.mrb[20].mxu0 %vm351_vm0, %v14363_v47 }
 0x15e   : > { %11510 = vmatprep.mubr.msk.f32.mxu0 %vm351_vm0, %v14370_v46 }
 0x161   : > { %11511 = vmatmul.mubr.msk.f32.gmra.mrb[22].mxu0 %vm351_vm0, %v14373_v45 }
 0x162   : > { %11513 = vmatprep.mubr.msk.f32.mxu0 %vm351_vm0, %v14380_v44 }
 0x165   : > { %11514 = vmatmul.mubr.msk.f32.gmra.mrb[24].mxu0 %vm351_vm0, %v14383_v43 }
 0x166   : > { %11516 = vmatprep.mubr.msk.f32.mxu0 %vm351_vm0, %v14390_v42 }
 0x169   : > { %11517 = vmatmul.mubr.msk.f32.gmra.mrb[26].mxu0 %vm351_vm0, %v14393_v41 }
 0x16a   : > { %11519 = vmatprep.mubr.msk.f32.mxu0 %vm351_vm0, %v14400_v40 }
 0x16d   : > { %11520 = vmatmul.mubr.msk.f32.gmra.mrb[28].mxu0 %vm351_vm0, %v14403_v39 }
 0x16e   : > { %11522 = vmatprep.mubr.msk.f32.mxu0 %vm351_vm0, %v14410_v38 }
 0x171   : > { %11523 = vmatmul.mubr.msk.f32.gmra.mrb[30].mxu0 %vm351_vm0, %v14413_v37 }
 0x172   : > { %11525 = vmatprep.mubr.msk.f32.mxu0 %vm351_vm0, %v14420_v36 }
 0x175   : > { %11526 = vmatmul.mubr.msk.f32.gmra.mrb[32].mxu0 %vm351_vm0, %v14423_v35 }
 0x176   : > { %11528 = vmatprep.mubr.msk.f32.mxu0 %vm351_vm0, %v14430_v34 }
 0x179   : > { %11529 = vmatmul.mubr.msk.f32.gmra.mrb[34].mxu0 %vm351_vm0, %v14433_v33 }
 0x17a   : > { %11531 = vmatprep.mubr.msk.f32.mxu0 %vm351_vm0, %v14440_v32 }
 0x17d   : > { %11532 = vmatmul.mubr.msk.f32.gmra.mrb[36].mxu0 %vm351_vm0, %v14443_v31 }
 0x17e   : > { %11534 = vmatprep.mubr.msk.f32.mxu0 %vm351_vm0, %v14450_v30 }
 0x181   : > { %11535 = vmatmul.mubr.msk.f32.gmra.mrb[38].mxu0 %vm351_vm0, %v14453_v29 }
 0x182   : > { %11537 = vmatprep.mubr.msk.f32.mxu0 %vm351_vm0, %v14460_v28 }
 0x185   : > { %11538 = vmatmul.mubr.msk.f32.gmra.mrb[40].mxu0 %vm351_vm0, %v14463_v27 }
 0x186   : > { %11540 = vmatprep.mubr.msk.f32.mxu0 %vm351_vm0, %v14470_v26 }
 0x189   : > { %11541 = vmatmul.mubr.msk.f32.gmra.mrb[42].mxu0 %vm351_vm0, %v14473_v25 }
 0x18a   : > { %11543 = vmatprep.mubr.msk.f32.mxu0 %vm351_vm0, %v14480_v24 }
 0x18d   : > { %11544 = vmatmul.mubr.msk.f32.gmra.mrb[44].mxu0 %vm351_vm0, %v14817_v20 }
 0x18e   : > { %11546 = vmatprep.mubr.msk.f32.mxu0 %vm351_vm0, %v14820_v55 }
 0x191   : > { %11547 = vmatmul.mubr.msk.f32.gmra.mrb[46].mxu0 %vm351_vm0, %v14827_v56 }
 0x192   : > { %11551 = vmatprep.mubr.msk.f32.mxu0 %vm351_vm0, %v14021_v6  ;;  %v17214_v6 = vld [vmem:[#allocation3_spill] sm:$0xff] }
 0x195   : > { %11552 = vmatmul.mubr.msk.f32.vlgmr.msra.gmra.mrb[0].mxu0 %vm351_vm0, %v14024_v7  ;;  %v17215_v7 = vld [vmem:[#allocation4_spill] sm:$0xff] }
 0x196   : > { %11624 = vmatpush3.msra.mxu0 %v9904_v18  ;;  %11554 = vmatprep.mubr.msk.f32.mxu0 %vm351_vm0, %v14032_v8  ;;  %v17216_v8 = vld [vmem:[#allocation5_spill] sm:$0xff]  ;;  %v17226_v18 = vld [vmem:[#allocation15_spill] sm:$0xff] }
 0x197   : > { %11697 = vmatprep.subr.mxu0 %v9953_v57 }
 0x199   : > { %11555 = vmatmul.mubr.msk.f32.gmra.mrb[2].mxu0 %vm351_vm0, %v14035_v9  ;;  %v17217_v9 = vld [vmem:[#allocation6_spill] sm:$0xff] }
 0x19a   : > { %11557 = vmatprep.mubr.msk.f32.mxu0 %vm351_vm0, %v14042_v10  ;;  %v17218_v10 = vld [vmem:[#allocation7_spill] sm:$0xff] }
 0x19d   : > { %11558 = vmatmul.mubr.msk.f32.gmra.mrb[4].mxu0 %vm351_vm0, %v14045_v11  ;;  %v17219_v11 = vld [vmem:[#allocation8_spill] sm:$0xff] }
 0x19e   : > { %11560 = vmatprep.mubr.msk.f32.mxu0 %vm351_vm0, %v14052_v12  ;;  %v17220_v12 = vld [vmem:[#allocation9_spill] sm:$0xff] }
 0x1a1   : > { %11561 = vmatmul.mubr.msk.f32.gmra.mrb[6].mxu0 %vm351_vm0, %v14055_v13  ;;  %v17221_v13 = vld [vmem:[#allocation10_spill] sm:$0xff] }
 0x1a2   : > { %11563 = vmatprep.mubr.msk.f32.mxu0 %vm351_vm0, %v14062_v14  ;;  %v17222_v14 = vld [vmem:[#allocation11_spill] sm:$0xff] }
 0x1a5   : > { %11564 = vmatmul.mubr.msk.f32.gmra.mrb[8].mxu0 %vm351_vm0, %v14065_v15  ;;  %v17223_v15 = vld [vmem:[#allocation12_spill] sm:$0xff] }
 0x1a6   : > { %11566 = vmatprep.mubr.msk.f32.mxu0 %vm351_vm0, %v14072_v16  ;;  %v17224_v16 = vld [vmem:[#allocation13_spill] sm:$0xff] }
 0x1a9   : > { %11567 = vmatmul.mubr.msk.f32.gmra.mrb[10].mxu0 %vm351_vm0, %v14075_v17  ;;  %v17225_v17 = vld [vmem:[#allocation14_spill] sm:$0xff] }
 0x1aa   : > { %11569 = vmatprep.mubr.msk.f32.mxu0 %vm351_vm0, %v17214_v6  ;;  %v17227_v6 = vld [vmem:[#allocation16_spill] sm:$0xff] }
 0x1ad   : > { %11570 = vmatmul.mubr.msk.f32.gmra.mrb[12].mxu0 %vm351_vm0, %v17215_v7  ;;  %v17228_v7 = vld [vmem:[#allocation17_spill] sm:$0xff] }
 0x1ae   : > { %11572 = vmatprep.mubr.msk.f32.mxu0 %vm351_vm0, %v17216_v8  ;;  %v17229_v8 = vld [vmem:[#allocation18_spill] sm:$0xff] }
 0x1b1   : > { %11573 = vmatmul.mubr.msk.f32.gmra.mrb[14].mxu0 %vm351_vm0, %v17217_v9  ;;  %v17230_v9 = vld [vmem:[#allocation19_spill] sm:$0xff] }
 0x1b2   : > { %11575 = vmatprep.mubr.msk.f32.mxu0 %vm351_vm0, %v17218_v10  ;;  %v17231_v10 = vld [vmem:[#allocation20_spill] sm:$0xff] }
 0x1b5   : > { %11576 = vmatmul.mubr.msk.f32.gmra.mrb[16].mxu0 %vm351_vm0, %v17219_v11  ;;  %v17232_v11 = vld [vmem:[#allocation21_spill] sm:$0xff] }
 0x1b6   : > { %11578 = vmatprep.mubr.msk.f32.mxu0 %vm351_vm0, %v17220_v12  ;;  %v17233_v12 = vld [vmem:[#allocation22_spill] sm:$0xff] }
 0x1b9   : > { %11579 = vmatmul.mubr.msk.f32.gmra.mrb[18].mxu0 %vm351_vm0, %v17221_v13  ;;  %v17234_v13 = vld [vmem:[#allocation23_spill] sm:$0xff] }
 0x1ba   : > { %11581 = vmatprep.mubr.msk.f32.mxu0 %vm351_vm0, %v17222_v14  ;;  %v17235_v14 = vld [vmem:[#allocation24_spill] sm:$0xff] }
 0x1bd   : > { %11582 = vmatmul.mubr.msk.f32.gmra.mrb[20].mxu0 %vm351_vm0, %v17223_v15  ;;  %v17236_v15 = vld [vmem:[#allocation25_spill] sm:$0xff] }
 0x1be   : > { %11584 = vmatprep.mubr.msk.f32.mxu0 %vm351_vm0, %v17224_v16  ;;  %v17237_v16 = vld [vmem:[#allocation26_spill] sm:$0xff] }
 0x1c1   : > { %11585 = vmatmul.mubr.msk.f32.gmra.mrb[22].mxu0 %vm351_vm0, %v17225_v17  ;;  %v17238_v17 = vld [vmem:[#allocation27_spill] sm:$0xff] }
 0x1c2   : > { %11587 = vmatprep.mubr.msk.f32.mxu0 %vm351_vm0, %v17226_v18  ;;  %v17239_v18 = vld [vmem:[#allocation28_spill] sm:$0xff] }
 0x1c5   : > { %11588 = vmatmul.mubr.msk.f32.gmra.mrb[24].mxu0 %vm351_vm0, %v17227_v6  ;;  %v17240_v6 = vld [vmem:[#allocation29_spill] sm:$0xff] }
 0x1c6   : > { %11590 = vmatprep.mubr.msk.f32.mxu0 %vm351_vm0, %v17228_v7  ;;  %v17241_v7 = vld [vmem:[#allocation30_spill] sm:$0xff] }
 0x1c9   : > { %11591 = vmatmul.mubr.msk.f32.gmra.mrb[26].mxu0 %vm351_vm0, %v17229_v8  ;;  %v17242_v8 = vld [vmem:[#allocation31_spill] sm:$0xff] }
 0x1ca   : > { %11593 = vmatprep.mubr.msk.f32.mxu0 %vm351_vm0, %v17230_v9  ;;  %v17243_v9 = vld [vmem:[#allocation32_spill] sm:$0xff] }
 0x1cd   : > { %11594 = vmatmul.mubr.msk.f32.gmra.mrb[28].mxu0 %vm351_vm0, %v17231_v10  ;;  %v17244_v10 = vld [vmem:[#allocation33_spill] sm:$0xff] }
 0x1ce   : > { %11596 = vmatprep.mubr.msk.f32.mxu0 %vm351_vm0, %v17232_v11  ;;  %v17245_v11 = vld [vmem:[#allocation34_spill] sm:$0xff] }
 0x1d1   : > { %11597 = vmatmul.mubr.msk.f32.gmra.mrb[30].mxu0 %vm351_vm0, %v17233_v12  ;;  %v17246_v12 = vld [vmem:[#allocation35_spill] sm:$0xff] }
 0x1d2   : > { %11599 = vmatprep.mubr.msk.f32.mxu0 %vm351_vm0, %v17234_v13  ;;  %v14925_v13 = vld [vmem:[%s14007_s30 + $0x181] sm:$0xff] }
 0x1d5   : > { %11600 = vmatmul.mubr.msk.f32.gmra.mrb[32].mxu0 %vm351_vm0, %v17235_v14  ;;  %v14928_v14 = vld [vmem:[%s14007_s30 + $0x189] sm:$0xff] }
 0x1d6   : > { %11602 = vmatprep.mubr.msk.f32.mxu0 %vm351_vm0, %v17236_v15  ;;  %v14935_v15 = vld [vmem:[%s14007_s30 + $0x191] sm:$0xff] }
 0x1d9   : > { %11603 = vmatmul.mubr.msk.f32.gmra.mrb[34].mxu0 %vm351_vm0, %v17237_v16  ;;  %v17247_v16 = vld [vmem:[#allocation36_spill] sm:$0xff] }
 0x1da   : > { %11605 = vmatprep.mubr.msk.f32.mxu0 %vm351_vm0, %v17238_v17  ;;  %v10002_v17 = vld [vmem:[%s17026_s1 + $0x38] sm:$0xff] }
 0x1dd   : > { %11606 = vmatmul.mubr.msk.f32.gmra.mrb[36].mxu0 %vm351_vm0, %v17239_v18  ;;  %v17248_v18 = vld [vmem:[#allocation37_spill] sm:$0xff] }
 0x1de   : > { %11608 = vmatprep.mubr.msk.f32.mxu0 %vm351_vm0, %v17240_v6  ;;  %v17249_v6 = vld [vmem:[#allocation38_spill] sm:$0xff] }
 0x1e1   : > { %11609 = vmatmul.mubr.msk.f32.gmra.mrb[38].mxu0 %vm351_vm0, %v17241_v7  ;;  %v17250_v7 = vld [vmem:[#allocation39_spill] sm:$0xff] }
 0x1e2   : > { %11611 = vmatprep.mubr.msk.f32.mxu0 %vm351_vm0, %v17242_v8  ;;  %v17251_v8 = vld [vmem:[#allocation40_spill] sm:$0xff] }
 0x1e5   : > { %11612 = vmatmul.mubr.msk.f32.gmra.mrb[40].mxu0 %vm351_vm0, %v17243_v9  ;;  %v17252_v9 = vld [vmem:[#allocation41_spill] sm:$0xff] }
 0x1e6   : > { %11614 = vmatprep.mubr.msk.f32.mxu0 %vm351_vm0, %v17244_v10  ;;  %v17253_v10 = vld [vmem:[#allocation42_spill] sm:$0xff] }
 0x1e9   : > { %11615 = vmatmul.mubr.msk.f32.gmra.mrb[42].mxu0 %vm351_vm0, %v17245_v11  ;;  %v17254_v11 = vld [vmem:[#allocation43_spill] sm:$0xff] }
 0x1ea   : > { %11617 = vmatprep.mubr.msk.f32.mxu0 %vm351_vm0, %v17246_v12  ;;  %v17256_v12 = vld [vmem:[#allocation45_spill] sm:$0xff] }
 0x1ed   : > { %11618 = vmatmul.mubr.msk.f32.gmra.mrb[44].mxu0 %vm351_vm0, %v14925_v13 }
 0x1ee   : > { %11620 = vmatprep.mubr.msk.f32.mxu0 %vm351_vm0, %v14928_v14 }
 0x1f1   : > { %11621 = vmatmul.mubr.msk.f32.gmra.mrb[46].mxu0 %vm351_vm0, %v14935_v15 }
 0x1f2   : > { %11625 = vmatprep.mubr.msk.f32.mxu0 %vm351_vm0, %v17247_v16  ;;  %v17257_v16 = vld [vmem:[#allocation46_spill] sm:$0xff] }
 0x1f5   : > { %11626 = vmatmul.mubr.msk.f32.vlgmr.msra.gmra.mrb[0].mxu0 %vm351_vm0, %v17248_v18  ;;  %v17258_v18 = vld [vmem:[#allocation47_spill] sm:$0xff] }
 0x1f6   : > { %11698 = vmatpush3.msra.mxu0 %v9953_v57  ;;  %11628 = vmatprep.mubr.msk.f32.mxu0 %vm351_vm0, %v17249_v6  ;;  %v17255_v57 = vld [vmem:[#allocation44_spill] sm:$0xff] }
 0x1f7   : > { %11771 = vmatprep.subr.mxu0 %v10002_v17  ;;  %v17259_v6 = vld [vmem:[#allocation48_spill] sm:$0xff] }
 0x1f9   : > { %11629 = vmatmul.mubr.msk.f32.gmra.mrb[2].mxu0 %vm351_vm0, %v17250_v7  ;;  %v17260_v7 = vld [vmem:[#allocation49_spill] sm:$0xff] }
 0x1fa   : > { %11631 = vmatprep.mubr.msk.f32.mxu0 %vm351_vm0, %v17251_v8  ;;  %v17261_v8 = vld [vmem:[#allocation50_spill] sm:$0xff] }
 0x1fd   : > { %11632 = vmatmul.mubr.msk.f32.gmra.mrb[4].mxu0 %vm351_vm0, %v17252_v9  ;;  %v17262_v9 = vld [vmem:[#allocation51_spill] sm:$0xff] }
 0x1fe   : > { %11634 = vmatprep.mubr.msk.f32.mxu0 %vm351_vm0, %v17253_v10  ;;  %v17263_v10 = vld [vmem:[#allocation52_spill] sm:$0xff] }
 0x201   : > { %11635 = vmatmul.mubr.msk.f32.gmra.mrb[6].mxu0 %vm351_vm0, %v17254_v11  ;;  %v17264_v11 = vld [vmem:[#allocation53_spill] sm:$0xff] }
 0x202   : > { %11637 = vmatprep.mubr.msk.f32.mxu0 %vm351_vm0, %v17255_v57  ;;  %v17265_v57 = vld [vmem:[#allocation54_spill] sm:$0xff] }
 0x205   : > { %11638 = vmatmul.mubr.msk.f32.gmra.mrb[8].mxu0 %vm351_vm0, %v17256_v12  ;;  %v17266_v12 = vld [vmem:[#allocation55_spill] sm:$0xff] }
 0x206   : > { %11640 = vmatprep.mubr.msk.f32.mxu0 %vm351_vm0, %v17257_v16  ;;  %v17267_v16 = vld [vmem:[#allocation56_spill] sm:$0xff] }
 0x209   : > { %11641 = vmatmul.mubr.msk.f32.gmra.mrb[10].mxu0 %vm351_vm0, %v17258_v18  ;;  %v17268_v18 = vld [vmem:[#allocation57_spill] sm:$0xff] }
 0x20a   : > { %11643 = vmatprep.mubr.msk.f32.mxu0 %vm351_vm0, %v17259_v6  ;;  %v17269_v6 = vld [vmem:[#allocation58_spill] sm:$0xff] }
 0x20d   : > { %11644 = vmatmul.mubr.msk.f32.gmra.mrb[12].mxu0 %vm351_vm0, %v17260_v7  ;;  %v17270_v7 = vld [vmem:[#allocation59_spill] sm:$0xff] }
 0x20e   : > { %11646 = vmatprep.mubr.msk.f32.mxu0 %vm351_vm0, %v17261_v8  ;;  %v17271_v8 = vld [vmem:[#allocation60_spill] sm:$0xff] }
 0x211   : > { %11647 = vmatmul.mubr.msk.f32.gmra.mrb[14].mxu0 %vm351_vm0, %v17262_v9  ;;  %v17272_v9 = vld [vmem:[#allocation61_spill] sm:$0xff] }
 0x212   : > { %11649 = vmatprep.mubr.msk.f32.mxu0 %vm351_vm0, %v17263_v10  ;;  %v17273_v10 = vld [vmem:[#allocation62_spill] sm:$0xff] }
 0x215   : > { %11650 = vmatmul.mubr.msk.f32.gmra.mrb[16].mxu0 %vm351_vm0, %v17264_v11  ;;  %v17274_v11 = vld [vmem:[#allocation63_spill] sm:$0xff] }
 0x216   : > { %11652 = vmatprep.mubr.msk.f32.mxu0 %vm351_vm0, %v17265_v57  ;;  %v17275_v57 = vld [vmem:[#allocation64_spill] sm:$0xff] }
 0x219   : > { %11653 = vmatmul.mubr.msk.f32.gmra.mrb[18].mxu0 %vm351_vm0, %v17266_v12  ;;  %v17276_v12 = vld [vmem:[#allocation65_spill] sm:$0xff] }
 0x21a   : > { %11655 = vmatprep.mubr.msk.f32.mxu0 %vm351_vm0, %v17267_v16  ;;  %v17277_v16 = vld [vmem:[#allocation66_spill] sm:$0xff] }
 0x21d   : > { %11656 = vmatmul.mubr.msk.f32.gmra.mrb[20].mxu0 %vm351_vm0, %v17268_v18  ;;  %v17278_v18 = vld [vmem:[#allocation67_spill] sm:$0xff] }
 0x21e   : > { %11658 = vmatprep.mubr.msk.f32.mxu0 %vm351_vm0, %v17269_v6  ;;  %v17279_v6 = vld [vmem:[#allocation68_spill] sm:$0xff] }
 0x221   : > { %11659 = vmatmul.mubr.msk.f32.gmra.mrb[22].mxu0 %vm351_vm0, %v17270_v7  ;;  %v17280_v7 = vld [vmem:[#allocation69_spill] sm:$0xff] }
 0x222   : > { %11661 = vmatprep.mubr.msk.f32.mxu0 %vm351_vm0, %v17271_v8  ;;  %v17281_v8 = vld [vmem:[#allocation70_spill] sm:$0xff] }
 0x225   : > { %11662 = vmatmul.mubr.msk.f32.gmra.mrb[24].mxu0 %vm351_vm0, %v17272_v9  ;;  %v17282_v9 = vld [vmem:[#allocation71_spill] sm:$0xff] }
 0x226   : > { %11664 = vmatprep.mubr.msk.f32.mxu0 %vm351_vm0, %v17273_v10  ;;  %v17283_v10 = vld [vmem:[#allocation72_spill] sm:$0xff] }
 0x229   : > { %11665 = vmatmul.mubr.msk.f32.gmra.mrb[26].mxu0 %vm351_vm0, %v17274_v11  ;;  %v17284_v11 = vld [vmem:[#allocation73_spill] sm:$0xff] }
 0x22a   : > { %11667 = vmatprep.mubr.msk.f32.mxu0 %vm351_vm0, %v17275_v57  ;;  %v17285_v57 = vld [vmem:[#allocation74_spill] sm:$0xff] }
 0x22d   : > { %11668 = vmatmul.mubr.msk.f32.gmra.mrb[28].mxu0 %vm351_vm0, %v17276_v12  ;;  %v17286_v12 = vld [vmem:[#allocation75_spill] sm:$0xff] }
 0x22e   : > { %11670 = vmatprep.mubr.msk.f32.mxu0 %vm351_vm0, %v17277_v16  ;;  %v15033_v16 = vld [vmem:[%s14007_s30 + $0x182] sm:$0xff] }
 0x231   : > { %11671 = vmatmul.mubr.msk.f32.gmra.mrb[30].mxu0 %vm351_vm0, %v17278_v18  ;;  %v4001_v18 = vld [vmem:[%s14007_s30 + $0xb1] sm:$0xff] }
 0x232   : > { %11673 = vmatprep.mubr.msk.f32.mxu0 %vm351_vm0, %v17279_v6  ;;  %v5317_v6 = vld [vmem:[%s17030_s5 + $0xf8] sm:$0xff] }
 0x235   : > { %11674 = vmatmul.mubr.msk.f32.gmra.mrb[32].mxu0 %vm351_vm0, %v17280_v7  ;;  %v4002_v7 = vld [vmem:[%s14007_s30 + $0xb9] sm:$0xff] }
 0x236   : > { %11676 = vmatprep.mubr.msk.f32.mxu0 %vm351_vm0, %v17281_v8  ;;  %v5318_v8 = vld [vmem:[%s17030_s5 + $0x100] sm:$0xff] }
 0x239   : > { %11677 = vmatmul.mubr.msk.f32.gmra.mrb[34].mxu0 %vm351_vm0, %v17282_v9  ;;  %v4003_v9 = vld [vmem:[%s14007_s30 + $0xc1] sm:$0xff] }
 0x23a   : > { %11679 = vmatprep.mubr.msk.f32.mxu0 %vm351_vm0, %v17283_v10  ;;  %v5319_v10 = vld [vmem:[%s17030_s5 + $0x108] sm:$0xff] }
 0x23d   : > { %11680 = vmatmul.mubr.msk.f32.gmra.mrb[36].mxu0 %vm351_vm0, %v17284_v11  ;;  %v4004_v11 = vld [vmem:[%s14007_s30 + $0xc9] sm:$0xff] }
 0x23e   : > { %11682 = vmatprep.mubr.msk.f32.mxu0 %vm351_vm0, %v14688_v22  ;;  %v15036_v22 = vld [vmem:[%s14007_s30 + $0x18a] sm:$0xff] }
 0x241   : > { %11683 = vmatmul.mubr.msk.f32.gmra.mrb[38].mxu0 %vm351_vm0, %v17285_v57  ;;  %v5320_v57 = vld [vmem:[%s17030_s5 + $0x110] sm:$0xff] }
 0x242   : > { %11685 = vmatprep.mubr.msk.f32.mxu0 %vm351_vm0, %v14698_v21  ;;  %v15043_v21 = vld [vmem:[%s14007_s30 + $0x192] sm:$0xff] }
 0x245   : > { %11686 = vmatmul.mubr.msk.f32.gmra.mrb[40].mxu0 %vm351_vm0, %v17286_v12  ;;  %v4005_v12 = vld [vmem:[%s14007_s30 + $0xd1] sm:$0xff] }
 0x246   : > { %11688 = vmatprep.mubr.msk.f32.mxu0 %vm351_vm0, %v14708_v23  ;;  %v3998_v23 = vld [vmem:[%s14007_s30 + $0x99] sm:$0xff] }
 0x249   : > { %11689 = vmatmul.mubr.msk.f32.gmra.mrb[42].mxu0 %vm351_vm0, %v14711_v19  ;;  %v15052_v19 = vld [vmem:[%s17026_s1 + $0x40] sm:$0xff] }
 0x24a   : > { %11691 = vmatprep.mubr.msk.f32.mxu0 %vm351_vm0, %v14718_v54  ;;  %v5314_v54 = vld [vmem:[%s17030_s5 + $0xe0] sm:$0xff] }
 0x24d   : > { %11692 = vmatmul.mubr.msk.f32.gmra.mrb[44].mxu0 %vm351_vm0, %v15033_v16 }
 0x24e   : > { %11694 = vmatprep.mubr.msk.f32.mxu0 %vm351_vm0, %v15036_v22 }
 0x251   : > { %11695 = vmatmul.mubr.msk.f32.gmra.mrb[46].mxu0 %vm351_vm0, %v15043_v21 }
 0x252   : > { %11699 = vmatprep.mubr.msk.f32.mxu0 %vm351_vm0, %v14273_v58  ;;  %v5306_v58 = vld [vmem:[%s17030_s5 + $0xa0] sm:$0xff] }
 0x255   : > { %11700 = vmatmul.mubr.msk.f32.vlgmr.msra.gmra.mrb[0].mxu0 %vm351_vm0, %v14280_v59  ;;  %v3991_v59 = vld [vmem:[%s14007_s30 + $0x61] sm:$0xff] }
 0x256   : > { %11772 = vmatpush3.msra.mxu0 %v10002_v17  ;;  %11702 = vmatprep.mubr.msk.f32.mxu0 %vm351_vm0, %v14283_v60  ;;  %v5307_v60 = vld [vmem:[%s17030_s5 + $0xa8] sm:$0xff]  ;;  %v5316_v17 = vld [vmem:[%s17030_s5 + $0xf0] sm:$0xff] }
 0x257   : > { %11845 = vmatprep.subr.mxu0 %v15052_v19 }
 0x259   : > { %11703 = vmatmul.mubr.msk.f32.gmra.mrb[2].mxu0 %vm351_vm0, %v14290_v61  ;;  %v3992_v61 = vld [vmem:[%s14007_s30 + $0x69] sm:$0xff] }
 0x25a   : > { %11705 = vmatprep.mubr.msk.f32.mxu0 %vm351_vm0, %v14293_v62  ;;  %v5308_v62 = vld [vmem:[%s17030_s5 + $0xb0] sm:$0xff] }
 0x25d   : > { %11706 = vmatmul.mubr.msk.f32.gmra.mrb[4].mxu0 %vm351_vm0, %v14300_v63  ;;  %v3993_v63 = vld [vmem:[%s14007_s30 + $0x71] sm:$0xff] }
 0x25e   : > { %11708 = vmatprep.mubr.msk.f32.mxu0 %vm351_vm0, %v14303_v0  ;;  %v5309_v0 = vld [vmem:[%s17030_s5 + $0xb8] sm:$0xff] }
 0x261   : > { %11709 = vmatmul.mubr.msk.f32.gmra.mrb[6].mxu0 %vm351_vm0, %v14310_v1  ;;  %v3994_v1 = vld [vmem:[%s14007_s30 + $0x79] sm:$0xff] }
 0x262   : > { %11711 = vmatprep.mubr.msk.f32.mxu0 %vm351_vm0, %v14313_v2  ;;  %v5310_v2 = vld [vmem:[%s17030_s5 + $0xc0] sm:$0xff] }
 0x265   : > { %11712 = vmatmul.mubr.msk.f32.gmra.mrb[8].mxu0 %vm351_vm0, %v14320_v3  ;;  %v3995_v3 = vld [vmem:[%s14007_s30 + $0x81] sm:$0xff] }
 0x266   : > { %11714 = vmatprep.mubr.msk.f32.mxu0 %vm351_vm0, %v14323_v4  ;;  %v5311_v4 = vld [vmem:[%s17030_s5 + $0xc8] sm:$0xff] }
 0x269   : > { %11715 = vmatmul.mubr.msk.f32.gmra.mrb[10].mxu0 %vm351_vm0, %v14330_v5  ;;  %v3996_v5 = vld [vmem:[%s14007_s30 + $0x89] sm:$0xff] }
 0x26a   : > { %11717 = vmatprep.mubr.msk.f32.mxu0 %vm351_vm0, %v14333_v51  ;;  %v5312_v51 = vld [vmem:[%s17030_s5 + $0xd0] sm:$0xff] }
 0x26d   : > { %11718 = vmatmul.mubr.msk.f32.gmra.mrb[12].mxu0 %vm351_vm0, %v14340_v52  ;;  %v3997_v52 = vld [vmem:[%s14007_s30 + $0x91] sm:$0xff] }
 0x26e   : > { %11720 = vmatprep.mubr.msk.f32.mxu0 %vm351_vm0, %v14343_v53  ;;  %v5313_v53 = vld [vmem:[%s17030_s5 + $0xd8] sm:$0xff] }
 0x271   : > { %11721 = vmatmul.mubr.msk.f32.gmra.mrb[14].mxu0 %vm351_vm0, %v14350_v50  ;;  %v3990_v50 = vld [vmem:[%s14007_s30 + $0x59] sm:$0xff] }
 0x272   : > { %11723 = vmatprep.mubr.msk.f32.mxu0 %vm351_vm0, %v14353_v49  ;;  %v5305_v49 = vld [vmem:[%s17030_s5 + $0x98] sm:$0xff] }
 0x275   : > { %11724 = vmatmul.mubr.msk.f32.gmra.mrb[16].mxu0 %vm351_vm0, %v14360_v48  ;;  %v3989_v48 = vld [vmem:[%s14007_s30 + $0x51] sm:$0xff] }
 0x276   : > { %11726 = vmatprep.mubr.msk.f32.mxu0 %vm351_vm0, %v14363_v47  ;;  %v5304_v47 = vld [vmem:[%s17030_s5 + $0x90] sm:$0xff] }
 0x279   : > { %11727 = vmatmul.mubr.msk.f32.gmra.mrb[18].mxu0 %vm351_vm0, %v14370_v46  ;;  %v3988_v46 = vld [vmem:[%s14007_s30 + $0x49] sm:$0xff] }
 0x27a   : > { %11729 = vmatprep.mubr.msk.f32.mxu0 %vm351_vm0, %v14373_v45  ;;  %v5303_v45 = vld [vmem:[%s17030_s5 + $0x88] sm:$0xff] }
 0x27d   : > { %11730 = vmatmul.mubr.msk.f32.gmra.mrb[20].mxu0 %vm351_vm0, %v14380_v44  ;;  %v3987_v44 = vld [vmem:[%s14007_s30 + $0x41] sm:$0xff] }
 0x27e   : > { %11732 = vmatprep.mubr.msk.f32.mxu0 %vm351_vm0, %v14383_v43  ;;  %v5302_v43 = vld [vmem:[%s17030_s5 + $0x80] sm:$0xff] }
 0x281   : > { %11733 = vmatmul.mubr.msk.f32.gmra.mrb[22].mxu0 %vm351_vm0, %v14390_v42  ;;  %v3986_v42 = vld [vmem:[%s14007_s30 + $0x39] sm:$0xff] }
 0x282   : > { %11735 = vmatprep.mubr.msk.f32.mxu0 %vm351_vm0, %v14393_v41  ;;  %v5301_v41 = vld [vmem:[%s17030_s5 + $0x78] sm:$0xff] }
 0x285   : > { %11736 = vmatmul.mubr.msk.f32.gmra.mrb[24].mxu0 %vm351_vm0, %v14400_v40  ;;  %v3985_v40 = vld [vmem:[%s14007_s30 + $0x31] sm:$0xff] }
 0x286   : > { %11738 = vmatprep.mubr.msk.f32.mxu0 %vm351_vm0, %v14403_v39  ;;  %v5300_v39 = vld [vmem:[%s17030_s5 + $0x70] sm:$0xff] }
 0x289   : > { %11739 = vmatmul.mubr.msk.f32.gmra.mrb[26].mxu0 %vm351_vm0, %v14410_v38  ;;  %v13950_v38 = vmov 0  }
 0x28a   : > { %11741 = vmatprep.mubr.msk.f32.mxu0 %vm351_vm0, %v14413_v37  ;;  %13939 = vset.pattern.permute.xlu0 %v13950_v38  ;;  %v3485_v37 = vld [vmem:[%s14007_s30 + $0x1a8] sm:$0xff] }
 0x28b   : > { %13940 = vset.pattern.permute.xlu1 %v13950_v38  ;;  %v4006_v38 = vld [vmem:[%s14007_s30 + $0xd9] sm:$0xff] }
 0x28d   : > { %11742 = vmatmul.mubr.msk.f32.gmra.mrb[28].mxu0 %vm351_vm0, %v14420_v36  ;;  %v5299_v36 = vld [vmem:[%s17030_s5 + $0x68] sm:$0xff] }
 0x28e   : > { %11744 = vmatprep.mubr.msk.f32.mxu0 %vm351_vm0, %v14423_v35  ;;  %v5289_v35 = vld [vmem:[%s17030_s5 + $0x18] sm:$0xff] }
 0x28f   : > { %5351 = vperm.xlu0 %13939, %v5289_v35   ;;  %v5322_v35 = vld [vmem:[%s17030_s5 + $0x120] sm:$0xff] }
 0x291   : > { %11745 = vmatmul.mubr.msk.f32.gmra.mrb[30].mxu0 %vm351_vm0, %v14430_v34  ;;  %v3484_v34 = vld [vmem:[%s14007_s30 + $0x1a0] sm:$0xff] }
 0x292   : > { %11747 = vmatprep.mubr.msk.f32.mxu0 %vm351_vm0, %v14433_v33  ;;  %v5298_v33 = vld [vmem:[%s17030_s5 + $0x60] sm:$0xff] }
 0x295   : > { %11748 = vmatmul.mubr.msk.f32.gmra.mrb[32].mxu0 %vm351_vm0, %v14440_v32  ;;  %v5291_v32 = vld [vmem:[%s17030_s5 + $0x28] sm:$0xff] }
 0x296   : > { %11750 = vmatprep.mubr.msk.f32.mxu0 %vm351_vm0, %v14443_v31  ;;  %5361 = vperm.xlu1 %13940, %v5291_v32   ;;  %v3483_v31 = vld [vmem:[%s14007_s30 + $0x198] sm:$0xff]  ;;  %v4007_v32 = vld [vmem:[%s14007_s30 + $0xe1] sm:$0xff] }
 0x299   : > { %11751 = vmatmul.mubr.msk.f32.gmra.mrb[34].mxu0 %vm351_vm0, %v14450_v30  ;;  %v5290_v30 = vld [vmem:[%s17030_s5 + $0x20] sm:$0xff] }
 0x29a   : > { %11753 = vmatprep.mubr.msk.f32.mxu0 %vm351_vm0, %v14453_v29  ;;  %5356 = vperm.xlu0 %13939, %v5290_v30   ;;  %v5292_v29 = vld [vmem:[%s17030_s5 + $0x30] sm:$0xff]  ;;  %v5323_v30 = vld [vmem:[%s17030_s5 + $0x128] sm:$0xff] }
 0x29b   : > { %5366 = vperm.xlu1 %13940, %v5292_v29   ;;  %v4008_v29 = vld [vmem:[%s14007_s30 + $0xe9] sm:$0xff] }
 0x29d   : > { %11754 = vmatmul.mubr.msk.f32.gmra.mrb[36].mxu0 %vm351_vm0, %v14460_v28  ;;  %v5293_v28 = vld [vmem:[%s17030_s5 + $0x38] sm:$0xff] }
 0x29e   : > { %11756 = vmatprep.mubr.msk.f32.mxu0 %vm351_vm0, %v14463_v27  ;;  %5371 = vperm.xlu0 %13939, %v5293_v28   ;;  %v5294_v27 = vld [vmem:[%s17030_s5 + $0x40] sm:$0xff]  ;;  %v5324_v28 = vld [vmem:[%s17030_s5 + $0x130] sm:$0xff] }
 0x29f   : > { %5376 = vperm.xlu1 %13940, %v5294_v27   ;;  %v4009_v27 = vld [vmem:[%s14007_s30 + $0xf1] sm:$0xff] }
 0x2a1   : > { %11757 = vmatmul.mubr.msk.f32.gmra.mrb[38].mxu0 %vm351_vm0, %v14470_v26  ;;  %v5295_v26 = vld [vmem:[%s17030_s5 + $0x48] sm:$0xff] }
 0x2a2   : > { %11759 = vmatprep.mubr.msk.f32.mxu0 %vm351_vm0, %v14473_v25  ;;  %5381 = vperm.xlu0 %13939, %v5295_v26   ;;  %v5296_v25 = vld [vmem:[%s17030_s5 + $0x50] sm:$0xff]  ;;  %v5325_v26 = vld [vmem:[%s17030_s5 + $0x138] sm:$0xff] }
 0x2a3   : > { %5386 = vperm.xlu1 %13940, %v5296_v25   ;;  %v4010_v25 = vld [vmem:[%s14007_s30 + $0xf9] sm:$0xff] }
 0x2a5   : > { %11760 = vmatmul.mubr.msk.f32.gmra.mrb[40].mxu0 %vm351_vm0, %v14480_v24  ;;  %v5297_v24 = vld [vmem:[%s17030_s5 + $0x58] sm:$0xff] }
 0x2a6   : > { %11762 = vmatprep.mubr.msk.f32.mxu0 %vm351_vm0, %v14817_v20  ;;  %5391 = vperm.xlu0 %13939, %v5297_v24   ;;  %v3999_v20 = vld [vmem:[%s14007_s30 + $0xa1] sm:$0xff] }
 0x2a7   : > { %5396 = vperm.xlu1 %13940, %v5298_v33   ;;  %v5326_v24 = vld [vmem:[%s17030_s5 + $0x140] sm:$0xff]  ;;  %v5327_v33 = vld [vmem:[%s17030_s5 + $0x148] sm:$0xff] }
 0x2a9   : > { %11763 = vmatmul.mubr.msk.f32.gmra.mrb[42].mxu0 %vm351_vm0, %v14820_v55  ;;  %v5315_v55 = vld [vmem:[%s17030_s5 + $0xe8] sm:$0xff] }
 0x2aa   : > { %11765 = vmatprep.mubr.msk.f32.mxu0 %vm351_vm0, %v14827_v56  ;;  %5401 = vperm.xlu0 %13939, %v5299_v36   ;;  %v4000_v56 = vld [vmem:[%s14007_s30 + $0xa9] sm:$0xff] }
 0x2ab   : > { %5406 = vperm.xlu1 %13940, %v5300_v39   ;;  %v5328_v36 = vld [vmem:[%s17030_s5 + $0x150] sm:$0xff]  ;;  %v5329_v39 = vld [vmem:[%s17030_s5 + $0x158] sm:$0xff] }
 0x2ad   : > { %11766 = vmatmul.mubr.msk.f32.gmra.mrb[44].mxu0 %vm351_vm0, %v3483_v31  ;;  %v4011_v31 = vld [vmem:[%s14007_s30 + $0x101] sm:$0xff] }
 0x2ae   : > { %11768 = vmatprep.mubr.msk.f32.mxu0 %vm351_vm0, %v3484_v34  ;;  %5411 = vperm.xlu0 %13939, %v5301_v41   ;;  %v4012_v34 = vld [vmem:[%s14007_s30 + $0x109] sm:$0xff]  ;;  %v5330_v41 = vld [vmem:[%s17030_s5 + $0x160] sm:$0xff] }
 0x2af   : > { %5416 = vperm.xlu1 %13940, %v5302_v43   ;;  %v5286_v43 = vld [vmem:[%s17030_s5] sm:$0xff] }
 0x2b1   : > { %11769 = vmatmul.mubr.msk.f32.gmra.mrb[46].mxu0 %vm351_vm0, %v3485_v37  ;;  %v4013_v37 = vld [vmem:[%s14007_s30 + $0x111] sm:$0xff] }
 0x2b2   : > { %11773 = vmatprep.mubr.msk.f32.mxu0 %vm351_vm0, %v3985_v40  ;;  %5421 = vperm.xlu0 %13939, %v5303_v45   ;;  %v4014_v40 = vld [vmem:[%s14007_s30 + $0x119] sm:$0xff]  ;;  %v5287_v45 = vld [vmem:[%s17030_s5 + $0x8] sm:$0xff] }
 0x2b3   : > { %5426 = vperm.xlu1 %13940, %v5304_v47   ;;  %v5288_v47 = vld [vmem:[%s17030_s5 + $0x10] sm:$0xff] }
 0x2b5   : > { %11774 = vmatmul.mubr.msk.f32.vlgmr.msra.gmra.mrb[0].mxu0 %vm351_vm0, %v3986_v42  ;;  %v4015_v42 = vld [vmem:[%s14007_s30 + $0x121] sm:$0xff] }
 0x2b6   : > { %11846 = vmatpush3.msra.mxu0 %v15052_v19  ;;  %11776 = vmatprep.mubr.msk.f32.mxu0 %vm351_vm0, %v3987_v44  ;;  %v5321_v19 = vld [vmem:[%s17030_s5 + $0x118] sm:$0xff]  ;;  %v4016_v44 = vld [vmem:[%s14007_s30 + $0x129] sm:$0xff] }
 0x2b7   : > { %5431 = vperm.xlu0 %13939, %v5305_v49   ;;  %5436 = vperm.xlu1 %13940, %v5306_v58   ;;  %v4018_v49 = vld [vmem:[%s14007_s30 + $0x139] sm:$0xff]  ;;  %v10104_v58 = vld [vmem:[%s17028_s3 + $0x88] sm:$0xff] }
 0x2b9   : > { %11777 = vmatmul.mubr.msk.f32.gmra.mrb[2].mxu0 %vm351_vm0, %v3988_v46  ;;  %v4017_v46 = vld [vmem:[%s14007_s30 + $0x131] sm:$0xff] }
 0x2ba   : > { %11779 = vmatprep.mubr.msk.f32.mxu0 %vm351_vm0, %v3989_v48  ;;  %v5331_v48 = vld [vmem:[%s17030_s5 + $0x168] sm:$0xff] }
 0x2bb   : > { %5441 = vperm.xlu0 %13939, %v5307_v60   ;;  %5446 = vperm.xlu1 %13940, %v5308_v62   ;;  %v5332_v60 = vld [vmem:[%s17030_s5 + $0x170] sm:$0xff]  ;;  %v5333_v62 = vld [vmem:[%s17030_s5 + $0x178] sm:$0xff] }
 0x2bd   : > { %11780 = vmatmul.mubr.msk.f32.gmra.mrb[4].mxu0 %vm351_vm0, %v3990_v50  ;;  %v10103_v50 = vld [vmem:[%s17028_s3 + $0x80] sm:$0xff] }
 0x2be   : > { %11782 = vmatprep.mubr.msk.f32.mxu0 %vm351_vm0, %v3991_v59  ;;  %v4019_v59 = vld [vmem:[%s14007_s30 + $0x141] sm:$0xff] }
 0x2bf   : > { %5451 = vperm.xlu0 %13939, %v5309_v0   ;;  %5456 = vperm.xlu1 %13940, %v5310_v2   ;;  %v10106_v0 = vld [vmem:[%s17028_s3 + $0x98] sm:$0xff] }
 0x2c0   : > { %v4021_v2 = vld [vmem:[%s14007_s30 + $0x151] sm:$0xff] }
 0x2c1   : > { %11783 = vmatmul.mubr.msk.f32.gmra.mrb[6].mxu0 %vm351_vm0, %v3992_v61  ;;  %v12855_v61 = vpack.c.bf16 %v10104_v58, %v10103_v50  ;;  %v4568_v50 = vld [vmem:[%s14007_s30 + $0x152] sm:$0xff]  ;;  %v4569_v58 = vld [vmem:[%s14007_s30 + $0x15a] sm:$0xff] }
 0x2c2   : > { %11785 = vmatprep.mubr.msk.f32.mxu0 %vm351_vm0, %v3993_v63  ;;  %v10105_v63 = vld [vmem:[%s17028_s3 + $0x90] sm:$0xff] }
 0x2c3   : > { %5461 = vperm.xlu0 %13939, %v5311_v4   ;;  %5466 = vperm.xlu1 %13940, %v5312_v51   ;;  %v10107_v4 = vld [vmem:[%s17028_s3 + $0xa0] sm:$0xff] }
 0x2c4   : > { %12856 = vmatprep.subr.bf16.mxu0 %v12855_v61  ;;  %13143 = vmatprep.subr.bf16.mxu1 %v12855_v61  ;;  %v4022_v51 = vld [vmem:[%s14007_s30 + $0x159] sm:$0xff] }
 0x2c5   : > { %11786 = vmatmul.mubr.msk.f32.gmra.mrb[8].mxu0 %vm351_vm0, %v3994_v1  ;;  %v4020_v1 = vld [vmem:[%s14007_s30 + $0x149] sm:$0xff]  ;;  %13151 = vmatpush3.bf16.msra.mxu1 %v12855_v61 }
 0x2c6   : > { %11788 = vmatprep.mubr.msk.f32.mxu0 %vm351_vm0, %v3995_v3  ;;  %v12859_v3 = vpack.c.bf16 %v10106_v0, %v10105_v63  ;;  %v4572_v0 = vld [vmem:[%s14007_s30 + $0x172] sm:$0xff] }
 0x2c7   : > { %5471 = vperm.xlu0 %13939, %v5313_v53   ;;  %5476 = vperm.xlu1 %13940, %v5314_v54   ;;  %v10110_v54 = vld [vmem:[%s17028_s3 + $0xb8] sm:$0xff] }
 0x2c8   : > { %13144 = vmatprep.subr.bf16.mxu1 %v12859_v3 }
 0x2c9   : > { %11789 = vmatmul.mubr.msk.f32.gmra.mrb[10].mxu0 %vm351_vm0, %v3996_v5  ;;  %v10108_v5 = vld [vmem:[%s17028_s3 + $0xa8] sm:$0xff]  ;;  %13152 = vmatpush3.bf16.msra.mxu1 %v12859_v3 }
 0x2ca   : > { %11791 = vmatprep.mubr.msk.f32.mxu0 %vm351_vm0, %v3997_v52  ;;  %v4023_v52 = vld [vmem:[%s14007_s30 + $0x161] sm:$0xff]  ;;  %v12863_v53 = vpack.c.bf16 %v10108_v5, %v10107_v4 }
 0x2cb   : > { %5481 = vperm.xlu0 %13939, %v5315_v55   ;;  %5486 = vperm.xlu1 %13940, %v5316_v17   ;;  %v4025_v55 = vld [vmem:[%s14007_s30 + $0x171] sm:$0xff]  ;;  %v4026_v17 = vld [vmem:[%s14007_s30 + $0x179] sm:$0xff] }
 0x2cc   : > { %13145 = vmatprep.subr.bf16.mxu1 %v12863_v53  ;;  %v10115_v5 = vld [vmem:[%s17028_s3 + $0xe0] sm:$0xff] }
 0x2cd   : > { %11792 = vmatmul.mubr.msk.f32.gmra.mrb[12].mxu0 %vm351_vm0, %v3998_v23  ;;  %v10109_v23 = vld [vmem:[%s17028_s3 + $0xb0] sm:$0xff]  ;;  %13153 = vmatpush3.bf16.msra.mxu1 %v12863_v53 }
 0x2ce   : > { %11794 = vmatprep.mubr.msk.f32.mxu0 %vm351_vm0, %v3999_v20  ;;  %v4024_v20 = vld [vmem:[%s14007_s30 + $0x169] sm:$0xff] }
 0x2cf   : > { %5491 = vperm.xlu0 %13939, %v5317_v6   ;;  %5496 = vperm.xlu1 %13940, %v5318_v8   ;;  %v4031_v6 = vld [vmem:[%s14007_s30 + $0x1a1] sm:$0xff]  ;;  %v4532_v8 = vld [vmem:[%s14007_s30 + $0x32] sm:$0xff] }
 0x2d1   : > { %11795 = vmatmul.mubr.msk.f32.gmra.mrb[14].mxu0 %vm351_vm0, %v4000_v56  ;;  %v12867_v56 = vpack.c.bf16 %v10110_v54, %v10109_v23  ;;  %v10118_v23 = vld [vmem:[%s17028_s3 + $0xf8] sm:$0xff] }
 0x2d2   : > { %11797 = vmatprep.mubr.msk.f32.mxu0 %vm351_vm0, %v4001_v18  ;;  %v4030_v18 = vld [vmem:[%s14007_s30 + $0x199] sm:$0xff] }
 0x2d3   : > { %5501 = vperm.xlu0 %13939, %v5319_v10   ;;  %5506 = vperm.xlu1 %13940, %v5320_v57   ;;  %v4537_v10 = vld [vmem:[%s14007_s30 + $0x5a] sm:$0xff]  ;;  %v4539_v57 = vld [vmem:[%s14007_s30 + $0x6a] sm:$0xff] }
 0x2d4   : > { %13146 = vmatprep.subr.bf16.mxu1 %v12867_v56 }
 0x2d5   : > { %11798 = vmatmul.mubr.msk.f32.gmra.mrb[16].mxu0 %vm351_vm0, %v4002_v7  ;;  %13154 = vmatpush3.bf16.msra.mxu1 %v12867_v56  ;;  %v4032_v7 = vld [vmem:[%s14007_s30 + $0x1a9] sm:$0xff] }
 0x2d6   : > { %11800 = vmatprep.mubr.msk.f32.mxu0 %vm351_vm0, %v4003_v9  ;;  %v4536_v9 = vld [vmem:[%s14007_s30 + $0x52] sm:$0xff] }
 0x2d7   : > { %5511 = vperm.xlu0 %13939, %v5321_v19   ;;  %5516 = vperm.xlu1 %13940, %v5322_v35   ;;  %v4541_v19 = vld [vmem:[%s14007_s30 + $0x7a] sm:$0xff]  ;;  %v4543_v35 = vld [vmem:[%s14007_s30 + $0x8a] sm:$0xff] }
 0x2d9   : > { %11801 = vmatmul.mubr.msk.f32.gmra.mrb[18].mxu0 %vm351_vm0, %v4004_v11  ;;  %v4538_v11 = vld [vmem:[%s14007_s30 + $0x62] sm:$0xff] }
 0x2da   : > { %11803 = vmatprep.mubr.msk.f32.mxu0 %vm351_vm0, %v4005_v12  ;;  %v4540_v12 = vld [vmem:[%s14007_s30 + $0x72] sm:$0xff] }
 0x2db   : > { %5521 = vperm.xlu0 %13939, %v5323_v30   ;;  %5526 = vperm.xlu1 %13940, %v5324_v28   ;;  %v4545_v30 = vld [vmem:[%s14007_s30 + $0x9a] sm:$0xff]  ;;  %v4547_v28 = vld [vmem:[%s14007_s30 + $0xaa] sm:$0xff] }
 0x2dd   : > { %11804 = vmatmul.mubr.msk.f32.gmra.mrb[20].mxu0 %vm351_vm0, %v4006_v38  ;;  %v4542_v38 = vld [vmem:[%s14007_s30 + $0x82] sm:$0xff] }
 0x2de   : > { %11806 = vmatprep.mubr.msk.f32.mxu0 %vm351_vm0, %v4007_v32  ;;  %v4544_v32 = vld [vmem:[%s14007_s30 + $0x92] sm:$0xff] }
 0x2df   : > { %5531 = vperm.xlu0 %13939, %v5325_v26   ;;  %5536 = vperm.xlu1 %13940, %v5326_v24   ;;  %v4549_v26 = vld [vmem:[%s14007_s30 + $0xba] sm:$0xff]  ;;  %v4551_v24 = vld [vmem:[%s14007_s30 + $0xca] sm:$0xff] }
 0x2e1   : > { %11807 = vmatmul.mubr.msk.f32.gmra.mrb[22].mxu0 %vm351_vm0, %v4008_v29  ;;  %v4546_v29 = vld [vmem:[%s14007_s30 + $0xa2] sm:$0xff] }
 0x2e2   : > { %11809 = vmatprep.mubr.msk.f32.mxu0 %vm351_vm0, %v4009_v27  ;;  %v4548_v27 = vld [vmem:[%s14007_s30 + $0xb2] sm:$0xff] }
 0x2e3   : > { %5541 = vperm.xlu0 %13939, %v5327_v33   ;;  %5546 = vperm.xlu1 %13940, %v5328_v36   ;;  %v4553_v33 = vld [vmem:[%s14007_s30 + $0xda] sm:$0xff]  ;;  %v4555_v36 = vld [vmem:[%s14007_s30 + $0xea] sm:$0xff] }
 0x2e5   : > { %11810 = vmatmul.mubr.msk.f32.gmra.mrb[24].mxu0 %vm351_vm0, %v4010_v25  ;;  %v4550_v25 = vld [vmem:[%s14007_s30 + $0xc2] sm:$0xff] }
 0x2e6   : > { %11812 = vmatprep.mubr.msk.f32.mxu0 %vm351_vm0, %v4011_v31  ;;  %v4552_v31 = vld [vmem:[%s14007_s30 + $0xd2] sm:$0xff] }
 0x2e7   : > { %5551 = vperm.xlu0 %13939, %v5329_v39   ;;  %5556 = vperm.xlu1 %13940, %v5330_v41   ;;  %v4557_v39 = vld [vmem:[%s14007_s30 + $0xfa] sm:$0xff]  ;;  %v4559_v41 = vld [vmem:[%s14007_s30 + $0x10a] sm:$0xff] }
 0x2e9   : > { %11813 = vmatmul.mubr.msk.f32.gmra.mrb[26].mxu0 %vm351_vm0, %v4012_v34  ;;  %v4554_v34 = vld [vmem:[%s14007_s30 + $0xe2] sm:$0xff] }
 0x2ea   : > { %11815 = vmatprep.mubr.msk.f32.mxu0 %vm351_vm0, %v4013_v37  ;;  %v4556_v37 = vld [vmem:[%s14007_s30 + $0xf2] sm:$0xff] }
 0x2eb   : > { %5336 = vperm.xlu0 %13939, %v5286_v43   ;;  %5341 = vperm.xlu1 %13940, %v5287_v45   ;;  %v4561_v43 = vld [vmem:[%s14007_s30 + $0x11a] sm:$0xff]  ;;  %v4563_v45 = vld [vmem:[%s14007_s30 + $0x12a] sm:$0xff] }
 0x2ed   : > { %11816 = vmatmul.mubr.msk.f32.gmra.mrb[28].mxu0 %vm351_vm0, %v4014_v40  ;;  %v4558_v40 = vld [vmem:[%s14007_s30 + $0x102] sm:$0xff] }
 0x2ee   : > { %11818 = vmatprep.mubr.msk.f32.mxu0 %vm351_vm0, %v4015_v42  ;;  %v4560_v42 = vld [vmem:[%s14007_s30 + $0x112] sm:$0xff] }
 0x2ef   : > { %5346 = vperm.xlu0 %13939, %v5288_v47   ;;  %5561 = vperm.xlu1 %13940, %v5331_v48   ;;  %v4565_v47 = vld [vmem:[%s14007_s30 + $0x13a] sm:$0xff]  ;;  %v4566_v48 = vld [vmem:[%s14007_s30 + $0x142] sm:$0xff] }
 0x2f1   : > { %11819 = vmatmul.mubr.msk.f32.gmra.mrb[30].mxu0 %vm351_vm0, %v4016_v44  ;;  %v4562_v44 = vld [vmem:[%s14007_s30 + $0x122] sm:$0xff] }
 0x2f2   : > { %11821 = vmatprep.mubr.msk.f32.mxu0 %vm351_vm0, %v4017_v46  ;;  %v4564_v46 = vld [vmem:[%s14007_s30 + $0x132] sm:$0xff] }
 0x2f3   : > { %5566 = vperm.xlu0 %13939, %v5332_v60   ;;  %5571 = vperm.xlu1 %13940, %v5333_v62   ;;  %v10111_v60 = vld [vmem:[%s17028_s3 + $0xc0] sm:$0xff]  ;;  %v4571_v62 = vld [vmem:[%s14007_s30 + $0x16a] sm:$0xff] }
 0x2f5   : > { %11822 = vmatmul.mubr.msk.f32.gmra.mrb[32].mxu0 %vm351_vm0, %v4018_v49  ;;  %v4567_v49 = vld [vmem:[%s14007_s30 + $0x14a] sm:$0xff] }
 0x2f6   : > { %11824 = vmatprep.mubr.msk.f32.mxu0 %vm351_vm0, %v4019_v59  ;;  %v4570_v59 = vld [vmem:[%s14007_s30 + $0x162] sm:$0xff] }
 0x2f9   : > { %11825 = vmatmul.mubr.msk.f32.gmra.mrb[34].mxu0 %vm351_vm0, %v4020_v1  ;;  %v10113_v1 = vld [vmem:[%s17028_s3 + $0xd0] sm:$0xff] }
 0x2fa   : > { %11827 = vmatprep.mubr.msk.f32.mxu0 %vm351_vm0, %v4021_v2  ;;  %v10114_v2 = vld [vmem:[%s17028_s3 + $0xd8] sm:$0xff] }
 0x2fb   : > { %v12875_v4 = vpack.c.bf16 %v10114_v2, %v10113_v1 }
 0x2fd   : > { %11828 = vmatmul.mubr.msk.f32.gmra.mrb[36].mxu0 %vm351_vm0, %v4022_v51  ;;  %v10116_v51 = vld [vmem:[%s17028_s3 + $0xe8] sm:$0xff] }
 0x2fe   : > { %11830 = vmatprep.mubr.msk.f32.mxu0 %vm351_vm0, %v4023_v52  ;;  %v12879_v52 = vpack.c.bf16 %v10116_v51, %v10115_v5  ;;  %v15642_v5 = vld [vmem:[%s17027_s2 + $0x2] ss:$0 sm:$0xff] }
 0x301   : > { %11831 = vmatmul.mubr.msk.f32.gmra.mrb[38].mxu0 %vm351_vm0, %v4024_v20  ;;  %v4578_v20 = vld [vmem:[%s14007_s30 + $0x1a2] sm:$0xff] }
 0x302   : > { %11833 = vmatprep.mubr.msk.f32.mxu0 %vm351_vm0, %v4025_v55  ;;  %v13951_v55 = vmov 0.0  }
 0x303   : > { %5623 = vst [vmem:[#allocation2 + $0x8] sm:$0xff] %v13951_v55  ;;  %5622 = vst [vmem:[#allocation2] sm:$0xff] %v13951_v55 }
 0x304   : > { %5624 = vst [vmem:[#allocation2 + $0x10] sm:$0xff] %v13951_v55  ;;  %5625 = vst [vmem:[#allocation2 + $0x18] sm:$0xff] %v13951_v55 }
 0x305   : > { %11834 = vmatmul.mubr.msk.f32.gmra.mrb[40].mxu0 %vm351_vm0, %v4026_v17  ;;  %5626 = vst [vmem:[#allocation2 + $0x1a0] sm:$0xff] %v13951_v55  ;;  %5627 = vst [vmem:[#allocation2 + $0x1a8] sm:$0xff] %v13951_v55 }
 0x306   : > { %11836 = vmatprep.mubr.msk.f32.mxu0 %vm351_vm0, %v14925_v13  ;;  %v4533_v13 = vld [vmem:[%s14007_s30 + $0x3a] sm:$0xff]  ;;  %5628 = vst [vmem:[#allocation2 + $0x1b0] sm:$0xff] %v13951_v55  ;;  %5629 = vst [vmem:[#allocation2 + $0x1b8] sm:$0xff] %v13951_v55 }
 0x309   : > { %11837 = vmatmul.mubr.msk.f32.gmra.mrb[42].mxu0 %vm351_vm0, %v14928_v14  ;;  %v4534_v14 = vld [vmem:[%s14007_s30 + $0x42] sm:$0xff] }
 0x30a   : > { %11839 = vmatprep.mubr.msk.f32.mxu0 %vm351_vm0, %v14935_v15  ;;  %v4535_v15 = vld [vmem:[%s14007_s30 + $0x4a] sm:$0xff] }
 0x30d   : > { %11840 = vmatmul.mubr.msk.f32.gmra.mrb[44].mxu0 %vm351_vm0, %v4030_v18 }
 0x30e   : > { %11842 = vmatprep.mubr.msk.f32.mxu0 %vm351_vm0, %v4031_v6 }
 0x311   : > { %11843 = vmatmul.mubr.msk.f32.gmra.mrb[46].mxu0 %vm351_vm0, %v4032_v7 }
 0x312   : > { %11847 = vmatprep.mubr.msk.f32.mxu0 %vm351_vm0, %v4532_v8 }
 0x315   : > { %11848 = vmatmul.mubr.msk.f32.vlgmr.msra.gmra.mrb[0].mxu0 %vm351_vm0, %v4533_v13 }
 0x316   : > { %11850 = vmatprep.mubr.msk.f32.mxu0 %vm351_vm0, %v4534_v14  ;;  %12858 = vmatpush3.bf16.msra.mxu0 %v12855_v61  ;;  %v10112_v61 = vld [vmem:[%s17028_s3 + $0xc8] sm:$0xff] }
 0x317   : > { %12860 = vmatprep.subr.bf16.mxu0 %v12859_v3  ;;  %v12871_v63 = vpack.c.bf16 %v10112_v61, %v10111_v60 }
 0x319   : > { %11851 = vmatmul.mubr.msk.f32.gmra.mrb[2].mxu0 %vm351_vm0, %v4535_v15  ;;  %13147 = vmatprep.subr.bf16.mxu1 %v12871_v63 }
 0x31a   : > { %11853 = vmatprep.mubr.msk.f32.mxu0 %vm351_vm0, %v4536_v9  ;;  %12862 = vmatpush3.bf16.msra.mxu0 %v12859_v3  ;;  %v4573_v3 = vld [vmem:[%s14007_s30 + $0x17a] sm:$0xff] }
 0x31b   : > { %12864 = vmatprep.subr.bf16.mxu0 %v12863_v53  ;;  %13155 = vmatpush3.bf16.msra.mxu1 %v12871_v63  ;;  %v5726_v9 = vld [vmem:[%s17028_s3] sm:$0xff] }
 0x31c   : > { %13148 = vmatprep.subr.bf16.mxu1 %v12875_v4 }
 0x31d   : > { %11854 = vmatmul.mubr.msk.f32.gmra.mrb[4].mxu0 %vm351_vm0, %v4537_v10  ;;  %v5727_v10 = vld [vmem:[%s17028_s3 + $0x8] sm:$0xff] }
 0x31e   : > { %11856 = vmatprep.mubr.msk.f32.mxu0 %vm351_vm0, %v4538_v11  ;;  %12866 = vmatpush3.bf16.msra.mxu0 %v12863_v53  ;;  %v10117_v53 = vld [vmem:[%s17028_s3 + $0xf0] sm:$0xff]  ;;  %v15560_v11 = vpack.c.bf16 %v5727_v10, %v5726_v9 }
 0x31f   : > { %12868 = vmatprep.subr.bf16.mxu0 %v12867_v56  ;;  %13156 = vmatpush3.bf16.msra.mxu1 %v12875_v4  ;;  %v12883_v54 = vpack.c.bf16 %v10118_v23, %v10117_v53 }
 0x320   : > { %13149 = vmatprep.subr.bf16.mxu1 %v12879_v52 }
 0x321   : > { %11857 = vmatmul.mubr.msk.f32.gmra.mrb[6].mxu0 %vm351_vm0, %v4539_v57 }
 0x322   : > { %11859 = vmatprep.mubr.msk.f32.mxu0 %vm351_vm0, %v4540_v12  ;;  %12870 = vmatpush3.bf16.msra.mxu0 %v12867_v56  ;;  %v15536_v56 = vpop.permute.xlu0 %5351 }
 0x323   : > { %12872 = vmatprep.subr.bf16.mxu0 %v12871_v63  ;;  %13157 = vmatpush3.bf16.msra.mxu1 %v12879_v52 }
 0x324   : > { %13150 = vmatprep.subr.bf16.mxu1 %v12883_v54 }
 0x325   : > { %11860 = vmatmul.mubr.msk.f32.gmra.mrb[8].mxu0 %vm351_vm0, %v4541_v19 }
 0x326   : > { %11862 = vmatprep.mubr.msk.f32.mxu0 %vm351_vm0, %v4542_v38  ;;  %12874 = vmatpush3.bf16.msra.mxu0 %v12871_v63  ;;  %v15540_v18 = vpop.permute.xlu0 %5356 }
 0x327   : > { %12876 = vmatprep.subr.bf16.mxu0 %v12875_v4  ;;  %13158 = vmatpush3.bf16.msra.mxu1 %v12883_v54 }
 0x328   : > { %12888 = vmatprep.subr.bf16.mxu1 %v15560_v11 }
 0x329   : > { %11863 = vmatmul.mubr.msk.f32.gmra.mrb[10].mxu0 %vm351_vm0, %v4543_v35 }
 0x32a   : > { %11865 = vmatprep.mubr.msk.f32.mxu0 %vm351_vm0, %v4544_v32  ;;  %12878 = vmatpush3.bf16.msra.mxu0 %v12875_v4  ;;  %v15544_v7 = vpop.permute.xlu0 %5371 }
 0x32b   : > { %12880 = vmatprep.subr.bf16.mxu0 %v12879_v52 }
 0x32d   : > { %11866 = vmatmul.mubr.msk.f32.gmra.mrb[12].mxu0 %vm351_vm0, %v4545_v30 }
 0x32e   : > { %11868 = vmatprep.mubr.msk.f32.mxu0 %vm351_vm0, %v4546_v29  ;;  %12882 = vmatpush3.bf16.msra.mxu0 %v12879_v52  ;;  %v15548_v13 = vpop.permute.xlu0 %5381 }
 0x32f   : > { %12884 = vmatprep.subr.bf16.mxu0 %v12883_v54 }
 0x331   : > { %11869 = vmatmul.mubr.msk.f32.gmra.mrb[14].mxu0 %vm351_vm0, %v4547_v28 }
 0x332   : > { %11871 = vmatprep.mubr.msk.f32.mxu0 %vm351_vm0, %v4548_v27  ;;  %12886 = vmatpush3.bf16.msra.mxu0 %v12883_v54  ;;  %v15552_v15 = vpop.permute.xlu0 %5391 }
 0x335   : > { %11872 = vmatmul.mubr.msk.f32.gmra.mrb[16].mxu0 %vm351_vm0, %v4549_v26 }
 0x336   : > { %11874 = vmatprep.mubr.msk.f32.mxu0 %vm351_vm0, %v4550_v25  ;;  %v15564_v12 = vpop.permute.xlu0 %5401 }
 0x339   : > { %11875 = vmatmul.mubr.msk.f32.gmra.mrb[18].mxu0 %vm351_vm0, %v4551_v24 }
 0x33a   : > { %11877 = vmatprep.mubr.msk.f32.mxu0 %vm351_vm0, %v4552_v31  ;;  %v15569_v38 = vpop.permute.xlu0 %5411 }
 0x33d   : > { %11878 = vmatmul.mubr.msk.f32.gmra.mrb[20].mxu0 %vm351_vm0, %v4553_v33 }
 0x33e   : > { %11880 = vmatprep.mubr.msk.f32.mxu0 %vm351_vm0, %v4554_v34  ;;  %v15573_v32 = vpop.permute.xlu0 %5421 }
 0x341   : > { %11881 = vmatmul.mubr.msk.f32.gmra.mrb[22].mxu0 %vm351_vm0, %v4555_v36 }
 0x342   : > { %11883 = vmatprep.mubr.msk.f32.mxu0 %vm351_vm0, %v4556_v37  ;;  %v15577_v29 = vpop.permute.xlu0 %5431 }
 0x345   : > { %11884 = vmatmul.mubr.msk.f32.gmra.mrb[24].mxu0 %vm351_vm0, %v4557_v39 }
 0x346   : > { %11886 = vmatprep.mubr.msk.f32.mxu0 %vm351_vm0, %v4558_v40  ;;  %v15581_v27 = vpop.permute.xlu0 %5441 }
 0x349   : > { %11887 = vmatmul.mubr.msk.f32.gmra.mrb[26].mxu0 %vm351_vm0, %v4559_v41 }
 0x34a   : > { %11889 = vmatprep.mubr.msk.f32.mxu0 %vm351_vm0, %v4560_v42  ;;  %v15585_v25 = vpop.permute.xlu0 %5451 }
 0x34d   : > { %11890 = vmatmul.mubr.msk.f32.gmra.mrb[28].mxu0 %vm351_vm0, %v4561_v43 }
 0x34e   : > { %11892 = vmatprep.mubr.msk.f32.mxu0 %vm351_vm0, %v4562_v44  ;;  %v15589_v31 = vpop.permute.xlu0 %5461 }
 0x351   : > { %11893 = vmatmul.mubr.msk.f32.gmra.mrb[30].mxu0 %vm351_vm0, %v4563_v45 }
 0x352   : > { %11895 = vmatprep.mubr.msk.f32.mxu0 %vm351_vm0, %v4564_v46  ;;  %v15593_v34 = vpop.permute.xlu0 %5471 }
 0x355   : > { %11896 = vmatmul.mubr.msk.f32.gmra.mrb[32].mxu0 %vm351_vm0, %v4565_v47 }
 0x356   : > { %11898 = vmatprep.mubr.msk.f32.mxu0 %vm351_vm0, %v4566_v48  ;;  %v15597_v37 = vpop.permute.xlu0 %5481 }
 0x359   : > { %11899 = vmatmul.mubr.msk.f32.gmra.mrb[34].mxu0 %vm351_vm0, %v4567_v49 }
 0x35a   : > { %11901 = vmatprep.mubr.msk.f32.mxu0 %vm351_vm0, %v4568_v50  ;;  %v15601_v40 = vpop.permute.xlu0 %5491 }
 0x35d   : > { %11902 = vmatmul.mubr.msk.f32.gmra.mrb[36].mxu0 %vm351_vm0, %v4569_v58  ;;  %v15626_v58 = vld [vmem:[%s17027_s2] ss:$0 sm:$0xff] }
 0x35e   : > { %11904 = vmatprep.mubr.msk.f32.mxu0 %vm351_vm0, %v4570_v59  ;;  %v15605_v42 = vpop.permute.xlu0 %5501 }
 0x361   : > { %11905 = vmatmul.mubr.msk.f32.gmra.mrb[38].mxu0 %vm351_vm0, %v4571_v62 }
 0x362   : > { %11907 = vmatprep.mubr.msk.f32.mxu0 %vm351_vm0, %v4572_v0  ;;  %v15609_v44 = vpop.permute.xlu0 %5511  ;;  %v15636_v0 = vld [vmem:[%s17027_s2 + $0x1] ss:$0 sm:$0xff] }
 0x365   : > { %11908 = vmatmul.mubr.msk.f32.gmra.mrb[40].mxu0 %vm351_vm0, %v4573_v3 }
 0x366   : > { %11910 = vmatprep.mubr.msk.f32.mxu0 %vm351_vm0, %v15033_v16  ;;  %v4577_v16 = vld [vmem:[%s14007_s30 + $0x19a] sm:$0xff]  ;;  %v15613_v46 = vpop.permute.xlu0 %5521 }
 0x369   : > { %11911 = vmatmul.mubr.msk.f32.gmra.mrb[42].mxu0 %vm351_vm0, %v15036_v22  ;;  %v4579_v22 = vld [vmem:[%s14007_s30 + $0x1aa] sm:$0xff]  ;;  %s13928_s30 = smul.u32 384, %s17374_s22 }
 0x36a   : > { %11913 = vmatprep.mubr.msk.f32.mxu0 %vm351_vm0, %v15043_v21  ;;  %v15533_v21 = vpop.permute.xlu1 %5361  ;;  %v15617_v48 = vpop.permute.xlu0 %5531 }
 0x36b   : > { %s16830_s7 = scalar_lea.vmem %s17031_s6, %s13928_s30 }
 0x36d   : > { %11914 = vmatmul.mubr.msk.f32.gmra.mrb[44].mxu0 %vm351_vm0, %v4577_v16 }
 0x36e   : > { %11916 = vmatprep.mubr.msk.f32.mxu0 %vm351_vm0, %v4578_v20  ;;  %v15538_v17 = vpop.permute.xlu1 %5366  ;;  %v15621_v50 = vpop.permute.xlu0 %5541 }
 0x371   : > { %11917 = vmatmul.mubr.msk.f32.gmra.mrb[46].mxu0 %vm351_vm0, %v4579_v22 }
 0x372   : > { %11951 = vmatprep.mubr.f32.mxu0 %v13951_v55  ;;  %v15542_v6 = vpop.permute.xlu1 %5376  ;;  %v15631_v62 = vpop.permute.xlu0 %5551 }
 0x375   : > { %11952 = vmatmul.mubr.f32.vlgmr.msra.gmra.mrb[48].mxu0 %v13951_v55 }
 0x376   : > { %11954 = vmatprep.mubr.f32.mxu0 %v13951_v55  ;;  %v15546_v8 = vpop.permute.xlu1 %5386  ;;  %v5337_v22 = vpop.permute.xlu0 %5336 }
 0x37a   : > { %v15550_v14 = vpop.permute.xlu1 %5396 }
 0x37e   : > { %v15562_v57 = vpop.permute.xlu1 %5406 }
 0x382   : > { %v15567_v19 = vpop.permute.xlu1 %5416 }
 0x386   : > { %v15571_v35 = vpop.permute.xlu1 %5426 }
 0x38a   : > { %v15575_v30 = vpop.permute.xlu1 %5436 }
 0x38e   : > { %v15579_v28 = vpop.permute.xlu1 %5446 }
 0x392   : > { %v15583_v26 = vpop.permute.xlu1 %5456 }
 0x396   : > { %v15587_v24 = vpop.permute.xlu1 %5466 }
 0x39a   : > { %v15591_v33 = vpop.permute.xlu1 %5476 }
 0x39e   : > { %v15595_v36 = vpop.permute.xlu1 %5486 }
 0x3a2   : > { %v15599_v39 = vpop.permute.xlu1 %5496 }
 0x3a6   : > { %v15603_v41 = vpop.permute.xlu1 %5506 }
 0x3aa   : > { %v15607_v43 = vpop.permute.xlu1 %5516 }
 0x3ae   : > { %v15611_v45 = vpop.permute.xlu1 %5526 }
 0x3b2   : > { %v15615_v47 = vpop.permute.xlu1 %5536 }
 0x3b6   : > { %v15619_v49 = vpop.permute.xlu1 %5546 }
 0x3ba   : > { %v15628_v60 = vpop.permute.xlu1 %5556 }
 0x3bb   : > { %17287 = vst [vmem:[#allocation3_spill] sm:$0xff] %v15628_v60 }
 0x3be   : > { %v5342_v54 = vpop.permute.xlu1 %5341 }
 0x3e8   : > { %v11849_v59 = vpop.f32.mrb[0].mxu0 }
 0x3e9   : > { %v5085_v61 = vadd.f32 %v11849_v59, %v15626_v58  ;;  %v4792_v63 = vpop.f32.mrb[1].mxu0 }
 0x3ea   : > { %v5084_v1 = vadd.f32 %v15626_v58, %v4792_v63 }
 0x3eb   : > { %v5133_v2 = vmax.f32 %v5085_v61, 0.0 }
 0x3ec   : > { %v5132_v3 = vmax.f32 %v5084_v1, 0.0  ;;  %v11852_v4 = vpop.f32.mrb[2].mxu0 }
 0x3ed   : > { %v5186_v51 = vmul.f32 %v15636_v0, %v5133_v2  ;;  %v5087_v52 = vadd.f32 %v11852_v4, %v15626_v58  ;;  %v4802_v53 = vpop.f32.mrb[3].mxu0 }
 0x3ee   : > { %v5185_v23 = vmul.f32 %v15636_v0, %v5132_v3  ;;  %v5086_v16 = vadd.f32 %v15626_v58, %v4802_v53 }
 0x3ef   : > { %v5135_v20 = vmax.f32 %v5087_v52, 0.0  ;;  %v5239_v55 = vadd.f32 %v15642_v5, %v5186_v51 }
 0x3f0   : > { %v5238_v9 = vadd.f32 %v15642_v5, %v5185_v23  ;;  %v5134_v10 = vmax.f32 %v5086_v16, 0.0  ;;  %v11855_v59 = vpop.f32.mrb[4].mxu0 }
 0x3f1   : > { %v5188_v61 = vmul.f32 %v15636_v0, %v5135_v20  ;;  %v5575_v63 = vmul.f32 %v5342_v54, %v5239_v55  ;;  %v5089_v1 = vadd.f32 %v11855_v59, %v15626_v58  ;;  %v4812_v2 = vpop.f32.mrb[5].mxu0  ;;  %v5347_v55 = vpop.permute.xlu0 %5346 }
 0x3f2   : > { %v5574_v4 = vmul.f32 %v5337_v22, %v5238_v9  ;;  %v5187_v3 = vmul.f32 %v15636_v0, %v5134_v10  ;;  %v5088_v53 = vadd.f32 %v15626_v58, %v4812_v2 }
 0x3f3   : > { %v5241_v52 = vadd.f32 %v15642_v5, %v5188_v61  ;;  %5631 = vst [vmem:[#allocation2 + $0x28] sm:$0xff] %v5575_v63  ;;  %v5137_v60 = vmax.f32 %v5089_v1, 0.0 }
 0x3f4   : > { %5630 = vst [vmem:[#allocation2 + $0x20] sm:$0xff] %v5574_v4  ;;  %v5240_v51 = vadd.f32 %v15642_v5, %v5187_v3  ;;  %v5136_v23 = vmax.f32 %v5088_v53, 0.0  ;;  %v11858_v16 = vpop.f32.mrb[6].mxu0  ;;  %11955 = vmatmul.mubr.f32.gmra.mrb[50].mxu0 %v5574_v4 }
 0x3f5   : > { %v5577_v54 = vmul.f32 %v15536_v56, %v5241_v52  ;;  %v5190_v20 = vmul.f32 %v15636_v0, %v5137_v60  ;;  %v5091_v22 = vadd.f32 %v11858_v16, %v15626_v58  ;;  %v4822_v9 = vpop.f32.mrb[7].mxu0  ;;  %11957 = vmatprep.mubr.f32.mxu0 %v5575_v63  ;;  %v5728_v56 = vld [vmem:[%s17028_s3 + $0x10] sm:$0xff]  ;;  %v5729_v60 = vld [vmem:[%s17028_s3 + $0x18] sm:$0xff] }
 0x3f6   : > { %v5576_v10 = vmul.f32 %v5347_v55, %v5240_v51  ;;  %v5189_v59 = vmul.f32 %v15636_v0, %v5136_v23  ;;  %v5090_v61 = vadd.f32 %v15626_v58, %v4822_v9  ;;  %v12891_v55 = vpack.c.bf16 %v5729_v60, %v5728_v56 }
 0x3f7   : > { %5633 = vst [vmem:[#allocation2 + $0x38] sm:$0xff] %v5577_v54  ;;  %v5243_v1 = vadd.f32 %v15642_v5, %v5190_v20  ;;  %v5139_v2 = vmax.f32 %v5091_v22, 0.0  ;;  %11960 = vmatprep.mubr.f32.mxu1 %v5577_v54 }
 0x3f8   : > { %5632 = vst [vmem:[#allocation2 + $0x30] sm:$0xff] %v5576_v10  ;;  %v5242_v63 = vadd.f32 %v15642_v5, %v5189_v59  ;;  %v5138_v4 = vmax.f32 %v5090_v61, 0.0  ;;  %v11861_v3 = vpop.f32.mrb[8].mxu0  ;;  %11958 = vmatmul.mubr.f32.gmra.mrb[52].mxu0 %v5576_v10  ;;  %v5731_v10 = vld [vmem:[%s17028_s3 + $0x28] sm:$0xff] }
 0x3f9   : > { %v5579_v53 = vmul.f32 %v15533_v21, %v5243_v1  ;;  %v5192_v52 = vmul.f32 %v15636_v0, %v5139_v2  ;;  %v5093_v51 = vadd.f32 %v11861_v3, %v15626_v58  ;;  %v4832_v23 = vpop.f32.mrb[9].mxu0  ;;  %v5730_v21 = vld [vmem:[%s17028_s3 + $0x20] sm:$0xff] }
 0x3fa   : > { %v5578_v16 = vmul.f32 %v15540_v18, %v5242_v63  ;;  %v5191_v54 = vmul.f32 %v15636_v0, %v5138_v4  ;;  %v5092_v20 = vadd.f32 %v15626_v58, %v4832_v23  ;;  %v5732_v23 = vld [vmem:[%s17028_s3 + $0x30] sm:$0xff] }
 0x3fb   : > { %5635 = vst [vmem:[#allocation2 + $0x48] sm:$0xff] %v5579_v53  ;;  %v5245_v22 = vadd.f32 %v15642_v5, %v5192_v52  ;;  %v5141_v9 = vmax.f32 %v5093_v51, 0.0  ;;  %v12895_v52 = vpack.c.bf16 %v5731_v10, %v5730_v21 }
 0x3fc   : > { %5634 = vst [vmem:[#allocation2 + $0x40] sm:$0xff] %v5578_v16  ;;  %v5244_v18 = vadd.f32 %v15642_v5, %v5191_v54  ;;  %v5140_v59 = vmax.f32 %v5092_v20, 0.0  ;;  %v11864_v61 = vpop.f32.mrb[10].mxu0  ;;  %11961 = vmatmul.mubr.f32.vlgmr.msra.gmra.mrb[0].mxu1 %v5578_v16 }
 0x3fd   : > { %v5581_v1 = vmul.f32 %v15544_v7, %v5245_v22  ;;  %v5194_v2 = vmul.f32 %v15636_v0, %v5141_v9  ;;  %v5095_v56 = vadd.f32 %v11864_v61, %v15626_v58  ;;  %v4842_v60 = vpop.f32.mrb[11].mxu0  ;;  %12890 = vmatpush3.bf16.msra.mxu1 %v15560_v11  ;;  %11963 = vmatprep.mubr.f32.mxu1 %v5579_v53  ;;  %v5733_v11 = vld [vmem:[%s17028_s3 + $0x38] sm:$0xff] }
 0x3fe   : > { %v5580_v63 = vmul.f32 %v15538_v17, %v5244_v18  ;;  %v5193_v4 = vmul.f32 %v15636_v0, %v5140_v59  ;;  %v5094_v3 = vadd.f32 %v15626_v58, %v4842_v60  ;;  %12892 = vmatprep.subr.bf16.mxu1 %v12891_v55  ;;  %v12899_v59 = vpack.c.bf16 %v5733_v11, %v5732_v23 }
 0x3ff   : > { %5637 = vst [vmem:[#allocation2 + $0x58] sm:$0xff] %v5581_v1  ;;  %v5247_v51 = vadd.f32 %v15642_v5, %v5194_v2  ;;  %v5143_v7 = vmax.f32 %v5095_v56, 0.0 }
 0x400   : > { %5636 = vst [vmem:[#allocation2 + $0x50] sm:$0xff] %v5580_v63  ;;  %v5246_v17 = vadd.f32 %v15642_v5, %v5193_v4  ;;  %v5142_v53 = vmax.f32 %v5094_v3, 0.0  ;;  %v11867_v16 = vpop.f32.mrb[12].mxu0  ;;  %11964 = vmatmul.mubr.f32.gmra.mrb[2].mxu1 %v5580_v63 }
 0x401   : > { %v5583_v54 = vmul.f32 %v15548_v13, %v5247_v51  ;;  %v5196_v20 = vmul.f32 %v15636_v0, %v5143_v7  ;;  %v5097_v22 = vadd.f32 %v11867_v16, %v15626_v58  ;;  %v4852_v9 = vpop.f32.mrb[13].mxu0  ;;  %11966 = vmatprep.mubr.f32.mxu1 %v5581_v1  ;;  %12894 = vmatpush3.bf16.msra.mxu1 %v12891_v55  ;;  %v5734_v13 = vld [vmem:[%s17028_s3 + $0x40] sm:$0xff]  ;;  %v5735_v55 = vld [vmem:[%s17028_s3 + $0x48] sm:$0xff] }
 0x402   : > { %v5582_v21 = vmul.f32 %v15542_v6, %v5246_v17  ;;  %v5195_v10 = vmul.f32 %v15636_v0, %v5142_v53  ;;  %v5096_v18 = vadd.f32 %v15626_v58, %v4852_v9  ;;  %12896 = vmatprep.subr.bf16.mxu1 %v12895_v52  ;;  %v12903_v11 = vpack.c.bf16 %v5735_v55, %v5734_v13 }
 0x403   : > { %5639 = vst [vmem:[#allocation2 + $0x68] sm:$0xff] %v5583_v54  ;;  %v5249_v61 = vadd.f32 %v15642_v5, %v5196_v20  ;;  %v5145_v2 = vmax.f32 %v5097_v22, 0.0 }
 0x404   : > { %5638 = vst [vmem:[#allocation2 + $0x60] sm:$0xff] %v5582_v21  ;;  %v5248_v6 = vadd.f32 %v15642_v5, %v5195_v10  ;;  %v5144_v1 = vmax.f32 %v5096_v18, 0.0  ;;  %v11870_v56 = vpop.f32.mrb[14].mxu0  ;;  %11967 = vmatmul.mubr.f32.gmra.mrb[4].mxu1 %v5582_v21 }
 0x405   : > { %v5585_v60 = vmul.f32 %v15552_v15, %v5249_v61  ;;  %v5198_v63 = vmul.f32 %v15636_v0, %v5145_v2  ;;  %v5099_v4 = vadd.f32 %v11870_v56, %v15626_v58  ;;  %v4862_v3 = vpop.f32.mrb[15].mxu0  ;;  %11969 = vmatprep.mubr.f32.mxu1 %v5583_v54  ;;  %12898 = vmatpush3.bf16.msra.mxu1 %v12895_v52  ;;  %v5736_v15 = vld [vmem:[%s17028_s3 + $0x50] sm:$0xff]  ;;  %v5737_v52 = vld [vmem:[%s17028_s3 + $0x58] sm:$0xff] }
 0x406   : > { %v5584_v51 = vmul.f32 %v15546_v8, %v5248_v6  ;;  %v5197_v7 = vmul.f32 %v15636_v0, %v5144_v1  ;;  %v5098_v23 = vadd.f32 %v15626_v58, %v4862_v3  ;;  %12900 = vmatprep.subr.bf16.mxu1 %v12899_v59  ;;  %v12907_v2 = vpack.c.bf16 %v5737_v52, %v5736_v15 }
 0x407   : > { %5641 = vst [vmem:[#allocation2 + $0x78] sm:$0xff] %v5585_v60  ;;  %v5251_v17 = vadd.f32 %v15642_v5, %v5198_v63  ;;  %v5147_v53 = vmax.f32 %v5099_v4, 0.0 }
 0x408   : > { %5640 = vst [vmem:[#allocation2 + $0x70] sm:$0xff] %v5584_v51  ;;  %v5250_v8 = vadd.f32 %v15642_v5, %v5197_v7  ;;  %v5146_v16 = vmax.f32 %v5098_v23, 0.0  ;;  %v11873_v54 = vpop.f32.mrb[16].mxu0  ;;  %11970 = vmatmul.mubr.f32.gmra.mrb[6].mxu1 %v5584_v51 }
 0x409   : > { %v5587_v20 = vmul.f32 %v15564_v12, %v5251_v17  ;;  %v5200_v22 = vmul.f32 %v15636_v0, %v5147_v53  ;;  %v5101_v9 = vadd.f32 %v11873_v54, %v15626_v58  ;;  %v4872_v21 = vpop.f32.mrb[17].mxu0  ;;  %11972 = vmatprep.mubr.f32.mxu1 %v5585_v60  ;;  %12902 = vmatpush3.bf16.msra.mxu1 %v12899_v59  ;;  %v5738_v12 = vld [vmem:[%s17028_s3 + $0x60] sm:$0xff]  ;;  %v5739_v59 = vld [vmem:[%s17028_s3 + $0x68] sm:$0xff] }
 0x40a   : > { %v5586_v10 = vmul.f32 %v15550_v14, %v5250_v8  ;;  %v5199_v18 = vmul.f32 %v15636_v0, %v5146_v16  ;;  %v5100_v61 = vadd.f32 %v15626_v58, %v4872_v21  ;;  %12904 = vmatprep.subr.bf16.mxu1 %v12903_v11  ;;  %v12911_v23 = vpack.c.bf16 %v5739_v59, %v5738_v12 }
 0x40b   : > { %5643 = vst [vmem:[#allocation2 + $0x88] sm:$0xff] %v5587_v20  ;;  %v5253_v13 = vadd.f32 %v15642_v5, %v5200_v22  ;;  %v5149_v55 = vmax.f32 %v5101_v9, 0.0 }
 0x40c   : > { %5642 = vst [vmem:[#allocation2 + $0x80] sm:$0xff] %v5586_v10  ;;  %v5252_v14 = vadd.f32 %v15642_v5, %v5199_v18  ;;  %v5148_v6 = vmax.f32 %v5100_v61, 0.0  ;;  %v11876_v1 = vpop.f32.mrb[18].mxu0  ;;  %11973 = vmatmul.mubr.f32.gmra.mrb[8].mxu1 %v5586_v10 }
 0x40d   : > { %v5589_v56 = vmul.f32 %v15569_v38, %v5253_v13  ;;  %v5202_v60 = vmul.f32 %v15636_v0, %v5149_v55  ;;  %v5103_v63 = vadd.f32 %v11876_v1, %v15626_v58  ;;  %v4882_v4 = vpop.f32.mrb[19].mxu0  ;;  %11975 = vmatprep.mubr.f32.mxu1 %v5587_v20  ;;  %12906 = vmatpush3.bf16.msra.mxu1 %v12903_v11  ;;  %v5740_v38 = vld [vmem:[%s17028_s3 + $0x70] sm:$0xff]  ;;  %v5741_v11 = vld [vmem:[%s17028_s3 + $0x78] sm:$0xff] }
 0x40e   : > { %v5588_v3 = vmul.f32 %v15562_v57, %v5252_v14  ;;  %v5201_v51 = vmul.f32 %v15636_v0, %v5148_v6  ;;  %v5102_v7 = vadd.f32 %v15626_v58, %v4882_v4  ;;  %12908 = vmatprep.subr.bf16.mxu1 %v12907_v2  ;;  %v12915_v10 = vpack.c.bf16 %v5741_v11, %v5740_v38 }
 0x40f   : > { %5645 = vst [vmem:[#allocation2 + $0x98] sm:$0xff] %v5589_v56  ;;  %v5255_v17 = vadd.f32 %v15642_v5, %v5202_v60  ;;  %v5151_v53 = vmax.f32 %v5103_v63, 0.0 }
 0x410   : > { %5644 = vst [vmem:[#allocation2 + $0x90] sm:$0xff] %v5588_v3  ;;  %v5254_v57 = vadd.f32 %v15642_v5, %v5201_v51  ;;  %v5150_v15 = vmax.f32 %v5102_v7, 0.0  ;;  %v11879_v52 = vpop.f32.mrb[20].mxu0  ;;  %11976 = vmatmul.mubr.f32.gmra.mrb[10].mxu1 %v5588_v3 }
 0x411   : > { %v5591_v8 = vmul.f32 %v15573_v32, %v5255_v17  ;;  %v5204_v16 = vmul.f32 %v15636_v0, %v5151_v53  ;;  %v5105_v54 = vadd.f32 %v11879_v52, %v15626_v58  ;;  %v4892_v20 = vpop.f32.mrb[21].mxu0  ;;  %11978 = vmatprep.mubr.f32.mxu1 %v5589_v56  ;;  %12910 = vmatpush3.bf16.msra.mxu1 %v12907_v2  ;;  %v10119_v32 = vld [vmem:[%s17028_s3 + $0x100] sm:$0xff]  ;;  %v10120_v2 = vld [vmem:[%s17028_s3 + $0x108] sm:$0xff] }
 0x412   : > { %v5590_v22 = vmul.f32 %v15567_v19, %v5254_v57  ;;  %v5203_v9 = vmul.f32 %v15636_v0, %v5150_v15  ;;  %v5104_v21 = vadd.f32 %v15626_v58, %v4892_v20  ;;  %12912 = vmatprep.subr.bf16.mxu1 %v12911_v23  ;;  %v15774_v63 = vpack.c.bf16 %v10120_v2, %v10119_v32 }
 0x413   : > { %5647 = vst [vmem:[#allocation2 + $0xa8] sm:$0xff] %v5591_v8  ;;  %v5257_v18 = vadd.f32 %v15642_v5, %v5204_v16  ;;  %v5153_v61 = vmax.f32 %v5105_v54, 0.0 }
 0x414   : > { %5646 = vst [vmem:[#allocation2 + $0xa0] sm:$0xff] %v5590_v22  ;;  %v5256_v19 = vadd.f32 %v15642_v5, %v5203_v9  ;;  %v5152_v13 = vmax.f32 %v5104_v21, 0.0  ;;  %v11882_v55 = vpop.f32.mrb[22].mxu0  ;;  %11979 = vmatmul.mubr.f32.gmra.mrb[12].mxu1 %v5590_v22 }
 0x415   : > { %v5593_v12 = vmul.f32 %v15577_v29, %v5257_v18  ;;  %v5206_v59 = vmul.f32 %v15636_v0, %v5153_v61  ;;  %v5107_v14 = vadd.f32 %v11882_v55, %v15626_v58  ;;  %v4902_v6 = vpop.f32.mrb[23].mxu0  ;;  %11981 = vmatprep.mubr.f32.mxu1 %v5591_v8  ;;  %12914 = vmatpush3.bf16.msra.mxu1 %v12911_v23 }
 0x416   : > { %v5592_v1 = vmul.f32 %v15571_v35, %v5256_v19  ;;  %v5205_v56 = vmul.f32 %v15636_v0, %v5152_v13  ;;  %v5106_v60 = vadd.f32 %v15626_v58, %v4902_v6  ;;  %12916 = vmatprep.subr.bf16.mxu1 %v12915_v10 }
 0x417   : > { %5649 = vst [vmem:[#allocation2 + $0xb8] sm:$0xff] %v5593_v12  ;;  %v5259_v4 = vadd.f32 %v15642_v5, %v5206_v59  ;;  %v5155_v29 = vmax.f32 %v5107_v14, 0.0 }
 0x418   : > { %5648 = vst [vmem:[#allocation2 + $0xb0] sm:$0xff] %v5592_v1  ;;  %v5258_v3 = vadd.f32 %v15642_v5, %v5205_v56  ;;  %v5154_v51 = vmax.f32 %v5106_v60, 0.0  ;;  %v11885_v7 = vpop.f32.mrb[24].mxu0  ;;  %11982 = vmatmul.mubr.f32.gmra.mrb[14].mxu1 %v5592_v1 }
 0x419   : > { %v5595_v23 = vmul.f32 %v15581_v27, %v5259_v4  ;;  %v5208_v35 = vmul.f32 %v15636_v0, %v5155_v29  ;;  %v5109_v17 = vadd.f32 %v11885_v7, %v15626_v58  ;;  %v4912_v53 = vpop.f32.mrb[25].mxu0  ;;  %11984 = vmatprep.mubr.f32.mxu1 %v5593_v12  ;;  %12918 = vmatpush3.bf16.msra.mxu1 %v12915_v10 }
 0x41a   : > { %v5594_v38 = vmul.f32 %v15575_v30, %v5258_v3  ;;  %v5207_v11 = vmul.f32 %v15636_v0, %v5154_v51  ;;  %v5108_v57 = vadd.f32 %v15626_v58, %v4912_v53  ;;  %12920 = vmatprep.subr.bf16.mxu1 %v15774_v63 }
 0x41b   : > { %5651 = vst [vmem:[#allocation2 + $0xc8] sm:$0xff] %v5595_v23  ;;  %v5261_v15 = vadd.f32 %v15642_v5, %v5208_v35  ;;  %v5157_v52 = vmax.f32 %v5109_v17, 0.0 }
 0x41c   : > { %5650 = vst [vmem:[#allocation2 + $0xc0] sm:$0xff] %v5594_v38  ;;  %v5260_v27 = vadd.f32 %v15642_v5, %v5207_v11  ;;  %v5156_v8 = vmax.f32 %v5108_v57, 0.0  ;;  %v11888_v16 = vpop.f32.mrb[26].mxu0  ;;  %11985 = vmatmul.mubr.f32.gmra.mrb[16].mxu1 %v5594_v38 }
 0x41d   : > { %v5597_v54 = vmul.f32 %v15585_v25, %v5261_v15  ;;  %v5210_v30 = vmul.f32 %v15636_v0, %v5157_v52  ;;  %v5111_v20 = vadd.f32 %v11888_v16, %v15626_v58  ;;  %v4922_v22 = vpop.f32.mrb[27].mxu0  ;;  %11987 = vmatprep.mubr.f32.mxu1 %v5595_v23 }
 0x41e   : > { %v5596_v9 = vmul.f32 %v15579_v28, %v5260_v27  ;;  %v5209_v21 = vmul.f32 %v15636_v0, %v5156_v8  ;;  %v5110_v10 = vadd.f32 %v15626_v58, %v4922_v22 }
 0x41f   : > { %5653 = vst [vmem:[#allocation2 + $0xd8] sm:$0xff] %v5597_v54  ;;  %v5263_v18 = vadd.f32 %v15642_v5, %v5210_v30  ;;  %v5159_v61 = vmax.f32 %v5111_v20, 0.0 }
 0x420   : > { %5652 = vst [vmem:[#allocation2 + $0xd0] sm:$0xff] %v5596_v9  ;;  %v5262_v32 = vadd.f32 %v15642_v5, %v5209_v21  ;;  %v5158_v25 = vmax.f32 %v5110_v10, 0.0  ;;  %v11891_v2 = vpop.f32.mrb[28].mxu0  ;;  %11988 = vmatmul.mubr.f32.gmra.mrb[18].mxu1 %v5596_v9 }
 0x421   : > { %v5599_v19 = vmul.f32 %v15589_v31, %v5263_v18  ;;  %v5212_v13 = vmul.f32 %v15636_v0, %v5159_v61  ;;  %v5113_v28 = vadd.f32 %v11891_v2, %v15626_v58  ;;  %v4932_v55 = vpop.f32.mrb[29].mxu0  ;;  %11990 = vmatprep.mubr.f32.mxu1 %v5597_v54 }
 0x422   : > { %v5598_v12 = vmul.f32 %v15583_v26, %v5262_v32  ;;  %v5211_v59 = vmul.f32 %v15636_v0, %v5158_v25  ;;  %v5112_v14 = vadd.f32 %v15626_v58, %v4932_v55 }
 0x423   : > { %5655 = vst [vmem:[#allocation2 + $0xe8] sm:$0xff] %v5599_v19  ;;  %v5265_v6 = vadd.f32 %v15642_v5, %v5212_v13  ;;  %v5161_v1 = vmax.f32 %v5113_v28, 0.0 }
 0x424   : > { %5654 = vst [vmem:[#allocation2 + $0xe0] sm:$0xff] %v5598_v12  ;;  %v5264_v56 = vadd.f32 %v15642_v5, %v5211_v59  ;;  %v5160_v31 = vmax.f32 %v5112_v14, 0.0  ;;  %v11894_v60 = vpop.f32.mrb[30].mxu0  ;;  %11991 = vmatmul.mubr.f32.gmra.mrb[20].mxu1 %v5598_v12 }
 0x425   : > { %v5601_v4 = vmul.f32 %v15593_v34, %v5265_v6  ;;  %v5214_v29 = vmul.f32 %v15636_v0, %v5161_v1  ;;  %v5115_v26 = vadd.f32 %v11894_v60, %v15626_v58  ;;  %v4942_v3 = vpop.f32.mrb[31].mxu0  ;;  %11993 = vmatprep.mubr.f32.mxu1 %v5599_v19 }
 0x426   : > { %v5600_v51 = vmul.f32 %v15587_v24, %v5264_v56  ;;  %v5213_v7 = vmul.f32 %v15636_v0, %v5160_v31  ;;  %v5114_v23 = vadd.f32 %v15626_v58, %v4942_v3 }
 0x427   : > { %5657 = vst [vmem:[#allocation2 + $0xf8] sm:$0xff] %v5601_v4  ;;  %v5267_v35 = vadd.f32 %v15642_v5, %v5214_v29  ;;  %v5163_v17 = vmax.f32 %v5115_v26, 0.0 }
 0x428   : > { %5656 = vst [vmem:[#allocation2 + $0xf0] sm:$0xff] %v5600_v51  ;;  %v5266_v53 = vadd.f32 %v15642_v5, %v5213_v7  ;;  %v5162_v34 = vmax.f32 %v5114_v23, 0.0  ;;  %v11897_v38 = vpop.f32.mrb[32].mxu0  ;;  %11994 = vmatmul.mubr.f32.gmra.mrb[22].mxu1 %v5600_v51 }
 0x429   : > { %v5603_v11 = vmul.f32 %v15597_v37, %v5267_v35  ;;  %v5216_v57 = vmul.f32 %v15636_v0, %v5163_v17  ;;  %v5117_v24 = vadd.f32 %v11897_v38, %v15626_v58  ;;  %v4952_v15 = vpop.f32.mrb[33].mxu0  ;;  %11996 = vmatprep.mubr.f32.mxu1 %v5601_v4 }
 0x42a   : > { %v5602_v52 = vmul.f32 %v15591_v33, %v5266_v53  ;;  %v5215_v27 = vmul.f32 %v15636_v0, %v5162_v34  ;;  %v5116_v8 = vadd.f32 %v15626_v58, %v4952_v15 }
 0x42b   : > { %5659 = vst [vmem:[#allocation2 + $0x108] sm:$0xff] %v5603_v11  ;;  %v5269_v16 = vadd.f32 %v15642_v5, %v5216_v57  ;;  %v5165_v54 = vmax.f32 %v5117_v24, 0.0 }
 0x42c   : > { %5658 = vst [vmem:[#allocation2 + $0x100] sm:$0xff] %v5602_v52  ;;  %v5268_v30 = vadd.f32 %v15642_v5, %v5215_v27  ;;  %v5164_v37 = vmax.f32 %v5116_v8, 0.0  ;;  %v11900_v20 = vpop.f32.mrb[34].mxu0  ;;  %11997 = vmatmul.mubr.f32.gmra.mrb[24].mxu1 %v5602_v52 }
 0x42d   : > { %v5605_v22 = vmul.f32 %v15601_v40, %v5269_v16  ;;  %v5218_v9 = vmul.f32 %v15636_v0, %v5165_v54  ;;  %v5119_v33 = vadd.f32 %v11900_v20, %v15626_v58  ;;  %v4962_v21 = vpop.f32.mrb[35].mxu0  ;;  %11999 = vmatprep.mubr.f32.mxu1 %v5603_v11 }
 0x42e   : > { %v5604_v10 = vmul.f32 %v15595_v36, %v5268_v30  ;;  %v5217_v18 = vmul.f32 %v15636_v0, %v5164_v37  ;;  %v5118_v61 = vadd.f32 %v15626_v58, %v4962_v21 }
 0x42f   : > { %5661 = vst [vmem:[#allocation2 + $0x118] sm:$0xff] %v5605_v22  ;;  %v5271_v32 = vadd.f32 %v15642_v5, %v5218_v9  ;;  %v5167_v25 = vmax.f32 %v5119_v33, 0.0 }
 0x430   : > { %5660 = vst [vmem:[#allocation2 + $0x110] sm:$0xff] %v5604_v10  ;;  %v5270_v2 = vadd.f32 %v15642_v5, %v5217_v18  ;;  %v5166_v40 = vmax.f32 %v5118_v61, 0.0  ;;  %v11903_v19 = vpop.f32.mrb[36].mxu0  ;;  %12000 = vmatmul.mubr.f32.gmra.mrb[26].mxu1 %v5604_v10 }
 0x431   : > { %v5607_v13 = vmul.f32 %v15605_v42, %v5271_v32  ;;  %v5220_v28 = vmul.f32 %v15636_v0, %v5167_v25  ;;  %v5121_v36 = vadd.f32 %v11903_v19, %v15626_v58  ;;  %v4972_v55 = vpop.f32.mrb[37].mxu0  ;;  %12002 = vmatprep.mubr.f32.mxu1 %v5605_v22 }
 0x432   : > { %v5606_v12 = vmul.f32 %v15599_v39, %v5270_v2  ;;  %v5219_v59 = vmul.f32 %v15636_v0, %v5166_v40  ;;  %v5120_v14 = vadd.f32 %v15626_v58, %v4972_v55 }
 0x433   : > { %5663 = vst [vmem:[#allocation2 + $0x128] sm:$0xff] %v5607_v13  ;;  %v5273_v6 = vadd.f32 %v15642_v5, %v5220_v28  ;;  %v5169_v1 = vmax.f32 %v5121_v36, 0.0 }
 0x434   : > { %5662 = vst [vmem:[#allocation2 + $0x120] sm:$0xff] %v5606_v12  ;;  %v5272_v56 = vadd.f32 %v15642_v5, %v5219_v59  ;;  %v5168_v42 = vmax.f32 %v5120_v14, 0.0  ;;  %v11906_v31 = vpop.f32.mrb[38].mxu0  ;;  %12003 = vmatmul.mubr.f32.gmra.mrb[28].mxu1 %v5606_v12  ;;  %v5562_v14 = vpop.permute.xlu1 %5561 }
 0x435   : > { %v5609_v60 = vmul.f32 %v15609_v44, %v5273_v6  ;;  %v5222_v4 = vmul.f32 %v15636_v0, %v5169_v1  ;;  %v5123_v39 = vadd.f32 %v11906_v31, %v15626_v58  ;;  %v4982_v29 = vpop.f32.mrb[39].mxu0  ;;  %12005 = vmatprep.mubr.f32.mxu1 %v5607_v13 }
 0x436   : > { %v5608_v26 = vmul.f32 %v15603_v41, %v5272_v56  ;;  %v5221_v3 = vmul.f32 %v15636_v0, %v5168_v42  ;;  %v5122_v51 = vadd.f32 %v15626_v58, %v4982_v29 }
 0x437   : > { %5665 = vst [vmem:[#allocation2 + $0x138] sm:$0xff] %v5609_v60  ;;  %v5275_v7 = vadd.f32 %v15642_v5, %v5222_v4  ;;  %v5171_v23 = vmax.f32 %v5123_v39, 0.0 }
 0x438   : > { %5664 = vst [vmem:[#allocation2 + $0x130] sm:$0xff] %v5608_v26  ;;  %v5274_v35 = vadd.f32 %v15642_v5, %v5221_v3  ;;  %v5170_v44 = vmax.f32 %v5122_v51, 0.0  ;;  %v11909_v17 = vpop.f32.mrb[40].mxu0  ;;  %12006 = vmatmul.mubr.f32.gmra.mrb[30].mxu1 %v5608_v26  ;;  %v17290_v26 = vld [vmem:[#allocation3_spill] sm:$0xff] }
 0x439   : > { %v5611_v53 = vmul.f32 %v15613_v46, %v5275_v7  ;;  %v5224_v34 = vmul.f32 %v15636_v0, %v5171_v23  ;;  %v5125_v41 = vadd.f32 %v11909_v17, %v15626_v58  ;;  %v4992_v38 = vpop.f32.mrb[41].mxu0  ;;  %12008 = vmatprep.mubr.f32.mxu1 %v5609_v60  ;;  %v5678_v51 = vld [vmem:[#allocation2 + $0x7] sm:$0xff]  ;;  %v10121_v23 = vld [vmem:[%s17028_s3 + $0x110] sm:$0xff] }
 0x43a   : > { %v5610_v11 = vmul.f32 %v15607_v43, %v5274_v35  ;;  %v5223_v57 = vmul.f32 %v15636_v0, %v5170_v44  ;;  %v5124_v24 = vadd.f32 %v15626_v58, %v4992_v38  ;;  %v10122_v35 = vld [vmem:[%s17028_s3 + $0x118] sm:$0xff]  ;;  %v5572_v44 = vpop.permute.xlu1 %5571 }
 0x43b   : > { %5667 = vst [vmem:[#allocation2 + $0x148] sm:$0xff] %v5611_v53  ;;  %v5277_v15 = vadd.f32 %v15642_v5, %v5224_v34  ;;  %v5173_v52 = vmax.f32 %v5125_v41, 0.0  ;;  %v5680_v38 = vld [vmem:[#allocation2 + $0x17] sm:$0xff] }
 0x43c   : > { %5666 = vst [vmem:[#allocation2 + $0x140] sm:$0xff] %v5610_v11  ;;  %v5276_v27 = vadd.f32 %v15642_v5, %v5223_v57  ;;  %v5172_v46 = vmax.f32 %v5124_v24, 0.0  ;;  %v11912_v8 = vpop.f32.mrb[42].mxu0  ;;  %12009 = vmatmul.mubr.f32.gmra.mrb[32].mxu1 %v5610_v11  ;;  %v12923_v11 = vpack.c.bf16 %v10122_v35, %v10121_v23  ;;  %v10123_v57 = vld [vmem:[%s17028_s3 + $0x120] sm:$0xff]  ;;  %v10124_v24 = vld [vmem:[%s17028_s3 + $0x128] sm:$0xff]  ;;  %v16029_v23 = vld [vmem:[#allocation2 + $0x117] sm:$0xff] }
 0x43d   : > { %v5613_v16 = vmul.f32 %v15617_v48, %v5277_v15  ;;  %v5226_v54 = vmul.f32 %v15636_v0, %v5173_v52  ;;  %v5127_v43 = vadd.f32 %v11912_v8, %v15626_v58  ;;  %v5002_v30 = vpop.f32.mrb[43].mxu0  ;;  %12011 = vmatprep.mubr.f32.mxu1 %v5611_v53  ;;  %v5567_v53 = vpop.permute.xlu0 %5566  ;;  %v15897_v15 = vld [vmem:[#allocation2 + $0x1f] sm:$0xff]  ;;  %v10125_v52 = vld [vmem:[%s17028_s3 + $0x130] sm:$0xff] }
 0x43e   : > { %v5612_v37 = vmul.f32 %v15611_v45, %v5276_v27  ;;  %v5225_v20 = vmul.f32 %v15636_v0, %v5172_v46  ;;  %v5126_v22 = vadd.f32 %v15626_v58, %v5002_v30  ;;  %v10126_v27 = vld [vmem:[%s17028_s3 + $0x138] sm:$0xff]  ;;  %v15906_v46 = vld [vmem:[#allocation2 + $0x27] sm:$0xff]  ;;  %v15909_v8 = vld [vmem:[#allocation2 + $0x2f] sm:$0xff] }
 0x43f   : > { %5669 = vst [vmem:[#allocation2 + $0x158] sm:$0xff] %v5613_v16  ;;  %v5279_v9 = vadd.f32 %v15642_v5, %v5226_v54  ;;  %v5175_v33 = vmax.f32 %v5127_v43, 0.0  ;;  %v10128_v54 = vld [vmem:[%s17028_s3 + $0x148] sm:$0xff]  ;;  %v15918_v43 = vld [vmem:[#allocation2 + $0x37] sm:$0xff]  ;;  %v16032_v35 = vld [vmem:[#allocation2 + $0x11f] sm:$0xff] }
 0x440   : > { %5668 = vst [vmem:[#allocation2 + $0x150] sm:$0xff] %v5612_v37  ;;  %v5278_v21 = vadd.f32 %v15642_v5, %v5225_v20  ;;  %v5174_v48 = vmax.f32 %v5126_v22, 0.0  ;;  %v11915_v10 = vpop.f32.mrb[44].mxu0  ;;  %12012 = vmatmul.mubr.f32.gmra.mrb[34].mxu1 %v5612_v37  ;;  %v15921_v37 = vld [vmem:[#allocation2 + $0x3f] sm:$0xff]  ;;  %v10129_v20 = vld [vmem:[%s17028_s3 + $0x150] sm:$0xff] }
 0x441   : > { %v5615_v18 = vmul.f32 %v15621_v50, %v5279_v9  ;;  %v5228_v61 = vmul.f32 %v15636_v0, %v5175_v33  ;;  %v5129_v45 = vadd.f32 %v11915_v10, %v15626_v58  ;;  %v5012_v32 = vpop.f32.mrb[45].mxu0  ;;  %12014 = vmatprep.mubr.f32.mxu1 %v5613_v16  ;;  %v10127_v16 = vld [vmem:[%s17028_s3 + $0x140] sm:$0xff]  ;;  %v10130_v22 = vld [vmem:[%s17028_s3 + $0x158] sm:$0xff]  ;;  %v10132_v10 = vld [vmem:[%s17028_s3 + $0x168] sm:$0xff] }
 0x442   : > { %v5614_v25 = vmul.f32 %v15615_v47, %v5278_v21  ;;  %v5227_v2 = vmul.f32 %v15636_v0, %v5174_v48  ;;  %v5128_v40 = vadd.f32 %v15626_v58, %v5012_v32  ;;  %v12935_v30 = vpack.c.bf16 %v10128_v54, %v10127_v16  ;;  %v15930_v9 = vld [vmem:[#allocation2 + $0x47] sm:$0xff]  ;;  %v15933_v21 = vld [vmem:[#allocation2 + $0x4f] sm:$0xff]  ;;  %v10138_v16 = vld [vmem:[%s17028_s3 + $0x198] sm:$0xff] }
 0x443   : > { %5671 = vst [vmem:[#allocation2 + $0x168] sm:$0xff] %v5615_v18  ;;  %v5281_v19 = vadd.f32 %v15642_v5, %v5228_v61  ;;  %v5177_v13 = vmax.f32 %v5129_v45, 0.0  ;;  %v12939_v33 = vpack.c.bf16 %v10130_v22, %v10129_v20  ;;  %v10131_v48 = vld [vmem:[%s17028_s3 + $0x160] sm:$0xff]  ;;  %v10133_v32 = vld [vmem:[%s17028_s3 + $0x170] sm:$0xff]  ;;  %v10140_v22 = vld [vmem:[%s17028_s3 + $0x1a8] sm:$0xff] }
 0x444   : > { %5670 = vst [vmem:[#allocation2 + $0x160] sm:$0xff] %v5614_v25  ;;  %v5280_v28 = vadd.f32 %v15642_v5, %v5227_v2  ;;  %v5176_v50 = vmax.f32 %v5128_v40, 0.0  ;;  %v11918_v36 = vpop.f32.mrb[46].mxu0  ;;  %12015 = vmatmul.mubr.f32.gmra.mrb[36].mxu1 %v5614_v25  ;;  %v12943_v61 = vpack.c.bf16 %v10132_v10, %v10131_v48  ;;  %v15945_v45 = vld [vmem:[#allocation2 + $0x5f] sm:$0xff]  ;;  %v15954_v2 = vld [vmem:[#allocation2 + $0x67] sm:$0xff]  ;;  %v6418_v54 = vld [vmem:[#allocation2 + $0x11] sm:$0xff] }
 0x445   : > { %v5617_v55 = vmul.f32 %v15631_v62, %v5281_v19  ;;  %v5230_v12 = vmul.f32 %v15636_v0, %v5177_v13  ;;  %v5131_v47 = vadd.f32 %v11918_v36, %v15626_v58  ;;  %v5022_v59 = vpop.f32.mrb[47].mxu0  ;;  %12017 = vmatprep.mubr.f32.mxu1 %v5615_v18  ;;  %v15942_v18 = vld [vmem:[#allocation2 + $0x57] sm:$0xff]  ;;  %v15957_v19 = vld [vmem:[#allocation2 + $0x6f] sm:$0xff]  ;;  %v10135_v13 = vld [vmem:[%s17028_s3 + $0x180] sm:$0xff] }
 0x446   : > { %v5616_v6 = vmul.f32 %v15619_v49, %v5280_v28  ;;  %v5229_v1 = vmul.f32 %v15636_v0, %v5176_v50  ;;  %v5130_v56 = vadd.f32 %v15626_v58, %v5022_v59  ;;  %v10134_v25 = vld [vmem:[%s17028_s3 + $0x178] sm:$0xff]  ;;  %v10136_v28 = vld [vmem:[%s17028_s3 + $0x188] sm:$0xff]  ;;  %v10139_v20 = vld [vmem:[%s17028_s3 + $0x1a0] sm:$0xff] }
 0x447   : > { %5673 = vst [vmem:[#allocation2 + $0x178] sm:$0xff] %v5617_v55  ;;  %v5283_v42 = vadd.f32 %v15642_v5, %v5230_v12  ;;  %v5179_v31 = vmax.f32 %v5131_v47, 0.0  ;;  %v12947_v40 = vpack.c.bf16 %v10134_v25, %v10133_v32  ;;  %v15966_v50 = vld [vmem:[#allocation2 + $0x77] sm:$0xff]  ;;  %v15969_v36 = vpack.c.bf16 %v10136_v28, %v10135_v13  ;;  %v15974_v12 = vld [vmem:[#allocation2 + $0x87] sm:$0xff]  ;;  %v15978_v47 = vld [vmem:[#allocation2 + $0x8f] sm:$0xff] }
 0x448   : > { %5672 = vst [vmem:[#allocation2 + $0x170] sm:$0xff] %v5616_v6  ;;  %v5282_v62 = vadd.f32 %v15642_v5, %v5229_v1  ;;  %v5178_v60 = vmax.f32 %v5130_v56, 0.0  ;;  %12018 = vmatmul.mubr.f32.gmra.mrb[38].mxu1 %v5616_v6  ;;  %v15875_v4 = vpop.f32.mrb[48].mxu0  ;;  %v15981_v59 = vld [vmem:[#allocation2 + $0x97] sm:$0xff]  ;;  %v15987_v6 = vld [vmem:[#allocation2 + $0xa7] sm:$0xff]  ;;  %v15990_v1 = vld [vmem:[#allocation2 + $0xaf] sm:$0xff]  ;;  %v12959_v48 = vpack.c.bf16 %v10140_v22, %v10139_v20 }
 0x449   : > { %17288 = vst [vmem:[#allocation4_spill] sm:$0xff] %v15875_v4  ;;  %v5619_v39 = vmul.f32 %v5562_v14, %v5283_v42  ;;  %v5232_v29 = vmul.f32 %v15636_v0, %v5179_v31  ;;  %12020 = vmatprep.mubr.f32.mxu1 %v5617_v55  ;;  %v15878_v49 = vpop.f32.mrb[49].mxu0  ;;  %v15971_v55 = vld [vmem:[#allocation2 + $0x7f] sm:$0xff]  ;;  %v15993_v56 = vld [vmem:[#allocation2 + $0xb7] sm:$0xff]  ;;  %v15999_v31 = vld [vmem:[#allocation2 + $0xc7] sm:$0xff] }
 0x44a   : > { %17289 = vst [vmem:[#allocation5_spill] sm:$0xff] %v15878_v49  ;;  %v5618_v3 = vmul.f32 %v17290_v26, %v5282_v62  ;;  %v5231_v58 = vmul.f32 %v15636_v0, %v5178_v60  ;;  %v5679_v0 = vld [vmem:[#allocation2 + $0xf] sm:$0xff]  ;;  %v15984_v14 = vld [vmem:[#allocation2 + $0x9f] sm:$0xff]  ;;  %v16005_v60 = vld [vmem:[#allocation2 + $0xd7] sm:$0xff] }
 0x44b   : > { %5675 = vst [vmem:[#allocation2 + $0x188] sm:$0xff] %v5619_v39  ;;  %v5285_v7 = vadd.f32 %v15642_v5, %v5232_v29  ;;  %v15996_v42 = vld [vmem:[#allocation2 + $0xbf] sm:$0xff]  ;;  %v16002_v62 = vld [vmem:[#allocation2 + $0xcf] sm:$0xff]  ;;  %v16011_v29 = vld [vmem:[#allocation2 + $0xe7] sm:$0xff] }
 0x44c   : > { %5674 = vst [vmem:[#allocation2 + $0x180] sm:$0xff] %v5618_v3  ;;  %v5284_v17 = vadd.f32 %v15642_v5, %v5231_v58  ;;  %12021 = vmatmul.mubr.f32.gmra.mrb[40].mxu1 %v5618_v3  ;;  %v12927_v5 = vpack.c.bf16 %v10124_v24, %v10123_v57  ;;  %v16008_v39 = vld [vmem:[#allocation2 + $0xdf] sm:$0xff]  ;;  %v16014_v26 = vld [vmem:[#allocation2 + $0xef] sm:$0xff]  ;;  %v16017_v3 = vld [vmem:[#allocation2 + $0xf7] sm:$0xff] }
 0x44d   : > { %v5621_v34 = vmul.f32 %v5572_v44, %v5285_v7  ;;  %12055 = vmatprep.mubr.f32.mxu1 %v5678_v51  ;;  %v16020_v58 = vld [vmem:[#allocation2 + $0xff] sm:$0xff]  ;;  %v16023_v51 = vld [vmem:[#allocation2 + $0x107] sm:$0xff]  ;;  %v16026_v7 = vld [vmem:[#allocation2 + $0x10f] sm:$0xff] }
 0x44e   : > { %v5620_v41 = vmul.f32 %v5567_v53, %v5284_v17  ;;  %v16035_v44 = vld [vmem:[#allocation2 + $0x127] sm:$0xff]  ;;  %v16038_v17 = vld [vmem:[#allocation2 + $0x12f] sm:$0xff]  ;;  %v16041_v53 = vld [vmem:[#allocation2 + $0x137] sm:$0xff] }
 0x44f   : > { %5677 = vst [vmem:[#allocation2 + $0x198] sm:$0xff] %v5621_v34  ;;  %v16044_v34 = vld [vmem:[#allocation2 + $0x13f] sm:$0xff]  ;;  %v16059_v57 = vld [vmem:[#allocation2 + $0x167] sm:$0xff]  ;;  %v16062_v24 = vld [vmem:[#allocation2 + $0x16f] sm:$0xff] }
 0x450   : > { %5676 = vst [vmem:[#allocation2 + $0x190] sm:$0xff] %v5620_v41  ;;  %12056 = vmatmul.mubr.f32.vlgmr.msra.gmra.mrb[42].mxu1 %v5679_v0  ;;  %v16047_v0 = vld [vmem:[#allocation2 + $0x147] sm:$0xff]  ;;  %v16050_v41 = vld [vmem:[#allocation2 + $0x14f] sm:$0xff]  ;;  %v10142_v32 = vld [vmem:[%s17028_s3 + $0x1b8] sm:$0xff] }
 0x451   : > { %12922 = vmatpush3.bf16.msra.mxu1 %v15774_v63  ;;  %12058 = vmatprep.mubr.f32.mxu1 %v5680_v38  ;;  %v12931_v63 = vpack.c.bf16 %v10126_v27, %v10125_v52  ;;  %v16053_v38 = vld [vmem:[#allocation2 + $0x157] sm:$0xff]  ;;  %v6417_v52 = vld [vmem:[#allocation2 + $0x9] sm:$0xff]  ;;  %v16084_v10 = vld [vmem:[#allocation2 + $0x21] sm:$0xff] }
 0x452   : > { %12924 = vmatprep.subr.bf16.mxu1 %v12923_v11  ;;  %v16093_v25 = vld [vmem:[#allocation2 + $0x29] sm:$0xff]  ;;  %v16096_v13 = vld [vmem:[#allocation2 + $0x31] sm:$0xff]  ;;  %v10143_v28 = vld [vmem:[%s17028_s3 + $0x1c0] sm:$0xff] }
 0x453   : > { %v16068_v27 = vld [vmem:[#allocation2 + $0x17f] sm:$0xff]  ;;  %v16117_v20 = vld [vmem:[#allocation2 + $0x49] sm:$0xff] }
 0x454   : > { %12059 = vmatmul.mubr.f32.gmra.mrb[44].mxu1 %v15897_v15  ;;  %v10151_v49 = vld [vmem:[%s17028_s3 + $0x200] sm:$0xff]  ;;  %v10152_v4 = vld [vmem:[%s17028_s3 + $0x208] sm:$0xff] }
 0x455   : > { %12061 = vmatprep.mubr.f32.mxu1 %v15906_v46  ;;  %12926 = vmatpush3.bf16.msra.mxu1 %v12923_v11  ;;  %v16056_v11 = vld [vmem:[#allocation2 + $0x15f] sm:$0xff] }
 0x456   : > { %12928 = vmatprep.subr.bf16.mxu1 %v12927_v5 }
 0x458   : > { %12062 = vmatmul.mubr.f32.gmra.mrb[46].mxu1 %v15909_v8 }
 0x459   : > { %12064 = vmatprep.mubr.f32.mxu1 %v15918_v43  ;;  %12930 = vmatpush3.bf16.msra.mxu1 %v12927_v5  ;;  %v16065_v5 = vld [vmem:[#allocation2 + $0x177] sm:$0xff] }
 0x45a   : > { %12932 = vmatprep.subr.bf16.mxu1 %v12931_v63 }
 0x45c   : > { %12065 = vmatmul.mubr.f32.gmra.mrb[0].mxu1 %v15921_v37 }
 0x45d   : > { %12067 = vmatprep.mubr.f32.mxu1 %v15930_v9  ;;  %12934 = vmatpush3.bf16.msra.mxu1 %v12931_v63  ;;  %v10137_v63 = vld [vmem:[%s17028_s3 + $0x190] sm:$0xff] }
 0x45e   : > { %12936 = vmatprep.subr.bf16.mxu1 %v12935_v30 }
 0x460   : > { %12068 = vmatmul.mubr.f32.gmra.mrb[2].mxu1 %v15933_v21 }
 0x461   : > { %12070 = vmatprep.mubr.f32.mxu1 %v15942_v18  ;;  %12938 = vmatpush3.bf16.msra.mxu1 %v12935_v30  ;;  %v12955_v30 = vpack.c.bf16 %v10138_v16, %v10137_v63  ;;  %v16108_v16 = vld [vmem:[#allocation2 + $0x41] sm:$0xff] }
 0x462   : > { %12940 = vmatprep.subr.bf16.mxu1 %v12939_v33 }
 0x464   : > { %12071 = vmatmul.mubr.f32.gmra.mrb[4].mxu1 %v15945_v45 }
 0x465   : > { %12073 = vmatprep.mubr.f32.mxu1 %v15954_v2  ;;  %12942 = vmatpush3.bf16.msra.mxu1 %v12939_v33  ;;  %v6419_v33 = vld [vmem:[#allocation2 + $0x19] sm:$0xff] }
 0x466   : > { %12944 = vmatprep.subr.bf16.mxu1 %v12943_v61 }
 0x468   : > { %12074 = vmatmul.mubr.f32.gmra.mrb[6].mxu1 %v15957_v19 }
 0x469   : > { %12076 = vmatprep.mubr.f32.mxu1 %v15966_v50  ;;  %12946 = vmatpush3.bf16.msra.mxu1 %v12943_v61  ;;  %v10141_v61 = vld [vmem:[%s17028_s3 + $0x1b0] sm:$0xff] }
 0x46a   : > { %12948 = vmatprep.subr.bf16.mxu1 %v12947_v40 }
 0x46c   : > { %12077 = vmatmul.mubr.f32.gmra.mrb[8].mxu1 %v15971_v55 }
 0x46d   : > { %12079 = vmatprep.mubr.f32.mxu1 %v15974_v12  ;;  %12950 = vmatpush3.bf16.msra.mxu1 %v12947_v40  ;;  %v12963_v40 = vpack.c.bf16 %v10142_v32, %v10141_v61  ;;  %v10148_v61 = vld [vmem:[%s17028_s3 + $0x1e8] sm:$0xff]  ;;  %v16129_v32 = vld [vmem:[#allocation2 + $0x59] sm:$0xff] }
 0x46e   : > { %12952 = vmatprep.subr.bf16.mxu1 %v15969_v36  ;;  %17291 = vst [vmem:[#allocation6_spill] sm:$0xff] %v16129_v32 }
 0x470   : > { %12080 = vmatmul.mubr.f32.gmra.mrb[10].mxu1 %v15978_v47 }
 0x471   : > { %12082 = vmatprep.mubr.f32.mxu1 %v15981_v59 }
 0x474   : > { %12083 = vmatmul.mubr.f32.gmra.mrb[12].mxu1 %v15984_v14 }
 0x475   : > { %12085 = vmatprep.mubr.f32.mxu1 %v15987_v6 }
 0x478   : > { %12086 = vmatmul.mubr.f32.gmra.mrb[14].mxu1 %v15990_v1 }
 0x479   : > { %12088 = vmatprep.mubr.f32.mxu1 %v15993_v56 }
 0x47c   : > { %12089 = vmatmul.mubr.f32.gmra.mrb[16].mxu1 %v15996_v42 }
 0x47d   : > { %12091 = vmatprep.mubr.f32.mxu1 %v15999_v31 }
 0x480   : > { %12092 = vmatmul.mubr.f32.gmra.mrb[18].mxu1 %v16002_v62 }
 0x481   : > { %12094 = vmatprep.mubr.f32.mxu1 %v16005_v60 }
 0x484   : > { %12095 = vmatmul.mubr.f32.gmra.mrb[20].mxu1 %v16008_v39 }
 0x485   : > { %12097 = vmatprep.mubr.f32.mxu1 %v16011_v29 }
 0x488   : > { %12098 = vmatmul.mubr.f32.gmra.mrb[22].mxu1 %v16014_v26 }
 0x489   : > { %12100 = vmatprep.mubr.f32.mxu1 %v16017_v3 }
 0x48c   : > { %12101 = vmatmul.mubr.f32.gmra.mrb[24].mxu1 %v16020_v58 }
 0x48d   : > { %12103 = vmatprep.mubr.f32.mxu1 %v16023_v51 }
 0x490   : > { %12104 = vmatmul.mubr.f32.gmra.mrb[26].mxu1 %v16026_v7 }
 0x491   : > { %12106 = vmatprep.mubr.f32.mxu1 %v16029_v23 }
 0x494   : > { %12107 = vmatmul.mubr.f32.gmra.mrb[28].mxu1 %v16032_v35 }
 0x495   : > { %12109 = vmatprep.mubr.f32.mxu1 %v16035_v44 }
 0x498   : > { %12110 = vmatmul.mubr.f32.gmra.mrb[30].mxu1 %v16038_v17 }
 0x499   : > { %12112 = vmatprep.mubr.f32.mxu1 %v16041_v53 }
 0x49c   : > { %12113 = vmatmul.mubr.f32.gmra.mrb[32].mxu1 %v16044_v34 }
 0x49d   : > { %12115 = vmatprep.mubr.f32.mxu1 %v16047_v0 }
 0x4a0   : > { %12116 = vmatmul.mubr.f32.gmra.mrb[34].mxu1 %v16050_v41 }
 0x4a1   : > { %12118 = vmatprep.mubr.f32.mxu1 %v16053_v38 }
 0x4a4   : > { %12119 = vmatmul.mubr.f32.gmra.mrb[36].mxu1 %v16056_v11 }
 0x4a5   : > { %12121 = vmatprep.mubr.f32.mxu1 %v16059_v57 }
 0x4a8   : > { %12122 = vmatmul.mubr.f32.gmra.mrb[38].mxu1 %v16062_v24 }
 0x4a9   : > { %12124 = vmatprep.mubr.f32.mxu1 %v16065_v5 }
 0x4ac   : > { %12125 = vmatmul.mubr.f32.gmra.mrb[40].mxu1 %v16068_v27 }
 0x4ad   : > { %12159 = vmatprep.mubr.f32.mxu1 %v6417_v52  ;;  %v16105_v52 = vld [vmem:[#allocation2 + $0x39] sm:$0xff] }
 0x4b0   : > { %12160 = vmatmul.mubr.f32.vlgmr.msra.gmra.mrb[42].mxu1 %v6418_v54  ;;  %v10145_v54 = vld [vmem:[%s17028_s3 + $0x1d0] sm:$0xff] }
 0x4b1   : > { %12954 = vmatpush3.bf16.msra.mxu1 %v15969_v36  ;;  %12162 = vmatprep.mubr.f32.mxu1 %v6419_v33  ;;  %v10144_v36 = vld [vmem:[%s17028_s3 + $0x1c8] sm:$0xff]  ;;  %v16120_v33 = vld [vmem:[#allocation2 + $0x51] sm:$0xff] }
 0x4b2   : > { %12956 = vmatprep.subr.bf16.mxu1 %v12955_v30  ;;  %v12967_v63 = vpack.c.bf16 %v10144_v36, %v10143_v28  ;;  %v16132_v28 = vld [vmem:[#allocation2 + $0x61] sm:$0xff]  ;;  %v10149_v36 = vld [vmem:[%s17028_s3 + $0x1f0] sm:$0xff] }
 0x4b3   : > { %17292 = vst [vmem:[#allocation7_spill] sm:$0xff] %v16132_v28 }
 0x4b4   : > { %12163 = vmatmul.mubr.f32.gmra.mrb[44].mxu1 %v16084_v10 }
 0x4b5   : > { %12165 = vmatprep.mubr.f32.mxu1 %v16093_v25  ;;  %12958 = vmatpush3.bf16.msra.mxu1 %v12955_v30  ;;  %v10146_v30 = vld [vmem:[%s17028_s3 + $0x1d8] sm:$0xff] }
 0x4b6   : > { %12960 = vmatprep.subr.bf16.mxu1 %v12959_v48  ;;  %v12971_v22 = vpack.c.bf16 %v10146_v30, %v10145_v54  ;;  %v10150_v54 = vld [vmem:[%s17028_s3 + $0x1f8] sm:$0xff]  ;;  %v16141_v30 = vld [vmem:[#allocation2 + $0x69] sm:$0xff] }
 0x4b7   : > { %17293 = vst [vmem:[#allocation8_spill] sm:$0xff] %v16141_v30 }
 0x4b8   : > { %12166 = vmatmul.mubr.f32.gmra.mrb[46].mxu1 %v16096_v13 }
 0x4b9   : > { %12168 = vmatprep.mubr.f32.mxu1 %v16105_v52  ;;  %12962 = vmatpush3.bf16.msra.mxu1 %v12959_v48  ;;  %v10147_v48 = vld [vmem:[%s17028_s3 + $0x1e0] sm:$0xff] }
 0x4ba   : > { %12964 = vmatprep.subr.bf16.mxu1 %v12963_v40 }
 0x4bc   : > { %12169 = vmatmul.mubr.f32.gmra.mrb[0].mxu1 %v16108_v16 }
 0x4bd   : > { %12171 = vmatprep.mubr.f32.mxu1 %v16117_v20  ;;  %12966 = vmatpush3.bf16.msra.mxu1 %v12963_v40  ;;  %v12975_v40 = vpack.c.bf16 %v10148_v61, %v10147_v48  ;;  %v16146_v61 = vld [vmem:[#allocation2 + $0x71] sm:$0xff] }
 0x4be   : > { %12968 = vmatprep.subr.bf16.mxu1 %v12967_v63 }
 0x4c0   : > { %12172 = vmatmul.mubr.f32.gmra.mrb[2].mxu1 %v16120_v33 }
 0x4c1   : > { %12174 = vmatprep.mubr.f32.mxu1 %v16129_v32  ;;  %12970 = vmatpush3.bf16.msra.mxu1 %v12967_v63  ;;  %v12979_v63 = vpack.c.bf16 %v10150_v54, %v10149_v36  ;;  %v16164_v54 = vld [vmem:[#allocation2 + $0x81] sm:$0xff]  ;;  %v16169_v32 = vld [vmem:[#allocation2 + $0x89] sm:$0xff] }
 0x4c2   : > { %12972 = vmatprep.subr.bf16.mxu1 %v12971_v22 }
 0x4c4   : > { %12175 = vmatmul.mubr.f32.gmra.mrb[4].mxu1 %v16132_v28 }
 0x4c5   : > { %12177 = vmatprep.mubr.f32.mxu1 %v16141_v30  ;;  %12974 = vmatpush3.bf16.msra.mxu1 %v12971_v22  ;;  %v16157_v30 = vld [vmem:[#allocation2 + $0x79] sm:$0xff]  ;;  %v16160_v22 = vpack.c.bf16 %v10152_v4, %v10151_v49  ;;  %v16179_v49 = vld [vmem:[#allocation2 + $0xa1] sm:$0xff] }
 0x4c6   : > { %12976 = vmatprep.subr.bf16.mxu1 %v12975_v40  ;;  %v16176_v4 = vld [vmem:[#allocation2 + $0x99] sm:$0xff]  ;;  %17300 = vst [vmem:[#allocation15_spill] sm:$0xff] %v16179_v49 }
 0x4c7   : > { %v16144_v48 = vpop.f32.mrb[50].mxu0  ;;  %17299 = vst [vmem:[#allocation14_spill] sm:$0xff] %v16176_v4 }
 0x4c8   : > { %17294 = vst [vmem:[#allocation9_spill] sm:$0xff] %v16144_v48  ;;  %v16154_v28 = vpop.f32.mrb[51].mxu0  ;;  %12178 = vmatmul.mubr.f32.gmra.mrb[6].mxu1 %v16146_v61 }
 0x4c9   : > { %17295 = vst [vmem:[#allocation10_spill] sm:$0xff] %v16154_v28  ;;  %12180 = vmatprep.mubr.f32.mxu1 %v16157_v30  ;;  %12978 = vmatpush3.bf16.msra.mxu1 %v12975_v40  ;;  %v16173_v28 = vld [vmem:[#allocation2 + $0x91] sm:$0xff]  ;;  %v16182_v40 = vld [vmem:[#allocation2 + $0xa9] sm:$0xff] }
 0x4ca   : > { %12980 = vmatprep.subr.bf16.mxu1 %v12979_v63  ;;  %17298 = vst [vmem:[#allocation13_spill] sm:$0xff] %v16173_v28  ;;  %17301 = vst [vmem:[#allocation16_spill] sm:$0xff] %v16182_v40 }
 0x4cb   : > { %v16162_v36 = vpop.f32.mrb[52].mxu0 }
 0x4cc   : > { %17296 = vst [vmem:[#allocation11_spill] sm:$0xff] %v16162_v36  ;;  %v16166_v48 = vpop.f32.mrb[53].mxu0  ;;  %12181 = vmatmul.mubr.f32.gmra.mrb[8].mxu1 %v16164_v54  ;;  %v16191_v36 = vld [vmem:[#allocation2 + $0xc1] sm:$0xff] }
 0x4cd   : > { %17297 = vst [vmem:[#allocation12_spill] sm:$0xff] %v16166_v48  ;;  %12183 = vmatprep.mubr.f32.mxu1 %v16169_v32  ;;  %12982 = vmatpush3.bf16.msra.mxu1 %v12979_v63  ;;  %v16185_v48 = vld [vmem:[#allocation2 + $0xb1] sm:$0xff]  ;;  %v16188_v63 = vld [vmem:[#allocation2 + $0xb9] sm:$0xff]  ;;  %17304 = vst [vmem:[#allocation19_spill] sm:$0xff] %v16191_v36 }
 0x4ce   : > { %12984 = vmatprep.subr.bf16.mxu1 %v16160_v22  ;;  %17302 = vst [vmem:[#allocation17_spill] sm:$0xff] %v16185_v48  ;;  %17303 = vst [vmem:[#allocation18_spill] sm:$0xff] %v16188_v63 }
 0x4d0   : > { %12184 = vmatmul.mubr.f32.gmra.mrb[10].mxu1 %v16173_v28 }
 0x4d1   : > { %12186 = vmatprep.mubr.f32.mxu1 %v16176_v4  ;;  %v16194_v4 = vld [vmem:[#allocation2 + $0xc9] sm:$0xff] }
 0x4d2   : > { %17305 = vst [vmem:[#allocation20_spill] sm:$0xff] %v16194_v4 }
 0x4d4   : > { %12187 = vmatmul.mubr.f32.gmra.mrb[12].mxu1 %v16179_v49  ;;  %v16197_v49 = vld [vmem:[#allocation2 + $0xd1] sm:$0xff] }
 0x4d5   : > { %12189 = vmatprep.mubr.f32.mxu1 %v16182_v40  ;;  %17306 = vst [vmem:[#allocation21_spill] sm:$0xff] %v16197_v49  ;;  %v16200_v40 = vld [vmem:[#allocation2 + $0xd9] sm:$0xff] }
 0x4d6   : > { %17307 = vst [vmem:[#allocation22_spill] sm:$0xff] %v16200_v40 }
 0x4d8   : > { %12190 = vmatmul.mubr.f32.gmra.mrb[14].mxu1 %v16185_v48  ;;  %v16203_v48 = vld [vmem:[#allocation2 + $0xe1] sm:$0xff] }
 0x4d9   : > { %12192 = vmatprep.mubr.f32.mxu1 %v16188_v63  ;;  %17308 = vst [vmem:[#allocation23_spill] sm:$0xff] %v16203_v48  ;;  %v16206_v63 = vld [vmem:[#allocation2 + $0xe9] sm:$0xff] }
 0x4da   : > { %17309 = vst [vmem:[#allocation24_spill] sm:$0xff] %v16206_v63 }
 0x4dc   : > { %12193 = vmatmul.mubr.f32.gmra.mrb[16].mxu1 %v16191_v36  ;;  %v16209_v36 = vld [vmem:[#allocation2 + $0xf1] sm:$0xff] }
 0x4dd   : > { %12195 = vmatprep.mubr.f32.mxu1 %v16194_v4  ;;  %17310 = vst [vmem:[#allocation25_spill] sm:$0xff] %v16209_v36  ;;  %v16212_v4 = vld [vmem:[#allocation2 + $0xf9] sm:$0xff] }
 0x4de   : > { %17311 = vst [vmem:[#allocation26_spill] sm:$0xff] %v16212_v4 }
 0x4e0   : > { %12196 = vmatmul.mubr.f32.gmra.mrb[18].mxu1 %v16197_v49  ;;  %v16215_v49 = vld [vmem:[#allocation2 + $0x101] sm:$0xff] }
 0x4e1   : > { %12198 = vmatprep.mubr.f32.mxu1 %v16200_v40  ;;  %17312 = vst [vmem:[#allocation27_spill] sm:$0xff] %v16215_v49  ;;  %v16218_v40 = vld [vmem:[#allocation2 + $0x109] sm:$0xff] }
 0x4e2   : > { %17313 = vst [vmem:[#allocation28_spill] sm:$0xff] %v16218_v40 }
 0x4e4   : > { %12199 = vmatmul.mubr.f32.gmra.mrb[20].mxu1 %v16203_v48  ;;  %v16221_v48 = vld [vmem:[#allocation2 + $0x111] sm:$0xff] }
 0x4e5   : > { %12201 = vmatprep.mubr.f32.mxu1 %v16206_v63  ;;  %17314 = vst [vmem:[#allocation29_spill] sm:$0xff] %v16221_v48  ;;  %v16224_v63 = vld [vmem:[#allocation2 + $0x119] sm:$0xff] }
 0x4e6   : > { %17315 = vst [vmem:[#allocation30_spill] sm:$0xff] %v16224_v63 }
 0x4e8   : > { %12202 = vmatmul.mubr.f32.gmra.mrb[22].mxu1 %v16209_v36  ;;  %v16227_v36 = vld [vmem:[#allocation2 + $0x121] sm:$0xff] }
 0x4e9   : > { %12204 = vmatprep.mubr.f32.mxu1 %v16212_v4  ;;  %17316 = vst [vmem:[#allocation31_spill] sm:$0xff] %v16227_v36  ;;  %v16230_v4 = vld [vmem:[#allocation2 + $0x129] sm:$0xff] }
 0x4ea   : > { %17317 = vst [vmem:[#allocation32_spill] sm:$0xff] %v16230_v4 }
 0x4ec   : > { %12205 = vmatmul.mubr.f32.gmra.mrb[24].mxu1 %v16215_v49  ;;  %v16233_v49 = vld [vmem:[#allocation2 + $0x131] sm:$0xff] }
 0x4ed   : > { %12207 = vmatprep.mubr.f32.mxu1 %v16218_v40  ;;  %17318 = vst [vmem:[#allocation33_spill] sm:$0xff] %v16233_v49  ;;  %v16236_v40 = vld [vmem:[#allocation2 + $0x139] sm:$0xff] }
 0x4ee   : > { %17319 = vst [vmem:[#allocation34_spill] sm:$0xff] %v16236_v40 }
 0x4f0   : > { %12208 = vmatmul.mubr.f32.gmra.mrb[26].mxu1 %v16221_v48  ;;  %v16239_v48 = vld [vmem:[#allocation2 + $0x141] sm:$0xff] }
 0x4f1   : > { %12210 = vmatprep.mubr.f32.mxu1 %v16224_v63  ;;  %17320 = vst [vmem:[#allocation35_spill] sm:$0xff] %v16239_v48  ;;  %v16242_v63 = vld [vmem:[#allocation2 + $0x149] sm:$0xff] }
 0x4f2   : > { %17321 = vst [vmem:[#allocation36_spill] sm:$0xff] %v16242_v63 }
 0x4f4   : > { %12211 = vmatmul.mubr.f32.gmra.mrb[28].mxu1 %v16227_v36  ;;  %v16245_v36 = vld [vmem:[#allocation2 + $0x151] sm:$0xff] }
 0x4f5   : > { %12213 = vmatprep.mubr.f32.mxu1 %v16230_v4  ;;  %17322 = vst [vmem:[#allocation37_spill] sm:$0xff] %v16245_v36  ;;  %v16248_v4 = vld [vmem:[#allocation2 + $0x159] sm:$0xff] }
 0x4f6   : > { %17323 = vst [vmem:[#allocation38_spill] sm:$0xff] %v16248_v4 }
 0x4f8   : > { %12214 = vmatmul.mubr.f32.gmra.mrb[30].mxu1 %v16233_v49  ;;  %v16251_v49 = vld [vmem:[#allocation2 + $0x161] sm:$0xff] }
 0x4f9   : > { %12216 = vmatprep.mubr.f32.mxu1 %v16236_v40  ;;  %17324 = vst [vmem:[#allocation39_spill] sm:$0xff] %v16251_v49  ;;  %v16254_v40 = vld [vmem:[#allocation2 + $0x169] sm:$0xff] }
 0x4fa   : > { %17325 = vst [vmem:[#allocation40_spill] sm:$0xff] %v16254_v40 }
 0x4fc   : > { %12217 = vmatmul.mubr.f32.gmra.mrb[32].mxu1 %v16239_v48  ;;  %v16257_v48 = vld [vmem:[#allocation2 + $0x171] sm:$0xff] }
 0x4fd   : > { %12219 = vmatprep.mubr.f32.mxu1 %v16242_v63  ;;  %17326 = vst [vmem:[#allocation41_spill] sm:$0xff] %v16257_v48  ;;  %v16260_v63 = vld [vmem:[#allocation2 + $0x179] sm:$0xff] }
 0x4fe   : > { %17327 = vst [vmem:[#allocation42_spill] sm:$0xff] %v16260_v63 }
 0x500   : > { %12220 = vmatmul.mubr.f32.gmra.mrb[34].mxu1 %v16245_v36  ;;  %v16263_v36 = vld [vmem:[#allocation2 + $0x181] sm:$0xff] }
 0x501   : > { %12222 = vmatprep.mubr.f32.mxu1 %v16248_v4  ;;  %v10153_v4 = vld [vmem:[%s17028_s3 + $0x210] sm:$0xff] }
 0x504   : > { %12223 = vmatmul.mubr.f32.gmra.mrb[36].mxu1 %v16251_v49  ;;  %v10154_v49 = vld [vmem:[%s17028_s3 + $0x218] sm:$0xff] }
 0x505   : > { %12225 = vmatprep.mubr.f32.mxu1 %v16254_v40  ;;  %v12987_v40 = vpack.c.bf16 %v10154_v49, %v10153_v4  ;;  %v10158_v4 = vld [vmem:[%s17028_s3 + $0x238] sm:$0xff] }
 0x506   : > { %v10166_v49 = vld [vmem:[%s17028_s3 + $0x278] sm:$0xff] }
 0x508   : > { %12226 = vmatmul.mubr.f32.gmra.mrb[38].mxu1 %v16257_v48  ;;  %v10155_v48 = vld [vmem:[%s17028_s3 + $0x220] sm:$0xff] }
 0x509   : > { %12228 = vmatprep.mubr.f32.mxu1 %v16260_v63  ;;  %v10156_v63 = vld [vmem:[%s17028_s3 + $0x228] sm:$0xff] }
 0x50a   : > { %v12991_v28 = vpack.c.bf16 %v10156_v63, %v10155_v48  ;;  %v10160_v48 = vld [vmem:[%s17028_s3 + $0x248] sm:$0xff]  ;;  %v10181_v63 = vld [vmem:[%s17028_s3 + $0x2f0] sm:$0xff] }
 0x50c   : > { %12229 = vmatmul.mubr.f32.gmra.mrb[40].mxu1 %v16263_v36 }
 0x50d   : > { %12263 = vmatprep.mubr.f32.mxu1 %v15897_v15  ;;  %v10157_v15 = vld [vmem:[%s17028_s3 + $0x230] sm:$0xff] }
 0x510   : > { %12264 = vmatmul.mubr.f32.vlgmr.msra.gmra.mrb[42].mxu1 %v15906_v46  ;;  %v12995_v46 = vpack.c.bf16 %v10158_v4, %v10157_v15  ;;  %v10182_v15 = vld [vmem:[%s17028_s3 + $0x2f8] sm:$0xff]  ;;  %v16438_v4 = vld [vmem:[#allocation2 + $0x80] sm:$0xff] }
 0x511   : > { %12986 = vmatpush3.bf16.msra.mxu1 %v16160_v22  ;;  %12266 = vmatprep.mubr.f32.mxu1 %v15909_v8  ;;  %v10159_v8 = vld [vmem:[%s17028_s3 + $0x240] sm:$0xff]  ;;  %v10162_v22 = vld [vmem:[%s17028_s3 + $0x258] sm:$0xff] }
 0x512   : > { %12988 = vmatprep.subr.bf16.mxu1 %v12987_v40 }
 0x514   : > { %12267 = vmatmul.mubr.f32.gmra.mrb[44].mxu1 %v15918_v43  ;;  %v12999_v43 = vpack.c.bf16 %v10160_v48, %v10159_v8  ;;  %v16441_v8 = vld [vmem:[#allocation2 + $0x88] sm:$0xff]  ;;  %v10183_v48 = vld [vmem:[%s17028_s3 + $0x300] sm:$0xff] }
 0x515   : > { %12269 = vmatprep.mubr.f32.mxu1 %v15921_v37  ;;  %12990 = vmatpush3.bf16.msra.mxu1 %v12987_v40  ;;  %v10161_v37 = vld [vmem:[%s17028_s3 + $0x250] sm:$0xff]  ;;  %v10168_v40 = vld [vmem:[%s17028_s3 + $0x288] sm:$0xff] }
 0x516   : > { %12992 = vmatprep.subr.bf16.mxu1 %v12991_v28 }
 0x518   : > { %12270 = vmatmul.mubr.f32.gmra.mrb[46].mxu1 %v15930_v9  ;;  %v13003_v9 = vpack.c.bf16 %v10162_v22, %v10161_v37  ;;  %v16450_v37 = vld [vmem:[#allocation2 + $0x90] sm:$0xff] }
 0x519   : > { %12272 = vmatprep.mubr.f32.mxu1 %v15933_v21  ;;  %12994 = vmatpush3.bf16.msra.mxu1 %v12991_v28  ;;  %v10163_v21 = vld [vmem:[%s17028_s3 + $0x260] sm:$0xff]  ;;  %v10164_v28 = vld [vmem:[%s17028_s3 + $0x268] sm:$0xff] }
 0x51a   : > { %12996 = vmatprep.subr.bf16.mxu1 %v12995_v46 }
 0x51c   : > { %12273 = vmatmul.mubr.f32.gmra.mrb[0].mxu1 %v15942_v18  ;;  %v13007_v18 = vpack.c.bf16 %v10164_v28, %v10163_v21  ;;  %v16458_v21 = vld [vmem:[#allocation2 + $0xa0] sm:$0xff]  ;;  %v16462_v28 = vld [vmem:[#allocation2 + $0xa8] sm:$0xff] }
 0x51d   : > { %12275 = vmatprep.mubr.f32.mxu1 %v15945_v45  ;;  %12998 = vmatpush3.bf16.msra.mxu1 %v12995_v46  ;;  %v10165_v45 = vld [vmem:[%s17028_s3 + $0x270] sm:$0xff]  ;;  %v13043_v46 = vpack.c.bf16 %v10182_v15, %v10181_v63  ;;  %v16552_v15 = vld [vmem:[#allocation2 + $0x198] sm:$0xff] }
 0x51e   : > { %13000 = vmatprep.subr.bf16.mxu1 %v12999_v43  ;;  %v16549_v63 = vld [vmem:[#allocation2 + $0x190] sm:$0xff] }
 0x51f   : > { %17330 = vst [vmem:[#allocation45_spill] sm:$0xff] %v16549_v63 }
 0x520   : > { %12276 = vmatmul.mubr.f32.gmra.mrb[2].mxu1 %v15954_v2  ;;  %v13011_v2 = vpack.c.bf16 %v10166_v49, %v10165_v45  ;;  %v16468_v45 = vld [vmem:[#allocation2 + $0xb8] sm:$0xff]  ;;  %v16471_v49 = vld [vmem:[#allocation2 + $0xc0] sm:$0xff] }
 0x521   : > { %12278 = vmatprep.mubr.f32.mxu1 %v15957_v19  ;;  %13002 = vmatpush3.bf16.msra.mxu1 %v12999_v43  ;;  %v10167_v19 = vld [vmem:[%s17028_s3 + $0x280] sm:$0xff]  ;;  %v10184_v43 = vld [vmem:[%s17028_s3 + $0x308] sm:$0xff] }
 0x522   : > { %13004 = vmatprep.subr.bf16.mxu1 %v13003_v9  ;;  %v16453_v22 = vpack.c.bf16 %v10184_v43, %v10183_v48  ;;  %v10186_v48 = vld [vmem:[%s17028_s3 + $0x318] sm:$0xff] }
 0x524   : > { %12279 = vmatmul.mubr.f32.gmra.mrb[4].mxu1 %v15966_v50  ;;  %v13015_v50 = vpack.c.bf16 %v10168_v40, %v10167_v19  ;;  %v16477_v19 = vld [vmem:[#allocation2 + $0xd0] sm:$0xff]  ;;  %v16480_v40 = vld [vmem:[#allocation2 + $0xd8] sm:$0xff] }
 0x525   : > { %12281 = vmatprep.mubr.f32.mxu1 %v15971_v55  ;;  %13006 = vmatpush3.bf16.msra.mxu1 %v13003_v9  ;;  %v16360_v55 = vld [vmem:[#allocation2 + $0x187] sm:$0xff]  ;;  %v16455_v9 = vld [vmem:[#allocation2 + $0x98] sm:$0xff] }
 0x526   : > { %13008 = vmatprep.subr.bf16.mxu1 %v13007_v18 }
 0x528   : > { %12282 = vmatmul.mubr.f32.gmra.mrb[6].mxu1 %v15974_v12  ;;  %v16363_v12 = vld [vmem:[#allocation2 + $0x18f] sm:$0xff] }
 0x529   : > { %12284 = vmatprep.mubr.f32.mxu1 %v15978_v47  ;;  %13010 = vmatpush3.bf16.msra.mxu1 %v13007_v18  ;;  %v16366_v47 = vld [vmem:[#allocation2 + $0x197] sm:$0xff] }
 0x52a   : > { %13012 = vmatprep.subr.bf16.mxu1 %v13011_v2  ;;  %v16465_v18 = vld [vmem:[#allocation2 + $0xb0] sm:$0xff] }
 0x52c   : > { %12285 = vmatmul.mubr.f32.gmra.mrb[8].mxu1 %v15981_v59  ;;  %v10169_v59 = vld [vmem:[%s17028_s3 + $0x290] sm:$0xff] }
 0x52d   : > { %12287 = vmatprep.mubr.f32.mxu1 %v15984_v14  ;;  %13014 = vmatpush3.bf16.msra.mxu1 %v13011_v2  ;;  %v10170_v14 = vld [vmem:[%s17028_s3 + $0x298] sm:$0xff]  ;;  %v16474_v2 = vld [vmem:[#allocation2 + $0xc8] sm:$0xff] }
 0x52e   : > { %13016 = vmatprep.subr.bf16.mxu1 %v13015_v50 }
 0x530   : > { %12288 = vmatmul.mubr.f32.gmra.mrb[10].mxu1 %v15987_v6  ;;  %v7253_v6 = vld [vmem:[#allocation2 + $0x20] sm:$0xff] }
 0x531   : > { %12290 = vmatprep.mubr.f32.mxu1 %v15990_v1  ;;  %v13019_v1 = vpack.c.bf16 %v10170_v14, %v10169_v59  ;;  %v16486_v59 = vld [vmem:[#allocation2 + $0xe8] sm:$0xff]  ;;  %v16489_v14 = vld [vmem:[#allocation2 + $0xf0] sm:$0xff] }
 0x534   : > { %12291 = vmatmul.mubr.f32.gmra.mrb[12].mxu1 %v15993_v56  ;;  %v7254_v56 = vld [vmem:[#allocation2 + $0x28] sm:$0xff] }
 0x535   : > { %12293 = vmatprep.mubr.f32.mxu1 %v15996_v42  ;;  %v10171_v42 = vld [vmem:[%s17028_s3 + $0x2a0] sm:$0xff] }
 0x538   : > { %12294 = vmatmul.mubr.f32.gmra.mrb[14].mxu1 %v15999_v31  ;;  %v10172_v31 = vld [vmem:[%s17028_s3 + $0x2a8] sm:$0xff] }
 0x539   : > { %12296 = vmatprep.mubr.f32.mxu1 %v16002_v62  ;;  %v7255_v62 = vld [vmem:[#allocation2 + $0x30] sm:$0xff] }
 0x53c   : > { %12297 = vmatmul.mubr.f32.gmra.mrb[16].mxu1 %v16005_v60  ;;  %v13023_v60 = vpack.c.bf16 %v10172_v31, %v10171_v42  ;;  %v16501_v42 = vld [vmem:[#allocation2 + $0x110] sm:$0xff]  ;;  %v16504_v31 = vld [vmem:[#allocation2 + $0x118] sm:$0xff] }
 0x53d   : > { %12299 = vmatprep.mubr.f32.mxu1 %v16008_v39  ;;  %v16381_v39 = vld [vmem:[#allocation2 + $0x38] sm:$0xff] }
 0x540   : > { %12300 = vmatmul.mubr.f32.gmra.mrb[18].mxu1 %v16011_v29  ;;  %v10173_v29 = vld [vmem:[%s17028_s3 + $0x2b0] sm:$0xff] }
 0x541   : > { %12302 = vmatprep.mubr.f32.mxu1 %v16014_v26  ;;  %v10174_v26 = vld [vmem:[%s17028_s3 + $0x2b8] sm:$0xff] }
 0x544   : > { %12303 = vmatmul.mubr.f32.gmra.mrb[20].mxu1 %v16017_v3  ;;  %v16390_v3 = vld [vmem:[#allocation2 + $0x40] sm:$0xff] }
 0x545   : > { %12305 = vmatprep.mubr.f32.mxu1 %v16020_v58  ;;  %v13027_v58 = vpack.c.bf16 %v10174_v26, %v10173_v29  ;;  %v16513_v29 = vld [vmem:[#allocation2 + $0x130] sm:$0xff]  ;;  %v16516_v26 = vld [vmem:[#allocation2 + $0x138] sm:$0xff] }
 0x548   : > { %12306 = vmatmul.mubr.f32.gmra.mrb[22].mxu1 %v16023_v51  ;;  %v16393_v51 = vld [vmem:[#allocation2 + $0x48] sm:$0xff] }
 0x549   : > { %12308 = vmatprep.mubr.f32.mxu1 %v16026_v7  ;;  %v10175_v7 = vld [vmem:[%s17028_s3 + $0x2c0] sm:$0xff] }
 0x54c   : > { %12309 = vmatmul.mubr.f32.gmra.mrb[24].mxu1 %v16029_v23  ;;  %v10176_v23 = vld [vmem:[%s17028_s3 + $0x2c8] sm:$0xff] }
 0x54d   : > { %12311 = vmatprep.mubr.f32.mxu1 %v16032_v35  ;;  %v16402_v35 = vld [vmem:[#allocation2 + $0x50] sm:$0xff] }
 0x550   : > { %12312 = vmatmul.mubr.f32.gmra.mrb[26].mxu1 %v16035_v44  ;;  %v13031_v44 = vpack.c.bf16 %v10176_v23, %v10175_v7  ;;  %v16522_v7 = vld [vmem:[#allocation2 + $0x148] sm:$0xff]  ;;  %v16525_v23 = vld [vmem:[#allocation2 + $0x150] sm:$0xff] }
 0x551   : > { %12314 = vmatprep.mubr.f32.mxu1 %v16038_v17  ;;  %v16405_v17 = vld [vmem:[#allocation2 + $0x58] sm:$0xff] }
 0x554   : > { %12315 = vmatmul.mubr.f32.gmra.mrb[28].mxu1 %v16041_v53  ;;  %v10177_v53 = vld [vmem:[%s17028_s3 + $0x2d0] sm:$0xff] }
 0x555   : > { %12317 = vmatprep.mubr.f32.mxu1 %v16044_v34  ;;  %v10178_v34 = vld [vmem:[%s17028_s3 + $0x2d8] sm:$0xff] }
 0x558   : > { %12318 = vmatmul.mubr.f32.gmra.mrb[30].mxu1 %v16047_v0  ;;  %v16414_v0 = vld [vmem:[#allocation2 + $0x60] sm:$0xff] }
 0x559   : > { %12320 = vmatprep.mubr.f32.mxu1 %v16050_v41  ;;  %v13035_v41 = vpack.c.bf16 %v10178_v34, %v10177_v53  ;;  %v16531_v53 = vld [vmem:[#allocation2 + $0x160] sm:$0xff]  ;;  %v16534_v34 = vld [vmem:[#allocation2 + $0x168] sm:$0xff] }
 0x55c   : > { %12321 = vmatmul.mubr.f32.gmra.mrb[32].mxu1 %v16053_v38  ;;  %v16417_v38 = vld [vmem:[#allocation2 + $0x68] sm:$0xff] }
 0x55d   : > { %12323 = vmatprep.mubr.f32.mxu1 %v16056_v11  ;;  %v10179_v11 = vld [vmem:[%s17028_s3 + $0x2e0] sm:$0xff] }
 0x560   : > { %12324 = vmatmul.mubr.f32.gmra.mrb[34].mxu1 %v16059_v57  ;;  %v10180_v57 = vld [vmem:[%s17028_s3 + $0x2e8] sm:$0xff] }
 0x561   : > { %12326 = vmatprep.mubr.f32.mxu1 %v16062_v24  ;;  %v16426_v24 = vld [vmem:[#allocation2 + $0x70] sm:$0xff] }
 0x564   : > { %12327 = vmatmul.mubr.f32.gmra.mrb[36].mxu1 %v16065_v5  ;;  %v13039_v5 = vpack.c.bf16 %v10180_v57, %v10179_v11  ;;  %v16540_v11 = vld [vmem:[#allocation2 + $0x178] sm:$0xff]  ;;  %v16543_v57 = vld [vmem:[#allocation2 + $0x180] sm:$0xff] }
 0x565   : > { %12329 = vmatprep.mubr.f32.mxu1 %v16068_v27  ;;  %v16429_v27 = vld [vmem:[#allocation2 + $0x78] sm:$0xff]  ;;  %17328 = vst [vmem:[#allocation43_spill] sm:$0xff] %v16543_v57 }
 0x568   : > { %12330 = vmatmul.mubr.f32.gmra.mrb[38].mxu1 %v16360_v55 }
 0x569   : > { %12332 = vmatprep.mubr.f32.mxu1 %v16363_v12 }
 0x56c   : > { %12333 = vmatmul.mubr.f32.gmra.mrb[40].mxu1 %v16366_v47 }
 0x56d   : > { %12367 = vmatprep.mubr.f32.mxu1 %v7253_v6  ;;  %v16492_v6 = vld [vmem:[#allocation2 + $0xf8] sm:$0xff] }
 0x570   : > { %12368 = vmatmul.mubr.f32.vlgmr.msra.gmra.mrb[42].mxu1 %v7254_v56  ;;  %v16498_v56 = vld [vmem:[#allocation2 + $0x108] sm:$0xff] }
 0x571   : > { %13018 = vmatpush3.bf16.msra.mxu1 %v13015_v50  ;;  %12370 = vmatprep.mubr.f32.mxu1 %v7255_v62  ;;  %v16483_v50 = vld [vmem:[#allocation2 + $0xe0] sm:$0xff] }
 0x572   : > { %13020 = vmatprep.subr.bf16.mxu1 %v13019_v1  ;;  %v16507_v62 = vld [vmem:[#allocation2 + $0x120] sm:$0xff] }
 0x574   : > { %12371 = vmatmul.mubr.f32.gmra.mrb[44].mxu1 %v16381_v39 }
 0x575   : > { %12373 = vmatprep.mubr.f32.mxu1 %v16390_v3  ;;  %13022 = vmatpush3.bf16.msra.mxu1 %v13019_v1  ;;  %v16495_v1 = vld [vmem:[#allocation2 + $0x100] sm:$0xff] }
 0x576   : > { %13024 = vmatprep.subr.bf16.mxu1 %v13023_v60 }
 0x578   : > { %12374 = vmatmul.mubr.f32.gmra.mrb[46].mxu1 %v16393_v51 }
 0x579   : > { %12376 = vmatprep.mubr.f32.mxu1 %v16402_v35  ;;  %13026 = vmatpush3.bf16.msra.mxu1 %v13023_v60  ;;  %v16510_v60 = vld [vmem:[#allocation2 + $0x128] sm:$0xff] }
 0x57a   : > { %13028 = vmatprep.subr.bf16.mxu1 %v13027_v58 }
 0x57c   : > { %12377 = vmatmul.mubr.f32.gmra.mrb[0].mxu1 %v16405_v17 }
 0x57d   : > { %12379 = vmatprep.mubr.f32.mxu1 %v16414_v0  ;;  %13030 = vmatpush3.bf16.msra.mxu1 %v13027_v58  ;;  %v16519_v58 = vld [vmem:[#allocation2 + $0x140] sm:$0xff] }
 0x57e   : > { %13032 = vmatprep.subr.bf16.mxu1 %v13031_v44 }
 0x580   : > { %12380 = vmatmul.mubr.f32.gmra.mrb[2].mxu1 %v16417_v38 }
 0x581   : > { %12382 = vmatprep.mubr.f32.mxu1 %v16426_v24  ;;  %13034 = vmatpush3.bf16.msra.mxu1 %v13031_v44  ;;  %v16528_v44 = vld [vmem:[#allocation2 + $0x158] sm:$0xff] }
 0x582   : > { %13036 = vmatprep.subr.bf16.mxu1 %v13035_v41 }
 0x584   : > { %12383 = vmatmul.mubr.f32.gmra.mrb[4].mxu1 %v16429_v27 }
 0x585   : > { %12385 = vmatprep.mubr.f32.mxu1 %v16438_v4  ;;  %13038 = vmatpush3.bf16.msra.mxu1 %v13035_v41  ;;  %v16537_v41 = vld [vmem:[#allocation2 + $0x170] sm:$0xff] }
 0x586   : > { %13040 = vmatprep.subr.bf16.mxu1 %v13039_v5 }
 0x588   : > { %12386 = vmatmul.mubr.f32.gmra.mrb[6].mxu1 %v16441_v8 }
 0x589   : > { %12388 = vmatprep.mubr.f32.mxu1 %v16450_v37  ;;  %13042 = vmatpush3.bf16.msra.mxu1 %v13039_v5  ;;  %v16546_v5 = vld [vmem:[#allocation2 + $0x188] sm:$0xff] }
 0x58a   : > { %13044 = vmatprep.subr.bf16.mxu1 %v13043_v46  ;;  %17329 = vst [vmem:[#allocation44_spill] sm:$0xff] %v16546_v5 }
 0x58c   : > { %12389 = vmatmul.mubr.f32.gmra.mrb[8].mxu1 %v16455_v9 }
 0x58d   : > { %12391 = vmatprep.mubr.f32.mxu1 %v16458_v21  ;;  %13046 = vmatpush3.bf16.msra.mxu1 %v13043_v46  ;;  %v10185_v46 = vld [vmem:[%s17028_s3 + $0x310] sm:$0xff] }
 0x58e   : > { %13048 = vmatprep.subr.bf16.mxu1 %v16453_v22  ;;  %v13051_v43 = vpack.c.bf16 %v10186_v48, %v10185_v46  ;;  %v10190_v46 = vld [vmem:[%s17028_s3 + $0x338] sm:$0xff]  ;;  %v17332_v48 = vld [vmem:[#allocation7_spill] sm:$0xff] }
 0x590   : > { %12392 = vmatmul.mubr.f32.gmra.mrb[10].mxu1 %v16462_v28 }
 0x591   : > { %12394 = vmatprep.mubr.f32.mxu1 %v16465_v18 }
 0x594   : > { %12395 = vmatmul.mubr.f32.gmra.mrb[12].mxu1 %v16468_v45 }
 0x595   : > { %12397 = vmatprep.mubr.f32.mxu1 %v16471_v49 }
 0x598   : > { %12398 = vmatmul.mubr.f32.gmra.mrb[14].mxu1 %v16474_v2 }
 0x599   : > { %12400 = vmatprep.mubr.f32.mxu1 %v16477_v19 }
 0x59c   : > { %12401 = vmatmul.mubr.f32.gmra.mrb[16].mxu1 %v16480_v40 }
 0x59d   : > { %12403 = vmatprep.mubr.f32.mxu1 %v16483_v50 }
 0x5a0   : > { %12404 = vmatmul.mubr.f32.gmra.mrb[18].mxu1 %v16486_v59 }
 0x5a1   : > { %12406 = vmatprep.mubr.f32.mxu1 %v16489_v14 }
 0x5a4   : > { %12407 = vmatmul.mubr.f32.gmra.mrb[20].mxu1 %v16492_v6 }
 0x5a5   : > { %12409 = vmatprep.mubr.f32.mxu1 %v16495_v1 }
 0x5a8   : > { %12410 = vmatmul.mubr.f32.gmra.mrb[22].mxu1 %v16498_v56 }
 0x5a9   : > { %12412 = vmatprep.mubr.f32.mxu1 %v16501_v42 }
 0x5ac   : > { %12413 = vmatmul.mubr.f32.gmra.mrb[24].mxu1 %v16504_v31 }
 0x5ad   : > { %12415 = vmatprep.mubr.f32.mxu1 %v16507_v62 }
 0x5b0   : > { %12416 = vmatmul.mubr.f32.gmra.mrb[26].mxu1 %v16510_v60 }
 0x5b1   : > { %12418 = vmatprep.mubr.f32.mxu1 %v16513_v29 }
 0x5b4   : > { %12419 = vmatmul.mubr.f32.gmra.mrb[28].mxu1 %v16516_v26 }
 0x5b5   : > { %12421 = vmatprep.mubr.f32.mxu1 %v16519_v58 }
 0x5b8   : > { %12422 = vmatmul.mubr.f32.gmra.mrb[30].mxu1 %v16522_v7 }
 0x5b9   : > { %12424 = vmatprep.mubr.f32.mxu1 %v16525_v23 }
 0x5bc   : > { %12425 = vmatmul.mubr.f32.gmra.mrb[32].mxu1 %v16528_v44 }
 0x5bd   : > { %12427 = vmatprep.mubr.f32.mxu1 %v16531_v53 }
 0x5c0   : > { %12428 = vmatmul.mubr.f32.gmra.mrb[34].mxu1 %v16534_v34 }
 0x5c1   : > { %12430 = vmatprep.mubr.f32.mxu1 %v16537_v41 }
 0x5c4   : > { %12431 = vmatmul.mubr.f32.gmra.mrb[36].mxu1 %v16540_v11 }
 0x5c5   : > { %12433 = vmatprep.mubr.f32.mxu1 %v16543_v57 }
 0x5c8   : > { %12434 = vmatmul.mubr.f32.gmra.mrb[38].mxu1 %v16546_v5  ;;  %v10187_v5 = vld [vmem:[%s17028_s3 + $0x320] sm:$0xff] }
 0x5c9   : > { %12436 = vmatprep.mubr.f32.mxu1 %v16549_v63  ;;  %v10188_v63 = vld [vmem:[%s17028_s3 + $0x328] sm:$0xff] }
 0x5ca   : > { %v13055_v57 = vpack.c.bf16 %v10188_v63, %v10187_v5  ;;  %v10194_v5 = vld [vmem:[%s17028_s3 + $0x358] sm:$0xff] }
 0x5cb   : > { %v17331_v63 = vld [vmem:[#allocation6_spill] sm:$0xff] }
 0x5cc   : > { %12437 = vmatmul.mubr.f32.gmra.mrb[40].mxu1 %v16552_v15 }
 0x5cd   : > { %12471 = vmatprep.mubr.f32.mxu1 %v16084_v10  ;;  %v10189_v10 = vld [vmem:[%s17028_s3 + $0x330] sm:$0xff] }
 0x5d0   : > { %12472 = vmatmul.mubr.f32.vlgmr.msra.gmra.mrb[42].mxu1 %v16093_v25  ;;  %v13059_v25 = vpack.c.bf16 %v10190_v46, %v10189_v10  ;;  %v10197_v46 = vld [vmem:[%s17028_s3 + $0x370] sm:$0xff] }
 0x5d1   : > { %13050 = vmatpush3.bf16.msra.mxu1 %v16453_v22  ;;  %12474 = vmatprep.mubr.f32.mxu1 %v16096_v13  ;;  %v10191_v13 = vld [vmem:[%s17028_s3 + $0x340] sm:$0xff]  ;;  %v10192_v22 = vld [vmem:[%s17028_s3 + $0x348] sm:$0xff] }
 0x5d2   : > { %13052 = vmatprep.subr.bf16.mxu1 %v13051_v43 }
 0x5d4   : > { %12475 = vmatmul.mubr.f32.gmra.mrb[44].mxu1 %v16105_v52  ;;  %v13063_v52 = vpack.c.bf16 %v10192_v22, %v10191_v13  ;;  %v10200_v22 = vld [vmem:[%s17028_s3 + $0x388] sm:$0xff] }
 0x5d5   : > { %12477 = vmatprep.mubr.f32.mxu1 %v16108_v16  ;;  %13054 = vmatpush3.bf16.msra.mxu1 %v13051_v43  ;;  %v10193_v16 = vld [vmem:[%s17028_s3 + $0x350] sm:$0xff]  ;;  %v17333_v43 = vld [vmem:[#allocation8_spill] sm:$0xff] }
 0x5d6   : > { %13056 = vmatprep.subr.bf16.mxu1 %v13055_v57 }
 0x5d8   : > { %12478 = vmatmul.mubr.f32.gmra.mrb[46].mxu1 %v16117_v20  ;;  %v13067_v20 = vpack.c.bf16 %v10194_v5, %v10193_v16  ;;  %v17335_v16 = vld [vmem:[#allocation14_spill] sm:$0xff]  ;;  %v17337_v5 = vld [vmem:[#allocation16_spill] sm:$0xff] }
 0x5d9   : > { %12480 = vmatprep.mubr.f32.mxu1 %v16120_v33  ;;  %13058 = vmatpush3.bf16.msra.mxu1 %v13055_v57  ;;  %v10195_v33 = vld [vmem:[%s17028_s3 + $0x360] sm:$0xff]  ;;  %v10196_v57 = vld [vmem:[%s17028_s3 + $0x368] sm:$0xff] }
 0x5da   : > { %13060 = vmatprep.subr.bf16.mxu1 %v13059_v25  ;;  %v13071_v10 = vpack.c.bf16 %v10196_v57, %v10195_v33  ;;  %v17342_v33 = vld [vmem:[#allocation21_spill] sm:$0xff]  ;;  %v17343_v57 = vld [vmem:[#allocation22_spill] sm:$0xff] }
 0x5dc   : > { %12481 = vmatmul.mubr.f32.gmra.mrb[0].mxu1 %v17331_v63  ;;  %v17338_v63 = vld [vmem:[#allocation17_spill] sm:$0xff] }
 0x5dd   : > { %12483 = vmatprep.mubr.f32.mxu1 %v17332_v48  ;;  %13062 = vmatpush3.bf16.msra.mxu1 %v13059_v25  ;;  %v10198_v25 = vld [vmem:[%s17028_s3 + $0x378] sm:$0xff] }
 0x5de   : > { %13064 = vmatprep.subr.bf16.mxu1 %v13063_v52  ;;  %v13075_v13 = vpack.c.bf16 %v10198_v25, %v10197_v46  ;;  %v17339_v48 = vld [vmem:[#allocation18_spill] sm:$0xff]  ;;  %v17346_v46 = vld [vmem:[#allocation25_spill] sm:$0xff] }
 0x5df   : > { %v17347_v25 = vld [vmem:[#allocation26_spill] sm:$0xff] }
 0x5e0   : > { %12484 = vmatmul.mubr.f32.gmra.mrb[2].mxu1 %v17333_v43  ;;  %v17344_v43 = vld [vmem:[#allocation23_spill] sm:$0xff] }
 0x5e1   : > { %12486 = vmatprep.mubr.f32.mxu1 %v16146_v61  ;;  %13066 = vmatpush3.bf16.msra.mxu1 %v13063_v52  ;;  %v10199_v61 = vld [vmem:[%s17028_s3 + $0x380] sm:$0xff]  ;;  %v17334_v52 = vld [vmem:[#allocation13_spill] sm:$0xff] }
 0x5e2   : > { %13068 = vmatprep.subr.bf16.mxu1 %v13067_v20 }
 0x5e4   : > { %12487 = vmatmul.mubr.f32.gmra.mrb[4].mxu1 %v16157_v30  ;;  %v13079_v30 = vpack.c.bf16 %v10200_v22, %v10199_v61  ;;  %v17349_v61 = vld [vmem:[#allocation28_spill] sm:$0xff]  ;;  %v17350_v22 = vld [vmem:[#allocation29_spill] sm:$0xff] }
 0x5e5   : > { %12489 = vmatprep.mubr.f32.mxu1 %v16164_v54  ;;  %13070 = vmatpush3.bf16.msra.mxu1 %v13067_v20  ;;  %v17336_v54 = vld [vmem:[#allocation15_spill] sm:$0xff] }
 0x5e6   : > { %13072 = vmatprep.subr.bf16.mxu1 %v13071_v10  ;;  %v17340_v20 = vld [vmem:[#allocation19_spill] sm:$0xff] }
 0x5e8   : > { %12490 = vmatmul.mubr.f32.gmra.mrb[6].mxu1 %v16169_v32  ;;  %v17341_v32 = vld [vmem:[#allocation20_spill] sm:$0xff] }
 0x5e9   : > { %12492 = vmatprep.mubr.f32.mxu1 %v17334_v52  ;;  %13074 = vmatpush3.bf16.msra.mxu1 %v13071_v10  ;;  %v17345_v10 = vld [vmem:[#allocation24_spill] sm:$0xff]  ;;  %v17351_v52 = vld [vmem:[#allocation30_spill] sm:$0xff] }
 0x5ea   : > { %13076 = vmatprep.subr.bf16.mxu1 %v13075_v13 }
 0x5ec   : > { %12493 = vmatmul.mubr.f32.gmra.mrb[8].mxu1 %v17335_v16  ;;  %v17352_v16 = vld [vmem:[#allocation31_spill] sm:$0xff] }
 0x5ed   : > { %12495 = vmatprep.mubr.f32.mxu1 %v17336_v54  ;;  %13078 = vmatpush3.bf16.msra.mxu1 %v13075_v13  ;;  %v17348_v13 = vld [vmem:[#allocation27_spill] sm:$0xff]  ;;  %v17353_v54 = vld [vmem:[#allocation32_spill] sm:$0xff] }
 0x5ee   : > { %13080 = vmatprep.subr.bf16.mxu1 %v13079_v30 }
 0x5f0   : > { %12496 = vmatmul.mubr.f32.gmra.mrb[10].mxu1 %v17337_v5  ;;  %v17354_v5 = vld [vmem:[#allocation33_spill] sm:$0xff] }
 0x5f1   : > { %12498 = vmatprep.mubr.f32.mxu1 %v17338_v63  ;;  %v17355_v63 = vld [vmem:[#allocation34_spill] sm:$0xff] }
 0x5f4   : > { %12499 = vmatmul.mubr.f32.gmra.mrb[12].mxu1 %v17339_v48  ;;  %v17356_v48 = vld [vmem:[#allocation35_spill] sm:$0xff] }
 0x5f5   : > { %12501 = vmatprep.mubr.f32.mxu1 %v17340_v20  ;;  %v17357_v20 = vld [vmem:[#allocation36_spill] sm:$0xff] }
 0x5f8   : > { %12502 = vmatmul.mubr.f32.gmra.mrb[14].mxu1 %v17341_v32  ;;  %v17358_v32 = vld [vmem:[#allocation37_spill] sm:$0xff] }
 0x5f9   : > { %12504 = vmatprep.mubr.f32.mxu1 %v17342_v33  ;;  %v17359_v33 = vld [vmem:[#allocation38_spill] sm:$0xff] }
 0x5fc   : > { %12505 = vmatmul.mubr.f32.gmra.mrb[16].mxu1 %v17343_v57  ;;  %v17360_v57 = vld [vmem:[#allocation39_spill] sm:$0xff] }
 0x5fd   : > { %12507 = vmatprep.mubr.f32.mxu1 %v17344_v43  ;;  %v17361_v43 = vld [vmem:[#allocation40_spill] sm:$0xff] }
 0x600   : > { %12508 = vmatmul.mubr.f32.gmra.mrb[18].mxu1 %v17345_v10  ;;  %v17362_v10 = vld [vmem:[#allocation41_spill] sm:$0xff] }
 0x601   : > { %12510 = vmatprep.mubr.f32.mxu1 %v17346_v46  ;;  %v17363_v46 = vld [vmem:[#allocation42_spill] sm:$0xff] }
 0x604   : > { %12511 = vmatmul.mubr.f32.gmra.mrb[20].mxu1 %v17347_v25  ;;  %v16649_v25 = vld [vmem:[#allocation2 + $0x189] sm:$0xff] }
 0x605   : > { %12513 = vmatprep.mubr.f32.mxu1 %v17348_v13  ;;  %v16652_v13 = vld [vmem:[#allocation2 + $0x191] sm:$0xff] }
 0x608   : > { %12514 = vmatmul.mubr.f32.gmra.mrb[22].mxu1 %v17349_v61  ;;  %v16655_v61 = vld [vmem:[#allocation2 + $0x199] sm:$0xff] }
 0x609   : > { %12516 = vmatprep.mubr.f32.mxu1 %v17350_v22  ;;  %v10201_v22 = vld [vmem:[%s17028_s3 + $0x390] sm:$0xff] }
 0x60c   : > { %12517 = vmatmul.mubr.f32.gmra.mrb[24].mxu1 %v17351_v52  ;;  %v10202_v52 = vld [vmem:[%s17028_s3 + $0x398] sm:$0xff] }
 0x60d   : > { %12519 = vmatprep.mubr.f32.mxu1 %v17352_v16  ;;  %v13083_v16 = vpack.c.bf16 %v10202_v52, %v10201_v22  ;;  %v10208_v22 = vld [vmem:[%s17028_s3 + $0x3c8] sm:$0xff] }
 0x60e   : > { %v8095_v52 = vld [vmem:[#allocation2 + $0x67] sm:$0xff] }
 0x610   : > { %12520 = vmatmul.mubr.f32.gmra.mrb[26].mxu1 %v17353_v54  ;;  %v8090_v54 = vld [vmem:[#allocation2 + $0x3f] sm:$0xff] }
 0x611   : > { %12522 = vmatprep.mubr.f32.mxu1 %v17354_v5  ;;  %v10203_v5 = vld [vmem:[%s17028_s3 + $0x3a0] sm:$0xff] }
 0x614   : > { %12523 = vmatmul.mubr.f32.gmra.mrb[28].mxu1 %v17355_v63  ;;  %v10204_v63 = vld [vmem:[%s17028_s3 + $0x3a8] sm:$0xff] }
 0x615   : > { %12525 = vmatprep.mubr.f32.mxu1 %v17356_v48  ;;  %v8091_v48 = vld [vmem:[#allocation2 + $0x47] sm:$0xff] }
 0x618   : > { %12526 = vmatmul.mubr.f32.gmra.mrb[30].mxu1 %v17357_v20  ;;  %v13087_v20 = vpack.c.bf16 %v10204_v63, %v10203_v5  ;;  %v10210_v5 = vld [vmem:[%s17028_s3 + $0x3d8] sm:$0xff] }
 0x619   : > { %12528 = vmatprep.mubr.f32.mxu1 %v17358_v32  ;;  %v8092_v32 = vld [vmem:[#allocation2 + $0x4f] sm:$0xff]  ;;  %v8097_v63 = vld [vmem:[#allocation2 + $0x77] sm:$0xff] }
 0x61c   : > { %12529 = vmatmul.mubr.f32.gmra.mrb[32].mxu1 %v17359_v33  ;;  %v10205_v33 = vld [vmem:[%s17028_s3 + $0x3b0] sm:$0xff] }
 0x61d   : > { %12531 = vmatprep.mubr.f32.mxu1 %v17360_v57  ;;  %v10206_v57 = vld [vmem:[%s17028_s3 + $0x3b8] sm:$0xff] }
 0x620   : > { %12532 = vmatmul.mubr.f32.gmra.mrb[34].mxu1 %v17361_v43  ;;  %v8093_v43 = vld [vmem:[#allocation2 + $0x57] sm:$0xff] }
 0x621   : > { %12534 = vmatprep.mubr.f32.mxu1 %v17362_v10  ;;  %v13091_v10 = vpack.c.bf16 %v10206_v57, %v10205_v33  ;;  %v10212_v33 = vld [vmem:[%s17028_s3 + $0x3e8] sm:$0xff] }
 0x622   : > { %v8099_v57 = vld [vmem:[#allocation2 + $0x87] sm:$0xff] }
 0x624   : > { %12535 = vmatmul.mubr.f32.gmra.mrb[36].mxu1 %v17363_v46  ;;  %v8094_v46 = vld [vmem:[#allocation2 + $0x5f] sm:$0xff] }
 0x625   : > { %12537 = vmatprep.mubr.f32.mxu1 %v16263_v36  ;;  %v8089_v36 = vld [vmem:[#allocation2 + $0x37] sm:$0xff] }
 0x628   : > { %12538 = vmatmul.mubr.f32.gmra.mrb[38].mxu1 %v16649_v25 }
 0x629   : > { %12540 = vmatprep.mubr.f32.mxu1 %v16652_v13 }
 0x62c   : > { %12541 = vmatmul.mubr.f32.gmra.mrb[40].mxu1 %v16655_v61 }
 0x62d   : > { %12575 = vmatprep.mubr.f32.mxu1 %v8089_v36 }
 0x630   : > { %12576 = vmatmul.mubr.f32.vlgmr.msra.gmra.mrb[42].mxu1 %v8090_v54  ;;  %v8096_v54 = vld [vmem:[#allocation2 + $0x6f] sm:$0xff] }
 0x631   : > { %13082 = vmatpush3.bf16.msra.mxu1 %v13079_v30  ;;  %12578 = vmatprep.mubr.f32.mxu1 %v8091_v48  ;;  %v10207_v30 = vld [vmem:[%s17028_s3 + $0x3c0] sm:$0xff] }
 0x632   : > { %13084 = vmatprep.subr.bf16.mxu1 %v13083_v16  ;;  %v13095_v36 = vpack.c.bf16 %v10208_v22, %v10207_v30  ;;  %v10214_v30 = vld [vmem:[%s17028_s3 + $0x3f8] sm:$0xff] }
 0x633   : > { %v8101_v22 = vld [vmem:[#allocation2 + $0x97] sm:$0xff] }
 0x634   : > { %12579 = vmatmul.mubr.f32.gmra.mrb[44].mxu1 %v8092_v32  ;;  %v8098_v32 = vld [vmem:[#allocation2 + $0x7f] sm:$0xff] }
 0x635   : > { %12581 = vmatprep.mubr.f32.mxu1 %v8093_v43  ;;  %13086 = vmatpush3.bf16.msra.mxu1 %v13083_v16  ;;  %v10209_v16 = vld [vmem:[%s17028_s3 + $0x3d0] sm:$0xff] }
 0x636   : > { %13088 = vmatprep.subr.bf16.mxu1 %v13087_v20  ;;  %v13099_v48 = vpack.c.bf16 %v10210_v5, %v10209_v16  ;;  %v10216_v16 = vld [vmem:[%s17028_s3 + $0x408] sm:$0xff] }
 0x637   : > { %v8103_v5 = vld [vmem:[#allocation2 + $0xa7] sm:$0xff] }
 0x638   : > { %12582 = vmatmul.mubr.f32.gmra.mrb[46].mxu1 %v8094_v46  ;;  %v8100_v46 = vld [vmem:[#allocation2 + $0x8f] sm:$0xff] }
 0x639   : > { %12584 = vmatprep.mubr.f32.mxu1 %v8095_v52  ;;  %13090 = vmatpush3.bf16.msra.mxu1 %v13087_v20  ;;  %v10211_v20 = vld [vmem:[%s17028_s3 + $0x3e0] sm:$0xff] }
 0x63a   : > { %13092 = vmatprep.subr.bf16.mxu1 %v13091_v10  ;;  %v13103_v43 = vpack.c.bf16 %v10212_v33, %v10211_v20  ;;  %v8106_v20 = vld [vmem:[#allocation2 + $0xbf] sm:$0xff]  ;;  %v8107_v33 = vld [vmem:[#allocation2 + $0xc7] sm:$0xff] }
 0x63c   : > { %12585 = vmatmul.mubr.f32.gmra.mrb[0].mxu1 %v8096_v54  ;;  %v8102_v54 = vld [vmem:[#allocation2 + $0x9f] sm:$0xff] }
 0x63d   : > { %12587 = vmatprep.mubr.f32.mxu1 %v8097_v63  ;;  %13094 = vmatpush3.bf16.msra.mxu1 %v13091_v10  ;;  %v10213_v10 = vld [vmem:[%s17028_s3 + $0x3f0] sm:$0xff] }
 0x63e   : > { %13096 = vmatprep.subr.bf16.mxu1 %v13095_v36  ;;  %v13107_v52 = vpack.c.bf16 %v10214_v30, %v10213_v10  ;;  %v8110_v10 = vld [vmem:[#allocation2 + $0xdf] sm:$0xff]  ;;  %v8112_v30 = vld [vmem:[#allocation2 + $0xef] sm:$0xff] }
 0x640   : > { %12588 = vmatmul.mubr.f32.gmra.mrb[2].mxu1 %v8098_v32  ;;  %v8104_v32 = vld [vmem:[#allocation2 + $0xaf] sm:$0xff] }
 0x641   : > { %12590 = vmatprep.mubr.f32.mxu1 %v8099_v57  ;;  %13098 = vmatpush3.bf16.msra.mxu1 %v13095_v36  ;;  %v10215_v36 = vld [vmem:[%s17028_s3 + $0x400] sm:$0xff]  ;;  %v8108_v57 = vld [vmem:[#allocation2 + $0xcf] sm:$0xff] }
 0x642   : > { %13100 = vmatprep.subr.bf16.mxu1 %v13099_v48  ;;  %v16706_v63 = vpack.c.bf16 %v10216_v16, %v10215_v36  ;;  %v8116_v36 = vld [vmem:[#allocation2 + $0x10f] sm:$0xff]  ;;  %v8117_v16 = vld [vmem:[#allocation2 + $0x117] sm:$0xff] }
 0x644   : > { %12591 = vmatmul.mubr.f32.gmra.mrb[4].mxu1 %v8100_v46  ;;  %v8109_v46 = vld [vmem:[#allocation2 + $0xd7] sm:$0xff] }
 0x645   : > { %12593 = vmatprep.mubr.f32.mxu1 %v8101_v22  ;;  %13102 = vmatpush3.bf16.msra.mxu1 %v13099_v48  ;;  %v8105_v48 = vld [vmem:[#allocation2 + $0xb7] sm:$0xff] }
 0x646   : > { %13104 = vmatprep.subr.bf16.mxu1 %v13103_v43  ;;  %v8113_v22 = vld [vmem:[#allocation2 + $0xf7] sm:$0xff] }
 0x648   : > { %12594 = vmatmul.mubr.f32.gmra.mrb[6].mxu1 %v8102_v54  ;;  %v8114_v54 = vld [vmem:[#allocation2 + $0xff] sm:$0xff] }
 0x649   : > { %12596 = vmatprep.mubr.f32.mxu1 %v8103_v5  ;;  %13106 = vmatpush3.bf16.msra.mxu1 %v13103_v43  ;;  %v8111_v43 = vld [vmem:[#allocation2 + $0xe7] sm:$0xff]  ;;  %v8118_v5 = vld [vmem:[#allocation2 + $0x11f] sm:$0xff] }
 0x64a   : > { %13108 = vmatprep.subr.bf16.mxu1 %v13107_v52 }
 0x64c   : > { %12597 = vmatmul.mubr.f32.gmra.mrb[8].mxu1 %v8104_v32  ;;  %v8119_v32 = vld [vmem:[#allocation2 + $0x127] sm:$0xff] }
 0x64d   : > { %12599 = vmatprep.mubr.f32.mxu1 %v8105_v48  ;;  %13110 = vmatpush3.bf16.msra.mxu1 %v13107_v52  ;;  %v8115_v52 = vld [vmem:[#allocation2 + $0x107] sm:$0xff]  ;;  %v8120_v48 = vld [vmem:[#allocation2 + $0x12f] sm:$0xff] }
 0x64e   : > { %13112 = vmatprep.subr.bf16.mxu1 %v16706_v63 }
 0x650   : > { %12600 = vmatmul.mubr.f32.gmra.mrb[10].mxu1 %v8106_v20  ;;  %v8121_v20 = vld [vmem:[#allocation2 + $0x137] sm:$0xff] }
 0x651   : > { %12602 = vmatprep.mubr.f32.mxu1 %v8107_v33  ;;  %v8122_v33 = vld [vmem:[#allocation2 + $0x13f] sm:$0xff] }
 0x654   : > { %12603 = vmatmul.mubr.f32.gmra.mrb[12].mxu1 %v8108_v57  ;;  %v8123_v57 = vld [vmem:[#allocation2 + $0x147] sm:$0xff] }
 0x655   : > { %12605 = vmatprep.mubr.f32.mxu1 %v8109_v46  ;;  %v8124_v46 = vld [vmem:[#allocation2 + $0x14f] sm:$0xff] }
 0x658   : > { %12606 = vmatmul.mubr.f32.gmra.mrb[14].mxu1 %v8110_v10  ;;  %v8125_v10 = vld [vmem:[#allocation2 + $0x157] sm:$0xff] }
 0x659   : > { %12608 = vmatprep.mubr.f32.mxu1 %v8111_v43  ;;  %v8126_v43 = vld [vmem:[#allocation2 + $0x15f] sm:$0xff] }
 0x65c   : > { %12609 = vmatmul.mubr.f32.gmra.mrb[16].mxu1 %v8112_v30  ;;  %v8127_v30 = vld [vmem:[#allocation2 + $0x167] sm:$0xff] }
 0x65d   : > { %12611 = vmatprep.mubr.f32.mxu1 %v8113_v22  ;;  %v8128_v22 = vld [vmem:[#allocation2 + $0x16f] sm:$0xff] }
 0x660   : > { %12612 = vmatmul.mubr.f32.gmra.mrb[18].mxu1 %v8114_v54  ;;  %v8129_v54 = vld [vmem:[#allocation2 + $0x177] sm:$0xff] }
 0x661   : > { %12614 = vmatprep.mubr.f32.mxu1 %v8115_v52  ;;  %v8130_v52 = vld [vmem:[#allocation2 + $0x17f] sm:$0xff] }
 0x664   : > { %12615 = vmatmul.mubr.f32.gmra.mrb[20].mxu1 %v8116_v36  ;;  %v8135_v36 = vld [vmem:[#allocation2 + $0x1a7] sm:$0xff] }
 0x665   : > { %12617 = vmatprep.mubr.f32.mxu1 %v8117_v16  ;;  %v8134_v16 = vld [vmem:[#allocation2 + $0x19f] sm:$0xff] }
 0x668   : > { %12618 = vmatmul.mubr.f32.gmra.mrb[22].mxu1 %v8118_v5  ;;  %v8136_v5 = vld [vmem:[#allocation2 + $0x1af] sm:$0xff] }
 0x669   : > { %12620 = vmatprep.mubr.f32.mxu1 %v8119_v32  ;;  %v10217_v32 = vld [vmem:[%s17028_s3 + $0x410] sm:$0xff] }
 0x66c   : > { %12621 = vmatmul.mubr.f32.gmra.mrb[24].mxu1 %v8120_v48  ;;  %v10218_v48 = vld [vmem:[%s17028_s3 + $0x418] sm:$0xff] }
 0x66d   : > { %12623 = vmatprep.mubr.f32.mxu1 %v8121_v20 }
 0x670   : > { %12624 = vmatmul.mubr.f32.gmra.mrb[26].mxu1 %v8122_v33  ;;  %v10222_v33 = vld [vmem:[%s17028_s3 + $0x438] sm:$0xff] }
 0x671   : > { %12626 = vmatprep.mubr.f32.mxu1 %v8123_v57  ;;  %v10226_v57 = vld [vmem:[%s17028_s3 + $0x458] sm:$0xff] }
 0x674   : > { %12627 = vmatmul.mubr.f32.gmra.mrb[28].mxu1 %v8124_v46  ;;  %v10228_v46 = vld [vmem:[%s17028_s3 + $0x468] sm:$0xff] }
 0x675   : > { %12629 = vmatprep.mubr.f32.mxu1 %v8125_v10  ;;  %v10230_v10 = vld [vmem:[%s17028_s3 + $0x478] sm:$0xff] }
 0x678   : > { %12630 = vmatmul.mubr.f32.gmra.mrb[30].mxu1 %v8126_v43  ;;  %v8953_v43 = vld [vmem:[#allocation2 + $0x119] sm:$0xff] }
 0x679   : > { %12632 = vmatprep.mubr.f32.mxu1 %v8127_v30  ;;  %v8954_v30 = vld [vmem:[#allocation2 + $0x121] sm:$0xff] }
 0x67c   : > { %12633 = vmatmul.mubr.f32.gmra.mrb[32].mxu1 %v8128_v22  ;;  %v8955_v22 = vld [vmem:[#allocation2 + $0x129] sm:$0xff] }
 0x67d   : > { %12635 = vmatprep.mubr.f32.mxu1 %v8129_v54  ;;  %v8956_v54 = vld [vmem:[#allocation2 + $0x131] sm:$0xff] }
 0x680   : > { %12636 = vmatmul.mubr.f32.gmra.mrb[34].mxu1 %v8130_v52  ;;  %v8957_v52 = vld [vmem:[#allocation2 + $0x139] sm:$0xff] }
 0x681   : > { %12638 = vmatprep.mubr.f32.mxu1 %v16360_v55  ;;  %v13115_v55 = vpack.c.bf16 %v10218_v48, %v10217_v32  ;;  %v8961_v32 = vld [vmem:[#allocation2 + $0x159] sm:$0xff]  ;;  %v8962_v48 = vld [vmem:[#allocation2 + $0x161] sm:$0xff] }
 0x684   : > { %12639 = vmatmul.mubr.f32.gmra.mrb[36].mxu1 %v16363_v12  ;;  %v10219_v12 = vld [vmem:[%s17028_s3 + $0x420] sm:$0xff] }
 0x685   : > { %12641 = vmatprep.mubr.f32.mxu1 %v16366_v47  ;;  %v10220_v47 = vld [vmem:[%s17028_s3 + $0x428] sm:$0xff] }
 0x686   : > { %v13119_v20 = vpack.c.bf16 %v10220_v47, %v10219_v12  ;;  %v8964_v12 = vld [vmem:[#allocation2 + $0x171] sm:$0xff]  ;;  %v8965_v47 = vld [vmem:[#allocation2 + $0x179] sm:$0xff] }
 0x688   : > { %12642 = vmatmul.mubr.f32.gmra.mrb[38].mxu1 %v8134_v16  ;;  %v8959_v16 = vld [vmem:[#allocation2 + $0x149] sm:$0xff] }
 0x689   : > { %12644 = vmatprep.mubr.f32.mxu1 %v8135_v36  ;;  %v8958_v36 = vld [vmem:[#allocation2 + $0x141] sm:$0xff] }
 0x68c   : > { %12645 = vmatmul.mubr.f32.gmra.mrb[40].mxu1 %v8136_v5  ;;  %v8960_v5 = vld [vmem:[#allocation2 + $0x151] sm:$0xff] }
 0x68d   : > { %12679 = vmatprep.mubr.f32.mxu1 %v16381_v39  ;;  %v10221_v39 = vld [vmem:[%s17028_s3 + $0x430] sm:$0xff] }
 0x690   : > { %12680 = vmatmul.mubr.f32.vlgmr.msra.gmra.mrb[42].mxu1 %v16390_v3  ;;  %v13123_v3 = vpack.c.bf16 %v10222_v33, %v10221_v39  ;;  %v8970_v39 = vld [vmem:[#allocation2 + $0x1a1] sm:$0xff]  ;;  %v8971_v33 = vld [vmem:[#allocation2 + $0x1a9] sm:$0xff] }
 0x691   : > { %13114 = vmatpush3.bf16.msra.mxu1 %v16706_v63  ;;  %12682 = vmatprep.mubr.f32.mxu1 %v16393_v51  ;;  %v10223_v51 = vld [vmem:[%s17028_s3 + $0x440] sm:$0xff]  ;;  %v10224_v63 = vld [vmem:[%s17028_s3 + $0x448] sm:$0xff] }
 0x692   : > { %13116 = vmatprep.subr.bf16.mxu1 %v13115_v55 }
 0x694   : > { %12683 = vmatmul.mubr.f32.gmra.mrb[44].mxu1 %v16402_v35  ;;  %v13127_v35 = vpack.c.bf16 %v10224_v63, %v10223_v51  ;;  %v16806_v63 = vld [vmem:[%s17029_s4] ss:$0 sm:$0xff] }
 0x695   : > { %12685 = vmatprep.mubr.f32.mxu1 %v16405_v17  ;;  %13118 = vmatpush3.bf16.msra.mxu1 %v13115_v55  ;;  %v10225_v17 = vld [vmem:[%s17028_s3 + $0x450] sm:$0xff] }
 0x696   : > { %13120 = vmatprep.subr.bf16.mxu1 %v13119_v20  ;;  %v8963_v55 = vld [vmem:[#allocation2 + $0x169] sm:$0xff] }
 0x698   : > { %12686 = vmatmul.mubr.f32.gmra.mrb[46].mxu1 %v16414_v0  ;;  %v13131_v0 = vpack.c.bf16 %v10226_v57, %v10225_v17 }
 0x699   : > { %12688 = vmatprep.mubr.f32.mxu1 %v16417_v38  ;;  %13122 = vmatpush3.bf16.msra.mxu1 %v13119_v20  ;;  %v10227_v38 = vld [vmem:[%s17028_s3 + $0x460] sm:$0xff] }
 0x69a   : > { %13124 = vmatprep.subr.bf16.mxu1 %v13123_v3  ;;  %v8966_v20 = vld [vmem:[#allocation2 + $0x181] sm:$0xff] }
 0x69c   : > { %12689 = vmatmul.mubr.f32.gmra.mrb[0].mxu1 %v16426_v24  ;;  %v13135_v24 = vpack.c.bf16 %v10228_v46, %v10227_v38 }
 0x69d   : > { %12691 = vmatprep.mubr.f32.mxu1 %v16429_v27  ;;  %13126 = vmatpush3.bf16.msra.mxu1 %v13123_v3  ;;  %v10229_v27 = vld [vmem:[%s17028_s3 + $0x470] sm:$0xff] }
 0x69e   : > { %13128 = vmatprep.subr.bf16.mxu1 %v13127_v35  ;;  %v8972_v3 = vld [vmem:[#allocation2 + $0x1b1] sm:$0xff] }
 0x6a0   : > { %12692 = vmatmul.mubr.f32.gmra.mrb[2].mxu1 %v16438_v4  ;;  %v13139_v4 = vpack.c.bf16 %v10230_v10, %v10229_v27  ;;  %v17369_v27 = vld [vmem:[#allocation9_spill] sm:$0xff] }
 0x6a1   : > { %12694 = vmatprep.mubr.f32.mxu1 %v16441_v8  ;;  %13130 = vmatpush3.bf16.msra.mxu1 %v13127_v35  ;;  %v17364_v8 = vld [vmem:[#allocation43_spill] sm:$0xff]  ;;  %v17367_v35 = vld [vmem:[#allocation4_spill] sm:$0xff] }
 0x6a2   : > { %13132 = vmatprep.subr.bf16.mxu1 %v13131_v0 }
 0x6a4   : > { %12695 = vmatmul.mubr.f32.gmra.mrb[4].mxu1 %v16450_v37  ;;  %v17365_v37 = vld [vmem:[#allocation44_spill] sm:$0xff] }
 0x6a5   : > { %12697 = vmatprep.mubr.f32.mxu1 %v16455_v9  ;;  %13134 = vmatpush3.bf16.msra.mxu1 %v13131_v0  ;;  %v17366_v9 = vld [vmem:[#allocation45_spill] sm:$0xff] }
 0x6a6   : > { %13136 = vmatprep.subr.bf16.mxu1 %v13135_v24 }
 0x6a8   : > { %12698 = vmatmul.mubr.f32.gmra.mrb[6].mxu1 %v16458_v21  ;;  %v13941_v21 = vld [vmem:[#allocation2 + $0x8] sm:$0xff] }
 0x6a9   : > { %12700 = vmatprep.mubr.f32.mxu1 %v16462_v28  ;;  %13138 = vmatpush3.bf16.msra.mxu1 %v13135_v24  ;;  %v8925_v28 = vld [vmem:[#allocation2 + $0x39] sm:$0xff] }
 0x6aa   : > { %13140 = vmatprep.subr.bf16.mxu1 %v13139_v4 }
 0x6ac   : > { %12701 = vmatmul.mubr.f32.gmra.mrb[8].mxu1 %v16465_v18  ;;  %v8926_v18 = vld [vmem:[#allocation2 + $0x41] sm:$0xff] }
 0x6ad   : > { %12703 = vmatprep.mubr.f32.mxu1 %v16468_v45  ;;  %13142 = vmatpush3.bf16.msra.mxu1 %v13139_v4  ;;  %v8927_v45 = vld [vmem:[#allocation2 + $0x49] sm:$0xff] }
 0x6b0   : > { %12704 = vmatmul.mubr.f32.gmra.mrb[10].mxu1 %v16471_v49  ;;  %v8928_v49 = vld [vmem:[#allocation2 + $0x51] sm:$0xff] }
 0x6b1   : > { %12706 = vmatprep.mubr.f32.mxu1 %v16474_v2  ;;  %v8929_v2 = vld [vmem:[#allocation2 + $0x59] sm:$0xff] }
 0x6b4   : > { %12707 = vmatmul.mubr.f32.gmra.mrb[12].mxu1 %v16477_v19  ;;  %v8930_v19 = vld [vmem:[#allocation2 + $0x61] sm:$0xff] }
 0x6b5   : > { %12709 = vmatprep.mubr.f32.mxu1 %v16480_v40  ;;  %v8931_v40 = vld [vmem:[#allocation2 + $0x69] sm:$0xff] }
 0x6b8   : > { %12710 = vmatmul.mubr.f32.gmra.mrb[14].mxu1 %v16483_v50  ;;  %v8932_v50 = vld [vmem:[#allocation2 + $0x71] sm:$0xff] }
 0x6b9   : > { %12712 = vmatprep.mubr.f32.mxu1 %v16486_v59  ;;  %v8933_v59 = vld [vmem:[#allocation2 + $0x79] sm:$0xff] }
 0x6bc   : > { %12713 = vmatmul.mubr.f32.gmra.mrb[16].mxu1 %v16489_v14  ;;  %v8934_v14 = vld [vmem:[#allocation2 + $0x81] sm:$0xff] }
 0x6bd   : > { %12715 = vmatprep.mubr.f32.mxu1 %v16492_v6  ;;  %v8935_v6 = vld [vmem:[#allocation2 + $0x89] sm:$0xff] }
 0x6c0   : > { %12716 = vmatmul.mubr.f32.gmra.mrb[18].mxu1 %v16495_v1  ;;  %v8936_v1 = vld [vmem:[#allocation2 + $0x91] sm:$0xff] }
 0x6c1   : > { %12718 = vmatprep.mubr.f32.mxu1 %v16498_v56  ;;  %v8937_v56 = vld [vmem:[#allocation2 + $0x99] sm:$0xff] }
 0x6c4   : > { %12719 = vmatmul.mubr.f32.gmra.mrb[20].mxu1 %v16501_v42  ;;  %v8938_v42 = vld [vmem:[#allocation2 + $0xa1] sm:$0xff] }
 0x6c5   : > { %12721 = vmatprep.mubr.f32.mxu1 %v16504_v31  ;;  %v8939_v31 = vld [vmem:[#allocation2 + $0xa9] sm:$0xff] }
 0x6c8   : > { %12722 = vmatmul.mubr.f32.gmra.mrb[22].mxu1 %v16507_v62  ;;  %v8940_v62 = vld [vmem:[#allocation2 + $0xb1] sm:$0xff] }
 0x6c9   : > { %12724 = vmatprep.mubr.f32.mxu1 %v16510_v60  ;;  %v8941_v60 = vld [vmem:[#allocation2 + $0xb9] sm:$0xff] }
 0x6cc   : > { %12725 = vmatmul.mubr.f32.gmra.mrb[24].mxu1 %v16513_v29  ;;  %v8942_v29 = vld [vmem:[#allocation2 + $0xc1] sm:$0xff] }
 0x6cd   : > { %12727 = vmatprep.mubr.f32.mxu1 %v16516_v26  ;;  %v8943_v26 = vld [vmem:[#allocation2 + $0xc9] sm:$0xff] }
 0x6d0   : > { %12728 = vmatmul.mubr.f32.gmra.mrb[26].mxu1 %v16519_v58  ;;  %v8944_v58 = vld [vmem:[#allocation2 + $0xd1] sm:$0xff] }
 0x6d1   : > { %12730 = vmatprep.mubr.f32.mxu1 %v16522_v7  ;;  %v8945_v7 = vld [vmem:[#allocation2 + $0xd9] sm:$0xff] }
 0x6d4   : > { %12731 = vmatmul.mubr.f32.gmra.mrb[28].mxu1 %v16525_v23  ;;  %v8946_v23 = vld [vmem:[#allocation2 + $0xe1] sm:$0xff] }
 0x6d5   : > { %12733 = vmatprep.mubr.f32.mxu1 %v16528_v44  ;;  %v8947_v44 = vld [vmem:[#allocation2 + $0xe9] sm:$0xff] }
 0x6d8   : > { %12734 = vmatmul.mubr.f32.gmra.mrb[30].mxu1 %v16531_v53  ;;  %v8948_v53 = vld [vmem:[#allocation2 + $0xf1] sm:$0xff] }
 0x6d9   : > { %12736 = vmatprep.mubr.f32.mxu1 %v16534_v34  ;;  %v8949_v34 = vld [vmem:[#allocation2 + $0xf9] sm:$0xff] }
 0x6dc   : > { %12737 = vmatmul.mubr.f32.gmra.mrb[32].mxu1 %v16537_v41  ;;  %v8950_v41 = vld [vmem:[#allocation2 + $0x101] sm:$0xff] }
 0x6dd   : > { %12739 = vmatprep.mubr.f32.mxu1 %v16540_v11  ;;  %v8951_v11 = vld [vmem:[#allocation2 + $0x109] sm:$0xff] }
 0x6e0   : > { %12740 = vmatmul.mubr.f32.gmra.mrb[34].mxu1 %v17364_v8  ;;  %v16822_v8 = vld [vmem:[%s17029_s4 + $0x2] ss:$0 sm:$0xff] }
 0x6e1   : > { %12742 = vmatprep.mubr.f32.mxu1 %v17365_v37 }
 0x6e4   : > { %12743 = vmatmul.mubr.f32.gmra.mrb[36].mxu1 %v17366_v9  ;;  %v17370_v9 = vld [vmem:[#allocation10_spill] sm:$0xff] }
 0x6e5   : > { %12745 = vmatprep.mubr.f32.mxu1 %v16552_v15  ;;  %v8952_v15 = vld [vmem:[#allocation2 + $0x111] sm:$0xff] }
 0x6e8   : > { %12746 = vmatmul.mubr.f32.gmra.mrb[38].mxu1 %v13941_v21 }
 0x6e9   : > { %12748 = vmatprep.mubr.f32.mxu1 %v13941_v21 }
 0x6ec   : > { %12749 = vmatmul.mubr.f32.gmra.mrb[40].mxu1 %v13941_v21 }
 0x6ed   : > { %12783 = vmatprep.mubr.f32.mxu1 %v8925_v28 }
 0x6f0   : > { %12784 = vmatmul.mubr.f32.vlgmr.msra.gmra.mrb[42].mxu1 %v8926_v18 }
 0x6f1   : > { %12786 = vmatprep.mubr.f32.mxu1 %v8927_v45 }
 0x6f4   : > { %12787 = vmatmul.mubr.f32.gmra.mrb[44].mxu1 %v8928_v49 }
 0x6f5   : > { %12789 = vmatprep.mubr.f32.mxu1 %v8929_v2 }
 0x6f8   : > { %12790 = vmatmul.mubr.f32.gmra.mrb[46].mxu1 %v8930_v19 }
 0x6f9   : > { %12792 = vmatprep.mubr.f32.mxu1 %v8931_v40 }
 0x6fc   : > { %12793 = vmatmul.mubr.f32.gmra.mrb[0].mxu1 %v8932_v50  ;;  %v17371_v50 = vld [vmem:[#allocation11_spill] sm:$0xff] }
 0x6fd   : > { %12795 = vmatprep.mubr.f32.mxu1 %v8933_v59 }
 0x700   : > { %12796 = vmatmul.mubr.f32.gmra.mrb[2].mxu1 %v8934_v14 }
 0x701   : > { %12798 = vmatprep.mubr.f32.mxu1 %v8935_v6 }
 0x704   : > { %12799 = vmatmul.mubr.f32.gmra.mrb[4].mxu1 %v8936_v1 }
 0x705   : > { %12801 = vmatprep.mubr.f32.mxu1 %v8937_v56  ;;  %v17372_v56 = vld [vmem:[#allocation12_spill] sm:$0xff] }
 0x708   : > { %12802 = vmatmul.mubr.f32.gmra.mrb[6].mxu1 %v8938_v42 }
 0x709   : > { %12804 = vmatprep.mubr.f32.mxu1 %v8939_v31 }
 0x70c   : > { %12805 = vmatmul.mubr.f32.gmra.mrb[8].mxu1 %v8940_v62 }
 0x70d   : > { %12807 = vmatprep.mubr.f32.mxu1 %v8941_v60 }
 0x710   : > { %12808 = vmatmul.mubr.f32.gmra.mrb[10].mxu1 %v8942_v29 }
 0x711   : > { %12810 = vmatprep.mubr.f32.mxu1 %v8943_v26 }
 0x714   : > { %12811 = vmatmul.mubr.f32.gmra.mrb[12].mxu1 %v8944_v58 }
 0x715   : > { %12813 = vmatprep.mubr.f32.mxu1 %v8945_v7 }
 0x718   : > { %12814 = vmatmul.mubr.f32.gmra.mrb[14].mxu1 %v8946_v23 }
 0x719   : > { %12816 = vmatprep.mubr.f32.mxu1 %v8947_v44 }
 0x71c   : > { %12817 = vmatmul.mubr.f32.gmra.mrb[16].mxu1 %v8948_v53 }
 0x71d   : > { %12819 = vmatprep.mubr.f32.mxu1 %v8949_v34 }
 0x720   : > { %12820 = vmatmul.mubr.f32.gmra.mrb[18].mxu1 %v8950_v41 }
 0x721   : > { %12822 = vmatprep.mubr.f32.mxu1 %v8951_v11 }
 0x724   : > { %12823 = vmatmul.mubr.f32.gmra.mrb[20].mxu1 %v8952_v15 }
 0x725   : > { %12825 = vmatprep.mubr.f32.mxu1 %v8953_v43 }
 0x728   : > { %12826 = vmatmul.mubr.f32.gmra.mrb[22].mxu1 %v8954_v30 }
 0x729   : > { %12828 = vmatprep.mubr.f32.mxu1 %v8955_v22 }
 0x72c   : > { %12829 = vmatmul.mubr.f32.gmra.mrb[24].mxu1 %v8956_v54 }
 0x72d   : > { %12831 = vmatprep.mubr.f32.mxu1 %v8957_v52 }
 0x730   : > { %12832 = vmatmul.mubr.f32.gmra.mrb[26].mxu1 %v8958_v36 }
 0x731   : > { %12834 = vmatprep.mubr.f32.mxu1 %v8959_v16 }
 0x734   : > { %12835 = vmatmul.mubr.f32.gmra.mrb[28].mxu1 %v8960_v5 }
 0x735   : > { %12837 = vmatprep.mubr.f32.mxu1 %v8961_v32 }
 0x738   : > { %12838 = vmatmul.mubr.f32.gmra.mrb[30].mxu1 %v8962_v48 }
 0x739   : > { %12840 = vmatprep.mubr.f32.mxu1 %v8963_v55 }
 0x73c   : > { %12841 = vmatmul.mubr.f32.gmra.mrb[32].mxu1 %v8964_v12 }
 0x73d   : > { %12843 = vmatprep.mubr.f32.mxu1 %v8965_v47 }
 0x740   : > { %12844 = vmatmul.mubr.f32.gmra.mrb[34].mxu1 %v8966_v20 }
 0x741   : > { %12846 = vmatprep.mubr.f32.mxu1 %v16649_v25  ;;  %v17368_v25 = vld [vmem:[#allocation5_spill] sm:$0xff] }
 0x744   : > { %12847 = vmatmul.mubr.f32.gmra.mrb[36].mxu1 %v16652_v13 }
 0x745   : > { %12849 = vmatprep.mubr.f32.mxu1 %v16655_v61  ;;  %v16815_v61 = vld [vmem:[%s17029_s4 + $0x1] ss:$0 sm:$0xff] }
 0x748   : > { %12850 = vmatmul.mubr.f32.gmra.mrb[38].mxu1 %v8970_v39 }
 0x749   : > { %12852 = vmatprep.mubr.f32.mxu1 %v8971_v33 }
 0x74c   : > { %12853 = vmatmul.mubr.f32.gmra.mrb[40].mxu1 %v8972_v3 }
 0x7c3   : > { %v12785_v51 = vpop.f32.mrb[42].mxu1 }
 0x7c4   : > { %v13159_v17 = vadd.f32 %v12785_v51, %v17367_v35  ;;  %v9056_v57 = vpop.f32.mrb[43].mxu1 }
 0x7c5   : > { %v13160_v0 = vadd.f32 %v9056_v57, %v17368_v25 }
 0x7c6   : > { %v9349_v13 = vadd.f32 %v13159_v17, %v16806_v63 }
 0x7c7   : > { %v9348_v38 = vadd.f32 %v13160_v0, %v16806_v63  ;;  %v12788_v46 = vpop.f32.mrb[44].mxu1 }
 0x7c8   : > { %v9397_v24 = vmax.f32 %v9349_v13, 0.0  ;;  %v13161_v10 = vadd.f32 %v12788_v46, %v17369_v27  ;;  %v9066_v4 = vpop.f32.mrb[45].mxu1 }
 0x7c9   : > { %v9396_v37 = vmax.f32 %v9348_v38, 0.0  ;;  %v13162_v21 = vadd.f32 %v9066_v4, %v17370_v9 }
 0x7ca   : > { %v9450_v28 = vmul.f32 %v16815_v61, %v9397_v24  ;;  %v9351_v18 = vadd.f32 %v13161_v10, %v16806_v63 }
 0x7cb   : > { %v9449_v45 = vmul.f32 %v16815_v61, %v9396_v37  ;;  %v9350_v49 = vadd.f32 %v13162_v21, %v16806_v63  ;;  %v12791_v2 = vpop.f32.mrb[46].mxu1 }
 0x7cc   : > { %v9503_v19 = vadd.f32 %v16822_v8, %v9450_v28  ;;  %v9399_v40 = vmax.f32 %v9351_v18, 0.0  ;;  %v13163_v59 = vadd.f32 %v12791_v2, %v17371_v50  ;;  %v9076_v14 = vpop.f32.mrb[47].mxu1 }
 0x7cd   : > { %v9502_v6 = vadd.f32 %v16822_v8, %v9449_v45  ;;  %v9398_v1 = vmax.f32 %v9350_v49, 0.0  ;;  %v13164_v42 = vadd.f32 %v9076_v14, %v17372_v56 }
 0x7ce   : > { %9551 = vst [vmem:[%s16830_s7 + $0x8] sm:$0xff] %v9503_v19  ;;  %v9452_v31 = vmul.f32 %v16815_v61, %v9399_v40  ;;  %v9353_v62 = vadd.f32 %v13163_v59, %v16806_v63 }
 0x7cf   : > { %9550 = vst [vmem:[%s16830_s7] sm:$0xff] %v9502_v6  ;;  %v9451_v60 = vmul.f32 %v16815_v61, %v9398_v1  ;;  %v9352_v29 = vadd.f32 %v13164_v42, %v16806_v63  ;;  %v12794_v26 = vpop.f32.mrb[0].mxu1 }
 0x7d0   : > { %v9505_v58 = vadd.f32 %v16822_v8, %v9452_v31  ;;  %v9401_v7 = vmax.f32 %v9353_v62, 0.0  ;;  %v9355_v23 = vadd.f32 %v12794_v26, %v16806_v63  ;;  %v9086_v44 = vpop.f32.mrb[1].mxu1 }
 0x7d1   : > { %v9504_v53 = vadd.f32 %v16822_v8, %v9451_v60  ;;  %v9400_v34 = vmax.f32 %v9352_v29, 0.0  ;;  %v9354_v41 = vadd.f32 %v16806_v63, %v9086_v44 }
 0x7d2   : > { %9553 = vst [vmem:[%s16830_s7 + $0x18] sm:$0xff] %v9505_v58  ;;  %v9454_v11 = vmul.f32 %v16815_v61, %v9401_v7  ;;  %v9403_v15 = vmax.f32 %v9355_v23, 0.0 }
 0x7d3   : > { %9552 = vst [vmem:[%s16830_s7 + $0x10] sm:$0xff] %v9504_v53  ;;  %v9453_v43 = vmul.f32 %v16815_v61, %v9400_v34  ;;  %v9402_v30 = vmax.f32 %v9354_v41, 0.0  ;;  %v12797_v22 = vpop.f32.mrb[2].mxu1 }
 0x7d4   : > { %v9507_v54 = vadd.f32 %v16822_v8, %v9454_v11  ;;  %v9456_v52 = vmul.f32 %v16815_v61, %v9403_v15  ;;  %v9357_v36 = vadd.f32 %v12797_v22, %v16806_v63  ;;  %v9096_v16 = vpop.f32.mrb[3].mxu1 }
 0x7d5   : > { %v9506_v5 = vadd.f32 %v16822_v8, %v9453_v43  ;;  %v9455_v32 = vmul.f32 %v16815_v61, %v9402_v30  ;;  %v9356_v48 = vadd.f32 %v16806_v63, %v9096_v16 }
 0x7d6   : > { %9555 = vst [vmem:[%s16830_s7 + $0x28] sm:$0xff] %v9507_v54  ;;  %v9509_v55 = vadd.f32 %v16822_v8, %v9456_v52  ;;  %v9405_v12 = vmax.f32 %v9357_v36, 0.0 }
 0x7d7   : > { %9554 = vst [vmem:[%s16830_s7 + $0x20] sm:$0xff] %v9506_v5  ;;  %v9508_v47 = vadd.f32 %v16822_v8, %v9455_v32  ;;  %v9404_v20 = vmax.f32 %v9356_v48, 0.0  ;;  %v12800_v39 = vpop.f32.mrb[4].mxu1 }
 0x7d8   : > { %9557 = vst [vmem:[%s16830_s7 + $0x38] sm:$0xff] %v9509_v55  ;;  %v9458_v33 = vmul.f32 %v16815_v61, %v9405_v12  ;;  %v9359_v3 = vadd.f32 %v12800_v39, %v16806_v63  ;;  %v9106_v51 = vpop.f32.mrb[5].mxu1 }
 0x7d9   : > { %9556 = vst [vmem:[%s16830_s7 + $0x30] sm:$0xff] %v9508_v47  ;;  %v9457_v35 = vmul.f32 %v16815_v61, %v9404_v20  ;;  %v9358_v17 = vadd.f32 %v16806_v63, %v9106_v51 }
 0x7da   : > { %v9511_v57 = vadd.f32 %v16822_v8, %v9458_v33  ;;  %v9407_v25 = vmax.f32 %v9359_v3, 0.0 }
 0x7db   : > { %v9510_v0 = vadd.f32 %v16822_v8, %v9457_v35  ;;  %v9406_v13 = vmax.f32 %v9358_v17, 0.0  ;;  %v12803_v38 = vpop.f32.mrb[6].mxu1 }
 0x7dc   : > { %9559 = vst [vmem:[%s16830_s7 + $0x48] sm:$0xff] %v9511_v57  ;;  %v9460_v46 = vmul.f32 %v16815_v61, %v9407_v25  ;;  %v9361_v24 = vadd.f32 %v12803_v38, %v16806_v63  ;;  %v9116_v27 = vpop.f32.mrb[7].mxu1 }
 0x7dd   : > { %9558 = vst [vmem:[%s16830_s7 + $0x40] sm:$0xff] %v9510_v0  ;;  %v9459_v10 = vmul.f32 %v16815_v61, %v9406_v13  ;;  %v9360_v4 = vadd.f32 %v16806_v63, %v9116_v27 }
 0x7de   : > { %v9513_v37 = vadd.f32 %v16822_v8, %v9460_v46  ;;  %v9409_v9 = vmax.f32 %v9361_v24, 0.0 }
 0x7df   : > { %v9512_v21 = vadd.f32 %v16822_v8, %v9459_v10  ;;  %v9408_v28 = vmax.f32 %v9360_v4, 0.0  ;;  %v12806_v18 = vpop.f32.mrb[8].mxu1 }
 0x7e0   : > { %9561 = vst [vmem:[%s16830_s7 + $0x58] sm:$0xff] %v9513_v37  ;;  %v9462_v45 = vmul.f32 %v16815_v61, %v9409_v9  ;;  %v9363_v49 = vadd.f32 %v12806_v18, %v16806_v63  ;;  %v9126_v2 = vpop.f32.mrb[9].mxu1 }
 0x7e1   : > { %9560 = vst [vmem:[%s16830_s7 + $0x50] sm:$0xff] %v9512_v21  ;;  %v9461_v19 = vmul.f32 %v16815_v61, %v9408_v28  ;;  %v9362_v40 = vadd.f32 %v16806_v63, %v9126_v2 }
 0x7e2   : > { %v9515_v50 = vadd.f32 %v16822_v8, %v9462_v45  ;;  %v9411_v59 = vmax.f32 %v9363_v49, 0.0 }
 0x7e3   : > { %v9514_v14 = vadd.f32 %v16822_v8, %v9461_v19  ;;  %v9410_v6 = vmax.f32 %v9362_v40, 0.0  ;;  %v12809_v1 = vpop.f32.mrb[10].mxu1 }
 0x7e4   : > { %9563 = vst [vmem:[%s16830_s7 + $0x68] sm:$0xff] %v9515_v50  ;;  %v9464_v56 = vmul.f32 %v16815_v61, %v9411_v59  ;;  %v9365_v42 = vadd.f32 %v12809_v1, %v16806_v63  ;;  %v9136_v31 = vpop.f32.mrb[11].mxu1 }
 0x7e5   : > { %9562 = vst [vmem:[%s16830_s7 + $0x60] sm:$0xff] %v9514_v14  ;;  %v9463_v62 = vmul.f32 %v16815_v61, %v9410_v6  ;;  %v9364_v60 = vadd.f32 %v16806_v63, %v9136_v31 }
 0x7e6   : > { %v9517_v29 = vadd.f32 %v16822_v8, %v9464_v56  ;;  %v9413_v26 = vmax.f32 %v9365_v42, 0.0 }
 0x7e7   : > { %v9516_v58 = vadd.f32 %v16822_v8, %v9463_v62  ;;  %v9412_v7 = vmax.f32 %v9364_v60, 0.0  ;;  %v12812_v23 = vpop.f32.mrb[12].mxu1 }
 0x7e8   : > { %9565 = vst [vmem:[%s16830_s7 + $0x78] sm:$0xff] %v9517_v29  ;;  %v9466_v44 = vmul.f32 %v16815_v61, %v9413_v26  ;;  %v9367_v53 = vadd.f32 %v12812_v23, %v16806_v63  ;;  %v9146_v34 = vpop.f32.mrb[13].mxu1 }
 0x7e9   : > { %9564 = vst [vmem:[%s16830_s7 + $0x70] sm:$0xff] %v9516_v58  ;;  %v9465_v41 = vmul.f32 %v16815_v61, %v9412_v7  ;;  %v9366_v11 = vadd.f32 %v16806_v63, %v9146_v34 }
 0x7ea   : > { %v9519_v15 = vadd.f32 %v16822_v8, %v9466_v44  ;;  %v9415_v43 = vmax.f32 %v9367_v53, 0.0 }
 0x7eb   : > { %v9518_v30 = vadd.f32 %v16822_v8, %v9465_v41  ;;  %v9414_v22 = vmax.f32 %v9366_v11, 0.0  ;;  %v12815_v54 = vpop.f32.mrb[14].mxu1 }
 0x7ec   : > { %9567 = vst [vmem:[%s16830_s7 + $0x88] sm:$0xff] %v9519_v15  ;;  %v9468_v52 = vmul.f32 %v16815_v61, %v9415_v43  ;;  %v9369_v36 = vadd.f32 %v12815_v54, %v16806_v63  ;;  %v9156_v16 = vpop.f32.mrb[15].mxu1 }
 0x7ed   : > { %9566 = vst [vmem:[%s16830_s7 + $0x80] sm:$0xff] %v9518_v30  ;;  %v9467_v5 = vmul.f32 %v16815_v61, %v9414_v22  ;;  %v9368_v32 = vadd.f32 %v16806_v63, %v9156_v16 }
 0x7ee   : > { %v9521_v48 = vadd.f32 %v16822_v8, %v9468_v52  ;;  %v9417_v55 = vmax.f32 %v9369_v36, 0.0 }
 0x7ef   : > { %v9520_v12 = vadd.f32 %v16822_v8, %v9467_v5  ;;  %v9416_v47 = vmax.f32 %v9368_v32, 0.0  ;;  %v12818_v20 = vpop.f32.mrb[16].mxu1 }
 0x7f0   : > { %9569 = vst [vmem:[%s16830_s7 + $0x98] sm:$0xff] %v9521_v48  ;;  %v9470_v39 = vmul.f32 %v16815_v61, %v9417_v55  ;;  %v9371_v33 = vadd.f32 %v12818_v20, %v16806_v63  ;;  %v9166_v3 = vpop.f32.mrb[17].mxu1 }
 0x7f1   : > { %9568 = vst [vmem:[%s16830_s7 + $0x90] sm:$0xff] %v9520_v12  ;;  %v9469_v51 = vmul.f32 %v16815_v61, %v9416_v47  ;;  %v9370_v35 = vadd.f32 %v16806_v63, %v9166_v3 }
 0x7f2   : > { %v9523_v17 = vadd.f32 %v16822_v8, %v9470_v39  ;;  %v9419_v57 = vmax.f32 %v9371_v33, 0.0 }
 0x7f3   : > { %v9522_v25 = vadd.f32 %v16822_v8, %v9469_v51  ;;  %v9418_v0 = vmax.f32 %v9370_v35, 0.0  ;;  %v12821_v13 = vpop.f32.mrb[18].mxu1 }
 0x7f4   : > { %9571 = vst [vmem:[%s16830_s7 + $0xa8] sm:$0xff] %v9523_v17  ;;  %v9472_v38 = vmul.f32 %v16815_v61, %v9419_v57  ;;  %v9373_v46 = vadd.f32 %v12821_v13, %v16806_v63  ;;  %v9176_v24 = vpop.f32.mrb[19].mxu1 }
 0x7f5   : > { %9570 = vst [vmem:[%s16830_s7 + $0xa0] sm:$0xff] %v9522_v25  ;;  %v9471_v27 = vmul.f32 %v16815_v61, %v9418_v0  ;;  %v9372_v10 = vadd.f32 %v16806_v63, %v9176_v24 }
 0x7f6   : > { %v9525_v4 = vadd.f32 %v16822_v8, %v9472_v38  ;;  %v9421_v37 = vmax.f32 %v9373_v46, 0.0 }
 0x7f7   : > { %v9524_v9 = vadd.f32 %v16822_v8, %v9471_v27  ;;  %v9420_v21 = vmax.f32 %v9372_v10, 0.0  ;;  %v12824_v28 = vpop.f32.mrb[20].mxu1 }
 0x7f8   : > { %9573 = vst [vmem:[%s16830_s7 + $0xb8] sm:$0xff] %v9525_v4  ;;  %v9474_v18 = vmul.f32 %v16815_v61, %v9421_v37  ;;  %v9375_v45 = vadd.f32 %v12824_v28, %v16806_v63  ;;  %v9186_v49 = vpop.f32.mrb[21].mxu1 }
 0x7f9   : > { %9572 = vst [vmem:[%s16830_s7 + $0xb0] sm:$0xff] %v9524_v9  ;;  %v9473_v2 = vmul.f32 %v16815_v61, %v9420_v21  ;;  %v9374_v19 = vadd.f32 %v16806_v63, %v9186_v49 }
 0x7fa   : > { %v9527_v40 = vadd.f32 %v16822_v8, %v9474_v18  ;;  %v9423_v50 = vmax.f32 %v9375_v45, 0.0 }
 0x7fb   : > { %v9526_v59 = vadd.f32 %v16822_v8, %v9473_v2  ;;  %v9422_v14 = vmax.f32 %v9374_v19, 0.0  ;;  %v12827_v6 = vpop.f32.mrb[22].mxu1 }
 0x7fc   : > { %9575 = vst [vmem:[%s16830_s7 + $0xc8] sm:$0xff] %v9527_v40  ;;  %v9476_v1 = vmul.f32 %v16815_v61, %v9423_v50  ;;  %v9377_v56 = vadd.f32 %v12827_v6, %v16806_v63  ;;  %v9196_v42 = vpop.f32.mrb[23].mxu1 }
 0x7fd   : > { %9574 = vst [vmem:[%s16830_s7 + $0xc0] sm:$0xff] %v9526_v59  ;;  %v9475_v31 = vmul.f32 %v16815_v61, %v9422_v14  ;;  %v9376_v62 = vadd.f32 %v16806_v63, %v9196_v42 }
 0x7fe   : > { %v9529_v60 = vadd.f32 %v16822_v8, %v9476_v1  ;;  %v9425_v29 = vmax.f32 %v9377_v56, 0.0 }
 0x7ff   : > { %v9528_v26 = vadd.f32 %v16822_v8, %v9475_v31  ;;  %v9424_v58 = vmax.f32 %v9376_v62, 0.0  ;;  %v12830_v7 = vpop.f32.mrb[24].mxu1 }
 0x800   : > { %9577 = vst [vmem:[%s16830_s7 + $0xd8] sm:$0xff] %v9529_v60  ;;  %v9478_v23 = vmul.f32 %v16815_v61, %v9425_v29  ;;  %v9379_v44 = vadd.f32 %v12830_v7, %v16806_v63  ;;  %v9206_v53 = vpop.f32.mrb[25].mxu1 }
 0x801   : > { %9576 = vst [vmem:[%s16830_s7 + $0xd0] sm:$0xff] %v9528_v26  ;;  %v9477_v34 = vmul.f32 %v16815_v61, %v9424_v58  ;;  %v9378_v41 = vadd.f32 %v16806_v63, %v9206_v53 }
 0x802   : > { %v9531_v11 = vadd.f32 %v16822_v8, %v9478_v23  ;;  %v9427_v15 = vmax.f32 %v9379_v44, 0.0 }
 0x803   : > { %v9530_v43 = vadd.f32 %v16822_v8, %v9477_v34  ;;  %v9426_v30 = vmax.f32 %v9378_v41, 0.0  ;;  %v12833_v22 = vpop.f32.mrb[26].mxu1 }
 0x804   : > { %9579 = vst [vmem:[%s16830_s7 + $0xe8] sm:$0xff] %v9531_v11  ;;  %v9480_v54 = vmul.f32 %v16815_v61, %v9427_v15  ;;  %v9381_v52 = vadd.f32 %v12833_v22, %v16806_v63  ;;  %v9216_v36 = vpop.f32.mrb[27].mxu1 }
 0x805   : > { %9578 = vst [vmem:[%s16830_s7 + $0xe0] sm:$0xff] %v9530_v43  ;;  %v9479_v16 = vmul.f32 %v16815_v61, %v9426_v30  ;;  %v9380_v5 = vadd.f32 %v16806_v63, %v9216_v36 }
 0x806   : > { %v9533_v32 = vadd.f32 %v16822_v8, %v9480_v54  ;;  %v9429_v48 = vmax.f32 %v9381_v52, 0.0 }
 0x807   : > { %v9532_v55 = vadd.f32 %v16822_v8, %v9479_v16  ;;  %v9428_v12 = vmax.f32 %v9380_v5, 0.0  ;;  %v12836_v47 = vpop.f32.mrb[28].mxu1 }
 0x808   : > { %9581 = vst [vmem:[%s16830_s7 + $0xf8] sm:$0xff] %v9533_v32  ;;  %v9482_v20 = vmul.f32 %v16815_v61, %v9429_v48  ;;  %v9383_v39 = vadd.f32 %v12836_v47, %v16806_v63  ;;  %v9226_v33 = vpop.f32.mrb[29].mxu1 }
 0x809   : > { %9580 = vst [vmem:[%s16830_s7 + $0xf0] sm:$0xff] %v9532_v55  ;;  %v9481_v3 = vmul.f32 %v16815_v61, %v9428_v12  ;;  %v9382_v51 = vadd.f32 %v16806_v63, %v9226_v33 }
 0x80a   : > { %v9535_v35 = vadd.f32 %v16822_v8, %v9482_v20  ;;  %v9431_v17 = vmax.f32 %v9383_v39, 0.0 }
 0x80b   : > { %v9534_v57 = vadd.f32 %v16822_v8, %v9481_v3  ;;  %v9430_v25 = vmax.f32 %v9382_v51, 0.0  ;;  %v12839_v0 = vpop.f32.mrb[30].mxu1 }
 0x80c   : > { %9583 = vst [vmem:[%s16830_s7 + $0x108] sm:$0xff] %v9535_v35  ;;  %v9484_v13 = vmul.f32 %v16815_v61, %v9431_v17  ;;  %v9385_v38 = vadd.f32 %v12839_v0, %v16806_v63  ;;  %v9236_v46 = vpop.f32.mrb[31].mxu1 }
 0x80d   : > { %9582 = vst [vmem:[%s16830_s7 + $0x100] sm:$0xff] %v9534_v57  ;;  %v9483_v24 = vmul.f32 %v16815_v61, %v9430_v25  ;;  %v9384_v27 = vadd.f32 %v16806_v63, %v9236_v46 }
 0x80e   : > { %v9537_v10 = vadd.f32 %v16822_v8, %v9484_v13  ;;  %v9433_v4 = vmax.f32 %v9385_v38, 0.0 }
 0x80f   : > { %v9536_v37 = vadd.f32 %v16822_v8, %v9483_v24  ;;  %v9432_v9 = vmax.f32 %v9384_v27, 0.0  ;;  %v12842_v21 = vpop.f32.mrb[32].mxu1 }
 0x810   : > { %9585 = vst [vmem:[%s16830_s7 + $0x118] sm:$0xff] %v9537_v10  ;;  %v9486_v28 = vmul.f32 %v16815_v61, %v9433_v4  ;;  %v9387_v18 = vadd.f32 %v12842_v21, %v16806_v63  ;;  %v9246_v45 = vpop.f32.mrb[33].mxu1 }
 0x811   : > { %9584 = vst [vmem:[%s16830_s7 + $0x110] sm:$0xff] %v9536_v37  ;;  %v9485_v49 = vmul.f32 %v16815_v61, %v9432_v9  ;;  %v9386_v2 = vadd.f32 %v16806_v63, %v9246_v45 }
 0x812   : > { %v9539_v19 = vadd.f32 %v16822_v8, %v9486_v28  ;;  %v9435_v40 = vmax.f32 %v9387_v18, 0.0 }
 0x813   : > { %v9538_v50 = vadd.f32 %v16822_v8, %v9485_v49  ;;  %v9434_v59 = vmax.f32 %v9386_v2, 0.0  ;;  %v12845_v14 = vpop.f32.mrb[34].mxu1 }
 0x814   : > { %9587 = vst [vmem:[%s16830_s7 + $0x128] sm:$0xff] %v9539_v19  ;;  %v9488_v6 = vmul.f32 %v16815_v61, %v9435_v40  ;;  %v9389_v1 = vadd.f32 %v12845_v14, %v16806_v63  ;;  %v9256_v56 = vpop.f32.mrb[35].mxu1 }
 0x815   : > { %9586 = vst [vmem:[%s16830_s7 + $0x120] sm:$0xff] %v9538_v50  ;;  %v9487_v42 = vmul.f32 %v16815_v61, %v9434_v59  ;;  %v9388_v31 = vadd.f32 %v16806_v63, %v9256_v56 }
 0x816   : > { %v9541_v62 = vadd.f32 %v16822_v8, %v9488_v6  ;;  %v9437_v60 = vmax.f32 %v9389_v1, 0.0 }
 0x817   : > { %v9540_v29 = vadd.f32 %v16822_v8, %v9487_v42  ;;  %v9436_v26 = vmax.f32 %v9388_v31, 0.0  ;;  %v12848_v58 = vpop.f32.mrb[36].mxu1 }
 0x818   : > { %9589 = vst [vmem:[%s16830_s7 + $0x138] sm:$0xff] %v9541_v62  ;;  %v9490_v7 = vmul.f32 %v16815_v61, %v9437_v60  ;;  %v9391_v23 = vadd.f32 %v12848_v58, %v16806_v63  ;;  %v9266_v44 = vpop.f32.mrb[37].mxu1 }
 0x819   : > { %9588 = vst [vmem:[%s16830_s7 + $0x130] sm:$0xff] %v9540_v29  ;;  %v9489_v53 = vmul.f32 %v16815_v61, %v9436_v26  ;;  %v9390_v34 = vadd.f32 %v16806_v63, %v9266_v44 }
 0x81a   : > { %v9543_v41 = vadd.f32 %v16822_v8, %v9490_v7  ;;  %v9439_v11 = vmax.f32 %v9391_v23, 0.0 }
 0x81b   : > { %v9542_v15 = vadd.f32 %v16822_v8, %v9489_v53  ;;  %v9438_v43 = vmax.f32 %v9390_v34, 0.0  ;;  %v12851_v30 = vpop.f32.mrb[38].mxu1 }
 0x81c   : > { %9591 = vst [vmem:[%s16830_s7 + $0x148] sm:$0xff] %v9543_v41  ;;  %v9492_v22 = vmul.f32 %v16815_v61, %v9439_v11  ;;  %v9393_v54 = vadd.f32 %v12851_v30, %v16806_v63  ;;  %v9276_v52 = vpop.f32.mrb[39].mxu1 }
 0x81d   : > { %9590 = vst [vmem:[%s16830_s7 + $0x140] sm:$0xff] %v9542_v15  ;;  %v9491_v36 = vmul.f32 %v16815_v61, %v9438_v43  ;;  %v9392_v16 = vadd.f32 %v16806_v63, %v9276_v52 }
 0x81e   : > { %v9545_v5 = vadd.f32 %v16822_v8, %v9492_v22  ;;  %v9441_v32 = vmax.f32 %v9393_v54, 0.0 }
 0x81f   : > { %v9544_v48 = vadd.f32 %v16822_v8, %v9491_v36  ;;  %v9440_v55 = vmax.f32 %v9392_v16, 0.0  ;;  %v12854_v12 = vpop.f32.mrb[40].mxu1 }
 0x820   : > { %9593 = vst [vmem:[%s16830_s7 + $0x158] sm:$0xff] %v9545_v5  ;;  %v9494_v47 = vmul.f32 %v16815_v61, %v9441_v32  ;;  %v9395_v20 = vadd.f32 %v12854_v12, %v16806_v63  ;;  %v9286_v39 = vpop.f32.mrb[41].mxu1 }
 0x821   : > { %9592 = vst [vmem:[%s16830_s7 + $0x150] sm:$0xff] %v9544_v48  ;;  %v9493_v33 = vmul.f32 %v16815_v61, %v9440_v55  ;;  %v9394_v3 = vadd.f32 %v16806_v63, %v9286_v39 }
 0x822   : > { %v9547_v51 = vadd.f32 %v16822_v8, %v9494_v47  ;;  %v9443_v35 = vmax.f32 %v9395_v20, 0.0 }
 0x823   : > { %v9546_v17 = vadd.f32 %v16822_v8, %v9493_v33  ;;  %v9442_v57 = vmax.f32 %v9394_v3, 0.0 }
 0x824   : > { %9595 = vst [vmem:[%s16830_s7 + $0x168] sm:$0xff] %v9547_v51  ;;  %v9496_v25 = vmul.f32 %v16815_v61, %v9443_v35 }
 0x825   : > { %9594 = vst [vmem:[%s16830_s7 + $0x160] sm:$0xff] %v9546_v17  ;;  %v9495_v0 = vmul.f32 %v16815_v61, %v9442_v57 }
 0x826   : > { %v9549_v13 = vadd.f32 %v16822_v8, %v9496_v25 }
 0x827   : > { %v9548_v38 = vadd.f32 %v16822_v8, %v9495_v0 }
 0x828   : > { %9597 = vst [vmem:[%s16830_s7 + $0x178] sm:$0xff] %v9549_v13 }
 0x829   : > { %9596 = vst [vmem:[%s16830_s7 + $0x170] sm:$0xff] %v9548_v38 }
 0x82a PF: > { %s16_s21 = sadd.s32 1, %s13948_s21  }
 0x82b   : > { %p13_p4 = scmp.ge.s32.totalorder %s16_s21, 4  }
 0x82d   :  { %15 = sbr.rel (!%p13_p4) target bundleno = 1 (0x1), region = 90 }

</bundles_post_ra>
